<compile_context>
chip_gen: v5e
topology: v5e:2x2
jax: 0.10.0
libtpu: 0.0.40
codegen_flags: <defaults>
</compile_context>

<pallas_src>
import jax
import jax.numpy as jnp
from jax.experimental import pallas as pl
from jax.experimental.pallas import tpu as pltpu

EPS = 1e-8


def _pool_windows(W, H, D, patch):
    """Static list of ceil_mode pooling windows (start/stop per spatial axis) and pooled dims."""
    pw, ph, pd = patch
    Wp, Hp, Dp = -(-W // pw), -(-H // ph), -(-D // pd)
    wins = []
    for iw in range(Wp):
        for ih in range(Hp):
            for idd in range(Dp):
                wins.append((iw * pw, min((iw + 1) * pw, W),
                             ih * ph, min((ih + 1) * ph, H),
                             idd * pd, min((idd + 1) * pd, D)))
    return wins, (Wp, Hp, Dp)


def _make_kernel(C, windows, M):
    """Per-batch-element kernel: fused max-pool -> normalized gram -> squared-diff sum."""
    use_mxu = (M >= 128) and (C >= 32)   # reserve the MXU for grams that can actually fill it

    def _pool(ref):
        # ref: (1, C, W, H, D) block in VMEM (native dtype). Returns pooled features (C, M) f32.
        cols = []
        for (w0, w1, h0, h1, d0, d1) in windows:
            blk = ref[0, :, w0:w1, h0:h1, d0:d1].astype(jnp.float32)   # (C, pw', ph', pd')
            r = jnp.max(blk, axis=3)                                   # lane reduce (D window)
            r = jnp.max(r, axis=2)                                     # lane reduce (H window)
            cols.append(jnp.max(r, axis=1, keepdims=True))             # (C, 1)
        return jnp.concatenate(cols, axis=1)                           # (C, M)

    def kernel(fs_ref, ft_ref, out_ref):
        ps = _pool(fs_ref)   # (C, M) f32, student
        pt = _pool(ft_ref)   # (C, M) f32, teacher

        # Column L2 norms (same EPS placement as the reference) and their exact reciprocals (EUP).
        inv_s = pl.reciprocal(jnp.sqrt(jnp.sum(ps * ps, axis=0, keepdims=True)) + EPS,
                              approx=False)                            # (1, M)
        inv_t = pl.reciprocal(jnp.sqrt(jnp.sum(pt * pt, axis=0, keepdims=True)) + EPS,
                              approx=False)                            # (1, M)

        if use_mxu:
            # Gram-first on the MXU, then scale rows/cols by the reciprocal norms.
            # TODO(synk): for very fine pooling (M >~ 1024) the (M, M) grams should be tiled into
            # panels with an explicit vmem_limit_bytes (v7x only has 64 MiB VMEM).
            dims = (((0,), (0,)), ((), ()))
            gs = jax.lax.dot_general(ps, ps, dims, preferred_element_type=jnp.float32)
            gt = jax.lax.dot_general(pt, pt, dims, preferred_element_type=jnp.float32)
            gs = gs * jnp.reshape(inv_s, (M, 1)) * inv_s
            gt = gt * jnp.reshape(inv_t, (M, 1)) * inv_t
            diff = gt - gs
            acc = jnp.sum(diff * diff).reshape(1, 1)
        else:
            # Tiny pooled gram (e.g. M=8, C=4): build it row-by-row on the VPU — an MXU matmul
            # would be <1% occupied and still pay feed/drain latency.
            acc = jnp.zeros((1, 1), jnp.float32)
            for m in range(M):
                rs = (jnp.sum(ps[:, m:m + 1] * ps, axis=0, keepdims=True)
                      * (inv_s[:, m:m + 1] * inv_s))                   # normalized gram row (1, M)
                rt = (jnp.sum(pt[:, m:m + 1] * pt, axis=0, keepdims=True)
                      * (inv_t[:, m:m + 1] * inv_t))
                d = rt - rs
                acc = acc + jnp.sum(d * d, axis=1, keepdims=True)      # (1, 1)

        # Lane-dense per-batch partial (summed in the wrapper); lets the batch axis be "parallel".
        out_ref[...] = jnp.broadcast_to(acc, (1, 1, 128))

    return kernel


def pairwise_loss_pallas(feat_S, feat_T, scale=0.5, loss_weight=1.0):
    """SKD pair-wise distillation loss; forward-equivalent to the PyTorch module."""
    assert feat_S.shape == feat_T.shape
    N, C, W, H, D = feat_T.shape
    patch = (int(W * scale), int(H * scale), int(D * scale))
    assert min(patch) >= 1, "scale too small for the given spatial dims"

    windows, (Wp, Hp, Dp) = _pool_windows(W, H, D, patch)
    M = Wp * Hp * Dp

    kernel = _make_kernel(C, windows, M)

    partials = pl.pallas_call(
        kernel,
        out_shape=jax.ShapeDtypeStruct((N, 1, 128), jnp.float32),
        grid_spec=pltpu.PrefetchScalarGridSpec(
            num_scalar_prefetch=0,
            grid=(N,),
            in_specs=[
                pl.BlockSpec((1, C, W, H, D), lambda n: (n, 0, 0, 0, 0)),
                pl.BlockSpec((1, C, W, H, D), lambda n: (n, 0, 0, 0, 0)),
            ],
            out_specs=pl.BlockSpec((1, 1, 128), lambda n: (n, 0, 0)),
        ),
        compiler_params=pltpu.CompilerParams(dimension_semantics=("parallel",)),
    )(feat_S, feat_T)

    # sim_err = (G_T - G_S)^2 / M^2 / N, summed over batch and all (m, n) pairs.
    sim_dis = jnp.sum(partials[:, 0, 0]) / jnp.float32(M * M) / jnp.float32(N)
    return jnp.float32(loss_weight) * sim_dis


def pairwise_loss_reference(feat_S, feat_T, scale=0.5, loss_weight=1.0):
    """Pure-JAX port of the PyTorch module (ceil_mode max-pool + normalized gram), for checking."""
    N, C, W, H, D = feat_T.shape
    patch = (int(W * scale), int(H * scale), int(D * scale))
    windows, (Wp, Hp, Dp) = _pool_windows(W, H, D, patch)
    M = Wp * Hp * Dp

    def pool_flat(x):
        cells = [jnp.max(x[:, :, w0:w1, h0:h1, d0:d1], axis=(2, 3, 4))
                 for (w0, w1, h0, h1, d0, d1) in windows]
        return jnp.stack(cells, axis=-1)              # (N, C, M)

    def sim(f):
        f = f.astype(jnp.float32)
        l2 = jnp.sqrt(jnp.sum(f * f, axis=1, keepdims=True)) + EPS
        f = f / l2
        return jnp.einsum('icm,icn->imn', f, f)

    err = (sim(pool_flat(feat_T)) - sim(pool_flat(feat_S))) ** 2 / float(M) ** 2 / N
    return loss_weight * err.sum()


if __name__ == "__main__":
    key = jax.random.PRNGKey(0)
    k1, k2, k3, k4 = jax.random.split(key, 4)

    # Case 1: module defaults — (N, C, W, H, D) = (2, 4, 16, 16, 16), scale=0.5 → patch 8^3, M=8.
    feat_S = jax.random.normal(k1, (2, 4, 16, 16, 16), dtype=jnp.float32)
    feat_T = jax.random.normal(k2, (2, 4, 16, 16, 16), dtype=jnp.float32)
    loss = pairwise_loss_pallas(feat_S, feat_T, scale=0.5, loss_weight=1.0)
    jax.block_until_ready(loss)
    ref = pairwise_loss_reference(feat_S, feat_T, scale=0.5, loss_weight=1.0)
    assert jnp.allclose(loss, ref, rtol=2e-5, atol=2e-6), (loss, ref)

    # Case 2: ceil_mode (non-divisible windows) + bf16 inputs DMA'd straight into the kernel.
    feat_S2 = jax.random.normal(k3, (2, 3, 6, 10, 14), dtype=jnp.float32).astype(jnp.bfloat16)
    feat_T2 = jax.random.normal(k4, (2, 3, 6, 10, 14), dtype=jnp.float32).astype(jnp.bfloat16)
    loss2 = pairwise_loss_pallas(feat_S2, feat_T2, scale=0.4, loss_weight=0.5)
    jax.block_until_ready(loss2)
    ref2 = pairwise_loss_reference(feat_S2, feat_T2, scale=0.4, loss_weight=0.5)
    assert jnp.allclose(loss2, ref2, rtol=2e-5, atol=2e-6), (loss2, ref2)

    print("KERNEL_OK")
</pallas_src>

<mosaic_0001>
module attributes {stable_mosaic.version = 11 : i64} {
  func.func @kernel(%arg0: i32, %arg1: memref<1x4x16x16x16xf32, #tpu.memory_space<vmem>>, %arg2: memref<1x4x16x16x16xf32, #tpu.memory_space<vmem>>, %arg3: memref<1x1x128xf32, #tpu.memory_space<vmem>>) attributes {dimension_semantics = [#tpu.dimension_semantics<parallel>], iteration_bounds = array<i64: 2>, scalar_prefetch = 0 : i64, scratch_operands = 0 : i64, tpu.core_type = #tpu.core_type<tc>, window_params = [{transform_indices = @transform_0, window_bounds = array<i64: 1, 4, 16, 16, 16>}, {transform_indices = @transform_1, window_bounds = array<i64: 1, 4, 16, 16, 16>}, {transform_indices = @transform_2, window_bounds = array<i64: 1, 1, 128>}]} {
    %c0 = arith.constant 0 : index
    %c0_0 = arith.constant 0 : index
    %c0_1 = arith.constant 0 : index
    %c0_2 = arith.constant 0 : index
    %c0_3 = arith.constant 0 : index
    %0 = vector.load %arg1[%c0, %c0_0, %c0_1, %c0_2, %c0_3] : memref<1x4x16x16x16xf32, #tpu.memory_space<vmem>>, vector<1x4x8x8x8xf32>
    %1 = vector.shape_cast %0 : vector<1x4x8x8x8xf32> to vector<4x8x8x8xf32>
    %cst = arith.constant dense<0xFF800000> : vector<4x8x8xf32>
    %2 = vector.multi_reduction <maximumf>, %1, %cst [3] : vector<4x8x8x8xf32> to vector<4x8x8xf32>
    %cst_4 = arith.constant dense<0xFF800000> : vector<4x8xf32>
    %3 = vector.multi_reduction <maximumf>, %2, %cst_4 [2] : vector<4x8x8xf32> to vector<4x8xf32>
    %cst_5 = arith.constant dense<0xFF800000> : vector<4xf32>
    %4 = vector.multi_reduction <maximumf>, %3, %cst_5 [1] : vector<4x8xf32> to vector<4xf32>
    %5 = vector.shape_cast %4 : vector<4xf32> to vector<4x1xf32>
    %c0_6 = arith.constant 0 : index
    %c0_7 = arith.constant 0 : index
    %c0_8 = arith.constant 0 : index
    %c0_9 = arith.constant 0 : index
    %c8 = arith.constant 8 : index
    %6 = vector.load %arg1[%c0_6, %c0_7, %c0_8, %c0_9, %c8] : memref<1x4x16x16x16xf32, #tpu.memory_space<vmem>>, vector<1x4x8x8x8xf32>
    %7 = vector.shape_cast %6 : vector<1x4x8x8x8xf32> to vector<4x8x8x8xf32>
    %cst_10 = arith.constant dense<0xFF800000> : vector<4x8x8xf32>
    %8 = vector.multi_reduction <maximumf>, %7, %cst_10 [3] : vector<4x8x8x8xf32> to vector<4x8x8xf32>
    %cst_11 = arith.constant dense<0xFF800000> : vector<4x8xf32>
    %9 = vector.multi_reduction <maximumf>, %8, %cst_11 [2] : vector<4x8x8xf32> to vector<4x8xf32>
    %cst_12 = arith.constant dense<0xFF800000> : vector<4xf32>
    %10 = vector.multi_reduction <maximumf>, %9, %cst_12 [1] : vector<4x8xf32> to vector<4xf32>
    %11 = vector.shape_cast %10 : vector<4xf32> to vector<4x1xf32>
    %c0_13 = arith.constant 0 : index
    %c0_14 = arith.constant 0 : index
    %c0_15 = arith.constant 0 : index
    %c8_16 = arith.constant 8 : index
    %c0_17 = arith.constant 0 : index
    %12 = vector.load %arg1[%c0_13, %c0_14, %c0_15, %c8_16, %c0_17] : memref<1x4x16x16x16xf32, #tpu.memory_space<vmem>>, vector<1x4x8x8x8xf32>
    %13 = vector.shape_cast %12 : vector<1x4x8x8x8xf32> to vector<4x8x8x8xf32>
    %cst_18 = arith.constant dense<0xFF800000> : vector<4x8x8xf32>
    %14 = vector.multi_reduction <maximumf>, %13, %cst_18 [3] : vector<4x8x8x8xf32> to vector<4x8x8xf32>
    %cst_19 = arith.constant dense<0xFF800000> : vector<4x8xf32>
    %15 = vector.multi_reduction <maximumf>, %14, %cst_19 [2] : vector<4x8x8xf32> to vector<4x8xf32>
    %cst_20 = arith.constant dense<0xFF800000> : vector<4xf32>
    %16 = vector.multi_reduction <maximumf>, %15, %cst_20 [1] : vector<4x8xf32> to vector<4xf32>
    %17 = vector.shape_cast %16 : vector<4xf32> to vector<4x1xf32>
    %c0_21 = arith.constant 0 : index
    %c0_22 = arith.constant 0 : index
    %c0_23 = arith.constant 0 : index
    %c8_24 = arith.constant 8 : index
    %c8_25 = arith.constant 8 : index
    %18 = vector.load %arg1[%c0_21, %c0_22, %c0_23, %c8_24, %c8_25] : memref<1x4x16x16x16xf32, #tpu.memory_space<vmem>>, vector<1x4x8x8x8xf32>
    %19 = vector.shape_cast %18 : vector<1x4x8x8x8xf32> to vector<4x8x8x8xf32>
    %cst_26 = arith.constant dense<0xFF800000> : vector<4x8x8xf32>
    %20 = vector.multi_reduction <maximumf>, %19, %cst_26 [3] : vector<4x8x8x8xf32> to vector<4x8x8xf32>
    %cst_27 = arith.constant dense<0xFF800000> : vector<4x8xf32>
    %21 = vector.multi_reduction <maximumf>, %20, %cst_27 [2] : vector<4x8x8xf32> to vector<4x8xf32>
    %cst_28 = arith.constant dense<0xFF800000> : vector<4xf32>
    %22 = vector.multi_reduction <maximumf>, %21, %cst_28 [1] : vector<4x8xf32> to vector<4xf32>
    %23 = vector.shape_cast %22 : vector<4xf32> to vector<4x1xf32>
    %c0_29 = arith.constant 0 : index
    %c0_30 = arith.constant 0 : index
    %c8_31 = arith.constant 8 : index
    %c0_32 = arith.constant 0 : index
    %c0_33 = arith.constant 0 : index
    %24 = vector.load %arg1[%c0_29, %c0_30, %c8_31, %c0_32, %c0_33] : memref<1x4x16x16x16xf32, #tpu.memory_space<vmem>>, vector<1x4x8x8x8xf32>
    %25 = vector.shape_cast %24 : vector<1x4x8x8x8xf32> to vector<4x8x8x8xf32>
    %cst_34 = arith.constant dense<0xFF800000> : vector<4x8x8xf32>
    %26 = vector.multi_reduction <maximumf>, %25, %cst_34 [3] : vector<4x8x8x8xf32> to vector<4x8x8xf32>
    %cst_35 = arith.constant dense<0xFF800000> : vector<4x8xf32>
    %27 = vector.multi_reduction <maximumf>, %26, %cst_35 [2] : vector<4x8x8xf32> to vector<4x8xf32>
    %cst_36 = arith.constant dense<0xFF800000> : vector<4xf32>
    %28 = vector.multi_reduction <maximumf>, %27, %cst_36 [1] : vector<4x8xf32> to vector<4xf32>
    %29 = vector.shape_cast %28 : vector<4xf32> to vector<4x1xf32>
    %c0_37 = arith.constant 0 : index
    %c0_38 = arith.constant 0 : index
    %c8_39 = arith.constant 8 : index
    %c0_40 = arith.constant 0 : index
    %c8_41 = arith.constant 8 : index
    %30 = vector.load %arg1[%c0_37, %c0_38, %c8_39, %c0_40, %c8_41] : memref<1x4x16x16x16xf32, #tpu.memory_space<vmem>>, vector<1x4x8x8x8xf32>
    %31 = vector.shape_cast %30 : vector<1x4x8x8x8xf32> to vector<4x8x8x8xf32>
    %cst_42 = arith.constant dense<0xFF800000> : vector<4x8x8xf32>
    %32 = vector.multi_reduction <maximumf>, %31, %cst_42 [3] : vector<4x8x8x8xf32> to vector<4x8x8xf32>
    %cst_43 = arith.constant dense<0xFF800000> : vector<4x8xf32>
    %33 = vector.multi_reduction <maximumf>, %32, %cst_43 [2] : vector<4x8x8xf32> to vector<4x8xf32>
    %cst_44 = arith.constant dense<0xFF800000> : vector<4xf32>
    %34 = vector.multi_reduction <maximumf>, %33, %cst_44 [1] : vector<4x8xf32> to vector<4xf32>
    %35 = vector.shape_cast %34 : vector<4xf32> to vector<4x1xf32>
    %c0_45 = arith.constant 0 : index
    %c0_46 = arith.constant 0 : index
    %c8_47 = arith.constant 8 : index
    %c8_48 = arith.constant 8 : index
    %c0_49 = arith.constant 0 : index
    %36 = vector.load %arg1[%c0_45, %c0_46, %c8_47, %c8_48, %c0_49] : memref<1x4x16x16x16xf32, #tpu.memory_space<vmem>>, vector<1x4x8x8x8xf32>
    %37 = vector.shape_cast %36 : vector<1x4x8x8x8xf32> to vector<4x8x8x8xf32>
    %cst_50 = arith.constant dense<0xFF800000> : vector<4x8x8xf32>
    %38 = vector.multi_reduction <maximumf>, %37, %cst_50 [3] : vector<4x8x8x8xf32> to vector<4x8x8xf32>
    %cst_51 = arith.constant dense<0xFF800000> : vector<4x8xf32>
    %39 = vector.multi_reduction <maximumf>, %38, %cst_51 [2] : vector<4x8x8xf32> to vector<4x8xf32>
    %cst_52 = arith.constant dense<0xFF800000> : vector<4xf32>
    %40 = vector.multi_reduction <maximumf>, %39, %cst_52 [1] : vector<4x8xf32> to vector<4xf32>
    %41 = vector.shape_cast %40 : vector<4xf32> to vector<4x1xf32>
    %c0_53 = arith.constant 0 : index
    %c0_54 = arith.constant 0 : index
    %c8_55 = arith.constant 8 : index
    %c8_56 = arith.constant 8 : index
    %c8_57 = arith.constant 8 : index
    %42 = vector.load %arg1[%c0_53, %c0_54, %c8_55, %c8_56, %c8_57] : memref<1x4x16x16x16xf32, #tpu.memory_space<vmem>>, vector<1x4x8x8x8xf32>
    %43 = vector.shape_cast %42 : vector<1x4x8x8x8xf32> to vector<4x8x8x8xf32>
    %cst_58 = arith.constant dense<0xFF800000> : vector<4x8x8xf32>
    %44 = vector.multi_reduction <maximumf>, %43, %cst_58 [3] : vector<4x8x8x8xf32> to vector<4x8x8xf32>
    %cst_59 = arith.constant dense<0xFF800000> : vector<4x8xf32>
    %45 = vector.multi_reduction <maximumf>, %44, %cst_59 [2] : vector<4x8x8xf32> to vector<4x8xf32>
    %cst_60 = arith.constant dense<0xFF800000> : vector<4xf32>
    %46 = vector.multi_reduction <maximumf>, %45, %cst_60 [1] : vector<4x8xf32> to vector<4xf32>
    %47 = vector.shape_cast %46 : vector<4xf32> to vector<4x1xf32>
    %48 = tpu.concatenate %5, %11, %17, %23, %29, %35, %41, %47 in 1 : vector<4x1xf32>, vector<4x1xf32>, vector<4x1xf32>, vector<4x1xf32>, vector<4x1xf32>, vector<4x1xf32>, vector<4x1xf32>, vector<4x1xf32> -> vector<4x8xf32>
    %c0_61 = arith.constant 0 : index
    %c0_62 = arith.constant 0 : index
    %c0_63 = arith.constant 0 : index
    %c0_64 = arith.constant 0 : index
    %c0_65 = arith.constant 0 : index
    %49 = vector.load %arg2[%c0_61, %c0_62, %c0_63, %c0_64, %c0_65] : memref<1x4x16x16x16xf32, #tpu.memory_space<vmem>>, vector<1x4x8x8x8xf32>
    %50 = vector.shape_cast %49 : vector<1x4x8x8x8xf32> to vector<4x8x8x8xf32>
    %cst_66 = arith.constant dense<0xFF800000> : vector<4x8x8xf32>
    %51 = vector.multi_reduction <maximumf>, %50, %cst_66 [3] : vector<4x8x8x8xf32> to vector<4x8x8xf32>
    %cst_67 = arith.constant dense<0xFF800000> : vector<4x8xf32>
    %52 = vector.multi_reduction <maximumf>, %51, %cst_67 [2] : vector<4x8x8xf32> to vector<4x8xf32>
    %cst_68 = arith.constant dense<0xFF800000> : vector<4xf32>
    %53 = vector.multi_reduction <maximumf>, %52, %cst_68 [1] : vector<4x8xf32> to vector<4xf32>
    %54 = vector.shape_cast %53 : vector<4xf32> to vector<4x1xf32>
    %c0_69 = arith.constant 0 : index
    %c0_70 = arith.constant 0 : index
    %c0_71 = arith.constant 0 : index
    %c0_72 = arith.constant 0 : index
    %c8_73 = arith.constant 8 : index
    %55 = vector.load %arg2[%c0_69, %c0_70, %c0_71, %c0_72, %c8_73] : memref<1x4x16x16x16xf32, #tpu.memory_space<vmem>>, vector<1x4x8x8x8xf32>
    %56 = vector.shape_cast %55 : vector<1x4x8x8x8xf32> to vector<4x8x8x8xf32>
    %cst_74 = arith.constant dense<0xFF800000> : vector<4x8x8xf32>
    %57 = vector.multi_reduction <maximumf>, %56, %cst_74 [3] : vector<4x8x8x8xf32> to vector<4x8x8xf32>
    %cst_75 = arith.constant dense<0xFF800000> : vector<4x8xf32>
    %58 = vector.multi_reduction <maximumf>, %57, %cst_75 [2] : vector<4x8x8xf32> to vector<4x8xf32>
    %cst_76 = arith.constant dense<0xFF800000> : vector<4xf32>
    %59 = vector.multi_reduction <maximumf>, %58, %cst_76 [1] : vector<4x8xf32> to vector<4xf32>
    %60 = vector.shape_cast %59 : vector<4xf32> to vector<4x1xf32>
    %c0_77 = arith.constant 0 : index
    %c0_78 = arith.constant 0 : index
    %c0_79 = arith.constant 0 : index
    %c8_80 = arith.constant 8 : index
    %c0_81 = arith.constant 0 : index
    %61 = vector.load %arg2[%c0_77, %c0_78, %c0_79, %c8_80, %c0_81] : memref<1x4x16x16x16xf32, #tpu.memory_space<vmem>>, vector<1x4x8x8x8xf32>
    %62 = vector.shape_cast %61 : vector<1x4x8x8x8xf32> to vector<4x8x8x8xf32>
    %cst_82 = arith.constant dense<0xFF800000> : vector<4x8x8xf32>
    %63 = vector.multi_reduction <maximumf>, %62, %cst_82 [3] : vector<4x8x8x8xf32> to vector<4x8x8xf32>
    %cst_83 = arith.constant dense<0xFF800000> : vector<4x8xf32>
    %64 = vector.multi_reduction <maximumf>, %63, %cst_83 [2] : vector<4x8x8xf32> to vector<4x8xf32>
    %cst_84 = arith.constant dense<0xFF800000> : vector<4xf32>
    %65 = vector.multi_reduction <maximumf>, %64, %cst_84 [1] : vector<4x8xf32> to vector<4xf32>
    %66 = vector.shape_cast %65 : vector<4xf32> to vector<4x1xf32>
    %c0_85 = arith.constant 0 : index
    %c0_86 = arith.constant 0 : index
    %c0_87 = arith.constant 0 : index
    %c8_88 = arith.constant 8 : index
    %c8_89 = arith.constant 8 : index
    %67 = vector.load %arg2[%c0_85, %c0_86, %c0_87, %c8_88, %c8_89] : memref<1x4x16x16x16xf32, #tpu.memory_space<vmem>>, vector<1x4x8x8x8xf32>
    %68 = vector.shape_cast %67 : vector<1x4x8x8x8xf32> to vector<4x8x8x8xf32>
    %cst_90 = arith.constant dense<0xFF800000> : vector<4x8x8xf32>
    %69 = vector.multi_reduction <maximumf>, %68, %cst_90 [3] : vector<4x8x8x8xf32> to vector<4x8x8xf32>
    %cst_91 = arith.constant dense<0xFF800000> : vector<4x8xf32>
    %70 = vector.multi_reduction <maximumf>, %69, %cst_91 [2] : vector<4x8x8xf32> to vector<4x8xf32>
    %cst_92 = arith.constant dense<0xFF800000> : vector<4xf32>
    %71 = vector.multi_reduction <maximumf>, %70, %cst_92 [1] : vector<4x8xf32> to vector<4xf32>
    %72 = vector.shape_cast %71 : vector<4xf32> to vector<4x1xf32>
    %c0_93 = arith.constant 0 : index
    %c0_94 = arith.constant 0 : index
    %c8_95 = arith.constant 8 : index
    %c0_96 = arith.constant 0 : index
    %c0_97 = arith.constant 0 : index
    %73 = vector.load %arg2[%c0_93, %c0_94, %c8_95, %c0_96, %c0_97] : memref<1x4x16x16x16xf32, #tpu.memory_space<vmem>>, vector<1x4x8x8x8xf32>
    %74 = vector.shape_cast %73 : vector<1x4x8x8x8xf32> to vector<4x8x8x8xf32>
    %cst_98 = arith.constant dense<0xFF800000> : vector<4x8x8xf32>
    %75 = vector.multi_reduction <maximumf>, %74, %cst_98 [3] : vector<4x8x8x8xf32> to vector<4x8x8xf32>
    %cst_99 = arith.constant dense<0xFF800000> : vector<4x8xf32>
    %76 = vector.multi_reduction <maximumf>, %75, %cst_99 [2] : vector<4x8x8xf32> to vector<4x8xf32>
    %cst_100 = arith.constant dense<0xFF800000> : vector<4xf32>
    %77 = vector.multi_reduction <maximumf>, %76, %cst_100 [1] : vector<4x8xf32> to vector<4xf32>
    %78 = vector.shape_cast %77 : vector<4xf32> to vector<4x1xf32>
    %c0_101 = arith.constant 0 : index
    %c0_102 = arith.constant 0 : index
    %c8_103 = arith.constant 8 : index
    %c0_104 = arith.constant 0 : index
    %c8_105 = arith.constant 8 : index
    %79 = vector.load %arg2[%c0_101, %c0_102, %c8_103, %c0_104, %c8_105] : memref<1x4x16x16x16xf32, #tpu.memory_space<vmem>>, vector<1x4x8x8x8xf32>
    %80 = vector.shape_cast %79 : vector<1x4x8x8x8xf32> to vector<4x8x8x8xf32>
    %cst_106 = arith.constant dense<0xFF800000> : vector<4x8x8xf32>
    %81 = vector.multi_reduction <maximumf>, %80, %cst_106 [3] : vector<4x8x8x8xf32> to vector<4x8x8xf32>
    %cst_107 = arith.constant dense<0xFF800000> : vector<4x8xf32>
    %82 = vector.multi_reduction <maximumf>, %81, %cst_107 [2] : vector<4x8x8xf32> to vector<4x8xf32>
    %cst_108 = arith.constant dense<0xFF800000> : vector<4xf32>
    %83 = vector.multi_reduction <maximumf>, %82, %cst_108 [1] : vector<4x8xf32> to vector<4xf32>
    %84 = vector.shape_cast %83 : vector<4xf32> to vector<4x1xf32>
    %c0_109 = arith.constant 0 : index
    %c0_110 = arith.constant 0 : index
    %c8_111 = arith.constant 8 : index
    %c8_112 = arith.constant 8 : index
    %c0_113 = arith.constant 0 : index
    %85 = vector.load %arg2[%c0_109, %c0_110, %c8_111, %c8_112, %c0_113] : memref<1x4x16x16x16xf32, #tpu.memory_space<vmem>>, vector<1x4x8x8x8xf32>
    %86 = vector.shape_cast %85 : vector<1x4x8x8x8xf32> to vector<4x8x8x8xf32>
    %cst_114 = arith.constant dense<0xFF800000> : vector<4x8x8xf32>
    %87 = vector.multi_reduction <maximumf>, %86, %cst_114 [3] : vector<4x8x8x8xf32> to vector<4x8x8xf32>
    %cst_115 = arith.constant dense<0xFF800000> : vector<4x8xf32>
    %88 = vector.multi_reduction <maximumf>, %87, %cst_115 [2] : vector<4x8x8xf32> to vector<4x8xf32>
    %cst_116 = arith.constant dense<0xFF800000> : vector<4xf32>
    %89 = vector.multi_reduction <maximumf>, %88, %cst_116 [1] : vector<4x8xf32> to vector<4xf32>
    %90 = vector.shape_cast %89 : vector<4xf32> to vector<4x1xf32>
    %c0_117 = arith.constant 0 : index
    %c0_118 = arith.constant 0 : index
    %c8_119 = arith.constant 8 : index
    %c8_120 = arith.constant 8 : index
    %c8_121 = arith.constant 8 : index
    %91 = vector.load %arg2[%c0_117, %c0_118, %c8_119, %c8_120, %c8_121] : memref<1x4x16x16x16xf32, #tpu.memory_space<vmem>>, vector<1x4x8x8x8xf32>
    %92 = vector.shape_cast %91 : vector<1x4x8x8x8xf32> to vector<4x8x8x8xf32>
    %cst_122 = arith.constant dense<0xFF800000> : vector<4x8x8xf32>
    %93 = vector.multi_reduction <maximumf>, %92, %cst_122 [3] : vector<4x8x8x8xf32> to vector<4x8x8xf32>
    %cst_123 = arith.constant dense<0xFF800000> : vector<4x8xf32>
    %94 = vector.multi_reduction <maximumf>, %93, %cst_123 [2] : vector<4x8x8xf32> to vector<4x8xf32>
    %cst_124 = arith.constant dense<0xFF800000> : vector<4xf32>
    %95 = vector.multi_reduction <maximumf>, %94, %cst_124 [1] : vector<4x8xf32> to vector<4xf32>
    %96 = vector.shape_cast %95 : vector<4xf32> to vector<4x1xf32>
    %97 = tpu.concatenate %54, %60, %66, %72, %78, %84, %90, %96 in 1 : vector<4x1xf32>, vector<4x1xf32>, vector<4x1xf32>, vector<4x1xf32>, vector<4x1xf32>, vector<4x1xf32>, vector<4x1xf32>, vector<4x1xf32> -> vector<4x8xf32>
    %98 = arith.mulf %48, %48 : vector<4x8xf32>
    %cst_125 = arith.constant dense<0.000000e+00> : vector<8xf32>
    %99 = vector.multi_reduction <add>, %98, %cst_125 [0] : vector<4x8xf32> to vector<8xf32>
    %100 = vector.shape_cast %99 : vector<8xf32> to vector<1x8xf32>
    %101 = math.sqrt %100 : vector<1x8xf32>
    %cst_126 = arith.constant 9.99999993E-9 : f32
    %102 = vector.broadcast %cst_126 : f32 to vector<1x8xf32>
    %103 = arith.addf %101, %102 : vector<1x8xf32>
    %104 = tpu.reciprocal %103 : vector<1x8xf32> -> vector<1x8xf32>
    %105 = arith.mulf %97, %97 : vector<4x8xf32>
    %cst_127 = arith.constant dense<0.000000e+00> : vector<8xf32>
    %106 = vector.multi_reduction <add>, %105, %cst_127 [0] : vector<4x8xf32> to vector<8xf32>
    %107 = vector.shape_cast %106 : vector<8xf32> to vector<1x8xf32>
    %108 = math.sqrt %107 : vector<1x8xf32>
    %cst_128 = arith.constant 9.99999993E-9 : f32
    %109 = vector.broadcast %cst_128 : f32 to vector<1x8xf32>
    %110 = arith.addf %108, %109 : vector<1x8xf32>
    %111 = tpu.reciprocal %110 : vector<1x8xf32> -> vector<1x8xf32>
    %cst_129 = arith.constant 0.000000e+00 : f32
    %112 = vector.broadcast %cst_129 : f32 to vector<1x1xf32>
    %113 = vector.extract_strided_slice %48 {offsets = [0, 0], sizes = [4, 1], strides = [1, 1]} : vector<4x8xf32> to vector<4x1xf32>
    %114 = vector.broadcast %113 : vector<4x1xf32> to vector<4x8xf32>
    %115 = arith.mulf %114, %48 : vector<4x8xf32>
    %cst_130 = arith.constant dense<0.000000e+00> : vector<8xf32>
    %116 = vector.multi_reduction <add>, %115, %cst_130 [0] : vector<4x8xf32> to vector<8xf32>
    %117 = vector.shape_cast %116 : vector<8xf32> to vector<1x8xf32>
    %118 = vector.extract_strided_slice %104 {offsets = [0, 0], sizes = [1, 1], strides = [1, 1]} : vector<1x8xf32> to vector<1x1xf32>
    %119 = vector.broadcast %118 : vector<1x1xf32> to vector<1x8xf32>
    %120 = arith.mulf %119, %104 : vector<1x8xf32>
    %121 = arith.mulf %117, %120 : vector<1x8xf32>
    %122 = vector.extract_strided_slice %97 {offsets = [0, 0], sizes = [4, 1], strides = [1, 1]} : vector<4x8xf32> to vector<4x1xf32>
    %123 = vector.broadcast %122 : vector<4x1xf32> to vector<4x8xf32>
    %124 = arith.mulf %123, %97 : vector<4x8xf32>
    %cst_131 = arith.constant dense<0.000000e+00> : vector<8xf32>
    %125 = vector.multi_reduction <add>, %124, %cst_131 [0] : vector<4x8xf32> to vector<8xf32>
    %126 = vector.shape_cast %125 : vector<8xf32> to vector<1x8xf32>
    %127 = vector.extract_strided_slice %111 {offsets = [0, 0], sizes = [1, 1], strides = [1, 1]} : vector<1x8xf32> to vector<1x1xf32>
    %128 = vector.broadcast %127 : vector<1x1xf32> to vector<1x8xf32>
    %129 = arith.mulf %128, %111 : vector<1x8xf32>
    %130 = arith.mulf %126, %129 : vector<1x8xf32>
    %131 = arith.subf %130, %121 : vector<1x8xf32>
    %132 = arith.mulf %131, %131 : vector<1x8xf32>
    %cst_132 = arith.constant dense<0.000000e+00> : vector<1xf32>
    %133 = vector.multi_reduction <add>, %132, %cst_132 [1] : vector<1x8xf32> to vector<1xf32>
    %134 = vector.shape_cast %133 : vector<1xf32> to vector<1x1xf32>
    %135 = arith.addf %112, %134 : vector<1x1xf32>
    %136 = vector.extract_strided_slice %48 {offsets = [0, 1], sizes = [4, 1], strides = [1, 1]} : vector<4x8xf32> to vector<4x1xf32>
    %137 = vector.broadcast %136 : vector<4x1xf32> to vector<4x8xf32>
    %138 = arith.mulf %137, %48 : vector<4x8xf32>
    %cst_133 = arith.constant dense<0.000000e+00> : vector<8xf32>
    %139 = vector.multi_reduction <add>, %138, %cst_133 [0] : vector<4x8xf32> to vector<8xf32>
    %140 = vector.shape_cast %139 : vector<8xf32> to vector<1x8xf32>
    %141 = vector.extract_strided_slice %104 {offsets = [0, 1], sizes = [1, 1], strides = [1, 1]} : vector<1x8xf32> to vector<1x1xf32>
    %142 = vector.broadcast %141 : vector<1x1xf32> to vector<1x8xf32>
    %143 = arith.mulf %142, %104 : vector<1x8xf32>
    %144 = arith.mulf %140, %143 : vector<1x8xf32>
    %145 = vector.extract_strided_slice %97 {offsets = [0, 1], sizes = [4, 1], strides = [1, 1]} : vector<4x8xf32> to vector<4x1xf32>
    %146 = vector.broadcast %145 : vector<4x1xf32> to vector<4x8xf32>
    %147 = arith.mulf %146, %97 : vector<4x8xf32>
    %cst_134 = arith.constant dense<0.000000e+00> : vector<8xf32>
    %148 = vector.multi_reduction <add>, %147, %cst_134 [0] : vector<4x8xf32> to vector<8xf32>
    %149 = vector.shape_cast %148 : vector<8xf32> to vector<1x8xf32>
    %150 = vector.extract_strided_slice %111 {offsets = [0, 1], sizes = [1, 1], strides = [1, 1]} : vector<1x8xf32> to vector<1x1xf32>
    %151 = vector.broadcast %150 : vector<1x1xf32> to vector<1x8xf32>
    %152 = arith.mulf %151, %111 : vector<1x8xf32>
    %153 = arith.mulf %149, %152 : vector<1x8xf32>
    %154 = arith.subf %153, %144 : vector<1x8xf32>
    %155 = arith.mulf %154, %154 : vector<1x8xf32>
    %cst_135 = arith.constant dense<0.000000e+00> : vector<1xf32>
    %156 = vector.multi_reduction <add>, %155, %cst_135 [1] : vector<1x8xf32> to vector<1xf32>
    %157 = vector.shape_cast %156 : vector<1xf32> to vector<1x1xf32>
    %158 = arith.addf %135, %157 : vector<1x1xf32>
    %159 = vector.extract_strided_slice %48 {offsets = [0, 2], sizes = [4, 1], strides = [1, 1]} : vector<4x8xf32> to vector<4x1xf32>
    %160 = vector.broadcast %159 : vector<4x1xf32> to vector<4x8xf32>
    %161 = arith.mulf %160, %48 : vector<4x8xf32>
    %cst_136 = arith.constant dense<0.000000e+00> : vector<8xf32>
    %162 = vector.multi_reduction <add>, %161, %cst_136 [0] : vector<4x8xf32> to vector<8xf32>
    %163 = vector.shape_cast %162 : vector<8xf32> to vector<1x8xf32>
    %164 = vector.extract_strided_slice %104 {offsets = [0, 2], sizes = [1, 1], strides = [1, 1]} : vector<1x8xf32> to vector<1x1xf32>
    %165 = vector.broadcast %164 : vector<1x1xf32> to vector<1x8xf32>
    %166 = arith.mulf %165, %104 : vector<1x8xf32>
    %167 = arith.mulf %163, %166 : vector<1x8xf32>
    %168 = vector.extract_strided_slice %97 {offsets = [0, 2], sizes = [4, 1], strides = [1, 1]} : vector<4x8xf32> to vector<4x1xf32>
    %169 = vector.broadcast %168 : vector<4x1xf32> to vector<4x8xf32>
    %170 = arith.mulf %169, %97 : vector<4x8xf32>
    %cst_137 = arith.constant dense<0.000000e+00> : vector<8xf32>
    %171 = vector.multi_reduction <add>, %170, %cst_137 [0] : vector<4x8xf32> to vector<8xf32>
    %172 = vector.shape_cast %171 : vector<8xf32> to vector<1x8xf32>
    %173 = vector.extract_strided_slice %111 {offsets = [0, 2], sizes = [1, 1], strides = [1, 1]} : vector<1x8xf32> to vector<1x1xf32>
    %174 = vector.broadcast %173 : vector<1x1xf32> to vector<1x8xf32>
    %175 = arith.mulf %174, %111 : vector<1x8xf32>
    %176 = arith.mulf %172, %175 : vector<1x8xf32>
    %177 = arith.subf %176, %167 : vector<1x8xf32>
    %178 = arith.mulf %177, %177 : vector<1x8xf32>
    %cst_138 = arith.constant dense<0.000000e+00> : vector<1xf32>
    %179 = vector.multi_reduction <add>, %178, %cst_138 [1] : vector<1x8xf32> to vector<1xf32>
    %180 = vector.shape_cast %179 : vector<1xf32> to vector<1x1xf32>
    %181 = arith.addf %158, %180 : vector<1x1xf32>
    %182 = vector.extract_strided_slice %48 {offsets = [0, 3], sizes = [4, 1], strides = [1, 1]} : vector<4x8xf32> to vector<4x1xf32>
    %183 = vector.broadcast %182 : vector<4x1xf32> to vector<4x8xf32>
    %184 = arith.mulf %183, %48 : vector<4x8xf32>
    %cst_139 = arith.constant dense<0.000000e+00> : vector<8xf32>
    %185 = vector.multi_reduction <add>, %184, %cst_139 [0] : vector<4x8xf32> to vector<8xf32>
    %186 = vector.shape_cast %185 : vector<8xf32> to vector<1x8xf32>
    %187 = vector.extract_strided_slice %104 {offsets = [0, 3], sizes = [1, 1], strides = [1, 1]} : vector<1x8xf32> to vector<1x1xf32>
    %188 = vector.broadcast %187 : vector<1x1xf32> to vector<1x8xf32>
    %189 = arith.mulf %188, %104 : vector<1x8xf32>
    %190 = arith.mulf %186, %189 : vector<1x8xf32>
    %191 = vector.extract_strided_slice %97 {offsets = [0, 3], sizes = [4, 1], strides = [1, 1]} : vector<4x8xf32> to vector<4x1xf32>
    %192 = vector.broadcast %191 : vector<4x1xf32> to vector<4x8xf32>
    %193 = arith.mulf %192, %97 : vector<4x8xf32>
    %cst_140 = arith.constant dense<0.000000e+00> : vector<8xf32>
    %194 = vector.multi_reduction <add>, %193, %cst_140 [0] : vector<4x8xf32> to vector<8xf32>
    %195 = vector.shape_cast %194 : vector<8xf32> to vector<1x8xf32>
    %196 = vector.extract_strided_slice %111 {offsets = [0, 3], sizes = [1, 1], strides = [1, 1]} : vector<1x8xf32> to vector<1x1xf32>
    %197 = vector.broadcast %196 : vector<1x1xf32> to vector<1x8xf32>
    %198 = arith.mulf %197, %111 : vector<1x8xf32>
    %199 = arith.mulf %195, %198 : vector<1x8xf32>
    %200 = arith.subf %199, %190 : vector<1x8xf32>
    %201 = arith.mulf %200, %200 : vector<1x8xf32>
    %cst_141 = arith.constant dense<0.000000e+00> : vector<1xf32>
    %202 = vector.multi_reduction <add>, %201, %cst_141 [1] : vector<1x8xf32> to vector<1xf32>
    %203 = vector.shape_cast %202 : vector<1xf32> to vector<1x1xf32>
    %204 = arith.addf %181, %203 : vector<1x1xf32>
    %205 = vector.extract_strided_slice %48 {offsets = [0, 4], sizes = [4, 1], strides = [1, 1]} : vector<4x8xf32> to vector<4x1xf32>
    %206 = vector.broadcast %205 : vector<4x1xf32> to vector<4x8xf32>
    %207 = arith.mulf %206, %48 : vector<4x8xf32>
    %cst_142 = arith.constant dense<0.000000e+00> : vector<8xf32>
    %208 = vector.multi_reduction <add>, %207, %cst_142 [0] : vector<4x8xf32> to vector<8xf32>
    %209 = vector.shape_cast %208 : vector<8xf32> to vector<1x8xf32>
    %210 = vector.extract_strided_slice %104 {offsets = [0, 4], sizes = [1, 1], strides = [1, 1]} : vector<1x8xf32> to vector<1x1xf32>
    %211 = vector.broadcast %210 : vector<1x1xf32> to vector<1x8xf32>
    %212 = arith.mulf %211, %104 : vector<1x8xf32>
    %213 = arith.mulf %209, %212 : vector<1x8xf32>
    %214 = vector.extract_strided_slice %97 {offsets = [0, 4], sizes = [4, 1], strides = [1, 1]} : vector<4x8xf32> to vector<4x1xf32>
    %215 = vector.broadcast %214 : vector<4x1xf32> to vector<4x8xf32>
    %216 = arith.mulf %215, %97 : vector<4x8xf32>
    %cst_143 = arith.constant dense<0.000000e+00> : vector<8xf32>
    %217 = vector.multi_reduction <add>, %216, %cst_143 [0] : vector<4x8xf32> to vector<8xf32>
    %218 = vector.shape_cast %217 : vector<8xf32> to vector<1x8xf32>
    %219 = vector.extract_strided_slice %111 {offsets = [0, 4], sizes = [1, 1], strides = [1, 1]} : vector<1x8xf32> to vector<1x1xf32>
    %220 = vector.broadcast %219 : vector<1x1xf32> to vector<1x8xf32>
    %221 = arith.mulf %220, %111 : vector<1x8xf32>
    %222 = arith.mulf %218, %221 : vector<1x8xf32>
    %223 = arith.subf %222, %213 : vector<1x8xf32>
    %224 = arith.mulf %223, %223 : vector<1x8xf32>
    %cst_144 = arith.constant dense<0.000000e+00> : vector<1xf32>
    %225 = vector.multi_reduction <add>, %224, %cst_144 [1] : vector<1x8xf32> to vector<1xf32>
    %226 = vector.shape_cast %225 : vector<1xf32> to vector<1x1xf32>
    %227 = arith.addf %204, %226 : vector<1x1xf32>
    %228 = vector.extract_strided_slice %48 {offsets = [0, 5], sizes = [4, 1], strides = [1, 1]} : vector<4x8xf32> to vector<4x1xf32>
    %229 = vector.broadcast %228 : vector<4x1xf32> to vector<4x8xf32>
    %230 = arith.mulf %229, %48 : vector<4x8xf32>
    %cst_145 = arith.constant dense<0.000000e+00> : vector<8xf32>
    %231 = vector.multi_reduction <add>, %230, %cst_145 [0] : vector<4x8xf32> to vector<8xf32>
    %232 = vector.shape_cast %231 : vector<8xf32> to vector<1x8xf32>
    %233 = vector.extract_strided_slice %104 {offsets = [0, 5], sizes = [1, 1], strides = [1, 1]} : vector<1x8xf32> to vector<1x1xf32>
    %234 = vector.broadcast %233 : vector<1x1xf32> to vector<1x8xf32>
    %235 = arith.mulf %234, %104 : vector<1x8xf32>
    %236 = arith.mulf %232, %235 : vector<1x8xf32>
    %237 = vector.extract_strided_slice %97 {offsets = [0, 5], sizes = [4, 1], strides = [1, 1]} : vector<4x8xf32> to vector<4x1xf32>
    %238 = vector.broadcast %237 : vector<4x1xf32> to vector<4x8xf32>
    %239 = arith.mulf %238, %97 : vector<4x8xf32>
    %cst_146 = arith.constant dense<0.000000e+00> : vector<8xf32>
    %240 = vector.multi_reduction <add>, %239, %cst_146 [0] : vector<4x8xf32> to vector<8xf32>
    %241 = vector.shape_cast %240 : vector<8xf32> to vector<1x8xf32>
    %242 = vector.extract_strided_slice %111 {offsets = [0, 5], sizes = [1, 1], strides = [1, 1]} : vector<1x8xf32> to vector<1x1xf32>
    %243 = vector.broadcast %242 : vector<1x1xf32> to vector<1x8xf32>
    %244 = arith.mulf %243, %111 : vector<1x8xf32>
    %245 = arith.mulf %241, %244 : vector<1x8xf32>
    %246 = arith.subf %245, %236 : vector<1x8xf32>
    %247 = arith.mulf %246, %246 : vector<1x8xf32>
    %cst_147 = arith.constant dense<0.000000e+00> : vector<1xf32>
    %248 = vector.multi_reduction <add>, %247, %cst_147 [1] : vector<1x8xf32> to vector<1xf32>
    %249 = vector.shape_cast %248 : vector<1xf32> to vector<1x1xf32>
    %250 = arith.addf %227, %249 : vector<1x1xf32>
    %251 = vector.extract_strided_slice %48 {offsets = [0, 6], sizes = [4, 1], strides = [1, 1]} : vector<4x8xf32> to vector<4x1xf32>
    %252 = vector.broadcast %251 : vector<4x1xf32> to vector<4x8xf32>
    %253 = arith.mulf %252, %48 : vector<4x8xf32>
    %cst_148 = arith.constant dense<0.000000e+00> : vector<8xf32>
    %254 = vector.multi_reduction <add>, %253, %cst_148 [0] : vector<4x8xf32> to vector<8xf32>
    %255 = vector.shape_cast %254 : vector<8xf32> to vector<1x8xf32>
    %256 = vector.extract_strided_slice %104 {offsets = [0, 6], sizes = [1, 1], strides = [1, 1]} : vector<1x8xf32> to vector<1x1xf32>
    %257 = vector.broadcast %256 : vector<1x1xf32> to vector<1x8xf32>
    %258 = arith.mulf %257, %104 : vector<1x8xf32>
    %259 = arith.mulf %255, %258 : vector<1x8xf32>
    %260 = vector.extract_strided_slice %97 {offsets = [0, 6], sizes = [4, 1], strides = [1, 1]} : vector<4x8xf32> to vector<4x1xf32>
    %261 = vector.broadcast %260 : vector<4x1xf32> to vector<4x8xf32>
    %262 = arith.mulf %261, %97 : vector<4x8xf32>
    %cst_149 = arith.constant dense<0.000000e+00> : vector<8xf32>
    %263 = vector.multi_reduction <add>, %262, %cst_149 [0] : vector<4x8xf32> to vector<8xf32>
    %264 = vector.shape_cast %263 : vector<8xf32> to vector<1x8xf32>
    %265 = vector.extract_strided_slice %111 {offsets = [0, 6], sizes = [1, 1], strides = [1, 1]} : vector<1x8xf32> to vector<1x1xf32>
    %266 = vector.broadcast %265 : vector<1x1xf32> to vector<1x8xf32>
    %267 = arith.mulf %266, %111 : vector<1x8xf32>
    %268 = arith.mulf %264, %267 : vector<1x8xf32>
    %269 = arith.subf %268, %259 : vector<1x8xf32>
    %270 = arith.mulf %269, %269 : vector<1x8xf32>
    %cst_150 = arith.constant dense<0.000000e+00> : vector<1xf32>
    %271 = vector.multi_reduction <add>, %270, %cst_150 [1] : vector<1x8xf32> to vector<1xf32>
    %272 = vector.shape_cast %271 : vector<1xf32> to vector<1x1xf32>
    %273 = arith.addf %250, %272 : vector<1x1xf32>
    %274 = vector.extract_strided_slice %48 {offsets = [0, 7], sizes = [4, 1], strides = [1, 1]} : vector<4x8xf32> to vector<4x1xf32>
    %275 = vector.broadcast %274 : vector<4x1xf32> to vector<4x8xf32>
    %276 = arith.mulf %275, %48 : vector<4x8xf32>
    %cst_151 = arith.constant dense<0.000000e+00> : vector<8xf32>
    %277 = vector.multi_reduction <add>, %276, %cst_151 [0] : vector<4x8xf32> to vector<8xf32>
    %278 = vector.shape_cast %277 : vector<8xf32> to vector<1x8xf32>
    %279 = vector.extract_strided_slice %104 {offsets = [0, 7], sizes = [1, 1], strides = [1, 1]} : vector<1x8xf32> to vector<1x1xf32>
    %280 = vector.broadcast %279 : vector<1x1xf32> to vector<1x8xf32>
    %281 = arith.mulf %280, %104 : vector<1x8xf32>
    %282 = arith.mulf %278, %281 : vector<1x8xf32>
    %283 = vector.extract_strided_slice %97 {offsets = [0, 7], sizes = [4, 1], strides = [1, 1]} : vector<4x8xf32> to vector<4x1xf32>
    %284 = vector.broadcast %283 : vector<4x1xf32> to vector<4x8xf32>
    %285 = arith.mulf %284, %97 : vector<4x8xf32>
    %cst_152 = arith.constant dense<0.000000e+00> : vector<8xf32>
    %286 = vector.multi_reduction <add>, %285, %cst_152 [0] : vector<4x8xf32> to vector<8xf32>
    %287 = vector.shape_cast %286 : vector<8xf32> to vector<1x8xf32>
    %288 = vector.extract_strided_slice %111 {offsets = [0, 7], sizes = [1, 1], strides = [1, 1]} : vector<1x8xf32> to vector<1x1xf32>
    %289 = vector.broadcast %288 : vector<1x1xf32> to vector<1x8xf32>
    %290 = arith.mulf %289, %111 : vector<1x8xf32>
    %291 = arith.mulf %287, %290 : vector<1x8xf32>
    %292 = arith.subf %291, %282 : vector<1x8xf32>
    %293 = arith.mulf %292, %292 : vector<1x8xf32>
    %cst_153 = arith.constant dense<0.000000e+00> : vector<1xf32>
    %294 = vector.multi_reduction <add>, %293, %cst_153 [1] : vector<1x8xf32> to vector<1xf32>
    %295 = vector.shape_cast %294 : vector<1xf32> to vector<1x1xf32>
    %296 = arith.addf %273, %295 : vector<1x1xf32>
    %297 = vector.shape_cast %296 : vector<1x1xf32> to vector<1x1x1xf32>
    %298 = vector.broadcast %297 : vector<1x1x1xf32> to vector<1x1x128xf32>
    %c0_154 = arith.constant 0 : index
    %c0_155 = arith.constant 0 : index
    %c0_156 = arith.constant 0 : index
    %299 = vector.load %arg3[%c0_154, %c0_155, %c0_156] : memref<1x1x128xf32, #tpu.memory_space<vmem>>, vector<1x1x128xf32>
    tpu.vector_store %arg3[%c0_154, %c0_155, %c0_156], %298 {strides = array<i32>} : memref<1x1x128xf32, #tpu.memory_space<vmem>>, vector<1x1x128xf32>,
    return
  }
  func.func @transform_0(%arg0: i32) -> (i32, i32, i32, i32, i32) {
    %c0_i32 = arith.constant 0 : i32
    %c0_i32_0 = arith.constant 0 : i32
    %c0_i32_1 = arith.constant 0 : i32
    %c0_i32_2 = arith.constant 0 : i32
    %c0_i32_3 = arith.constant 0 : i32
    return %arg0, %c0_i32, %c0_i32_0, %c0_i32_1, %c0_i32_2 : i32, i32, i32, i32, i32
  }
  func.func @transform_1(%arg0: i32) -> (i32, i32, i32, i32, i32) {
    %c0_i32 = arith.constant 0 : i32
    %c0_i32_0 = arith.constant 0 : i32
    %c0_i32_1 = arith.constant 0 : i32
    %c0_i32_2 = arith.constant 0 : i32
    %c0_i32_3 = arith.constant 0 : i32
    return %arg0, %c0_i32, %c0_i32_0, %c0_i32_1, %c0_i32_2 : i32, i32, i32, i32, i32
  }
  func.func @transform_2(%arg0: i32) -> (i32, i32, i32) {
    %c0_i32 = arith.constant 0 : i32
    %c0_i32_0 = arith.constant 0 : i32
    %c0_i32_1 = arith.constant 0 : i32
    return %arg0, %c0_i32, %c0_i32_0 : i32, i32, i32
  }
}

</mosaic_0001>

<bundles_post_ra>
// kernel: tpu_custom_call.1
= control target key start
LH: loop header
LB: loop body
LE: loop exit
PB: predicated region body
PF: predicated region fallthrough
CT: control target
= control target key end

     0   :  { %7 = vsyncpa [#allocation3], 0  ;;  %s8206_s0 = inlined_call_operand.hbm [shape: f32[2,4,16,16,16], index: 0, kind: input, shape index: {}]   ;;  %s8207_s1 = inlined_call_operand.hbm [shape: f32[2,4,16,16,16], index: 1, kind: input, shape index: {}]   ;;  %s8208_s2 = inlined_call_operand.hbm [shape: f32[2,1,128], index: 2, kind: output, shape index: {}]  }
   0x1   :  { %9 = vsyncpa [#allocation3 + $0x1], 0 }
   0x2   :  { %10 = vsyncpa [#allocation6], 0 }
   0x3   :  { %12 = vsyncpa [#allocation6 + $0x1], 0 }
   0x4   :  { %13 = vsyncpa [#allocation4], 0 }
   0x5   :  { %15 = vsyncpa [#allocation4 + $0x1], 0  ;;  %s4903_s9 = smov 0   ;;  %s4905_s10 = smov 0  }
   0x6   :  { %s4907_s11 = smov 0   ;;  %s4909_s12 = smov 0  }
   0x7 LB: > { %s4924_s13 = sadd.s32 4294967295, %s4876_s12   ;;  %s4513_s14 = sadd.s32 4294967294, %s4876_s12   ;;  %s4876_s12 = sphi %s4909_s12, %s8227_s12   ;;  %s4872_s11 = sphi %s4907_s11, %s8226_s11   ;;  %s4868_s10 = sphi %s4905_s10, %s8225_s10   ;;  %s4864_s9 = sphi %s4903_s9, %s8224_s9  }
   0x8   : > { %s4928_s15 = sadd.s32 1, %s4876_s12   ;;  %s28_s16 = sadd.s32 1, %s4872_s11 }
   0x9   : > { %s25_s17 = ssub.s32 %s4876_s12, %s4928_s15  ;;  %p35_p0 = scmp.ne.s32.totalorder %s4872_s11, %s4868_s10 }
   0xa   : > { %p26_p1 = scmp.eq.s32.totalorder %s25_s17, 0  ;;  %p36_p2 = scmp.eq.s32.totalorder %s4876_s12, 0 }
   0xb   : > { %p41_p3 = scmp.ne.s32.totalorder %s4868_s10, %s4864_s9  ;;  %p42_p4 = scmp.eq.s32.totalorder %s4924_s13, 0 }
   0xc   : > { %s4940_s18 = scalar_select %p26_p1, %s4872_s11, %s28_s16  }
   0xd   : > { %p4942_p5 = por %p36_p2, %p35_p0  ;;  %p4946_p6 = por %p42_p4, %p41_p3 }
   0xe   : > { %p91_p7 = scmp.eq.s32.totalorder %s4924_s13, 1  ;;  %p97_p8 = scmp.eq.s32.totalorder %s4513_s14, 1 }
   0xf   : > { %p4674_p10 = scmp.lt.s32.totalorder %s4876_s12, 2  ;;  %s4962_s23 = sand.u32 1, %s4872_s11  }
  0x10   : > { %p4953_p11 = por %p91_p7, %p35_p0  ;;  %p4957_p12 = por %p97_p8, %p41_p3 }
  0x11   : > { %s4655_s24 = sshll.u32 %s4876_s12, 10  ;;  %s4516_s25 = sshll.u32 %s4962_s23, 10 }
  0x12   : > { %s126_s28 = scalar_lea.hbm %s8206_s0, %s4655_s24  ;;  %s121_s30 = scalar_lea.vmem [#allocation2], %s4516_s25 }
  0x13   : > { %s127_s29 = sshll.u32 %s126_s28, 4  ;;  %s129_s3 = sshll.u32 %s121_s30, 4  ;;  %s128_s29 = int_to_ptr.hbm [resolvable:$true] %s127_s29  ;;  %s130_s3 = int_to_ptr.vmem [resolvable:$true] %s129_s3 }
  0x14   : > { %p4975_p13 = pnand %p4674_p10, %p4942_p5  ;;  %p4522_p0 = scmp.ge.s32.totalorder %s4876_s12, 1 }
  0x15   : > { %p159_p1 = scmp.lt.s32.totalorder %s4876_s12, 3  ;;  %s118_s5 = scalar_lea.sflag [#allocation3], %s4962_s23 }
  0x16   : > { %s4746_s6 = sshra.s32 %s128_s29, 4  ;;  %p4750_p3 = pneg %p4975_p13  ;;  %s4747_s6 = int_to_ptr.hbm [resolvable:$true] %s4746_s6 }
  0x17   : > { %s4748_s7 = scalar_lea.hbm %s4747_s6, 1024  ;;  %s4753_s16 = scalar_lea.hbm %s8206_s0, 2048 }
  0x18   : > { %p4749_p2 = scmp.ne.s32.totalorder %s4747_s6, %s4748_s7  ;;  %p4754_p5 = scmp.lt.s32.totalorder %s4747_s6, %s8206_s0 }
  0x19   : > { %p4755_p8 = scmp.lt.s32.totalorder %s4753_s16, %s4748_s7 }
  0x1a   : > { %p4751_p4 = pnand %p4750_p3, %p4749_p2 }
  0x1b   : > { %p4756_p10 = por %p4755_p8, %p4754_p5 }
  0x1c   : > { %p4752_p7 = pneg %p4751_p4 }
  0x1e   : > { %p4757_p9 = pnand %p4756_p10, %p4752_p7 }
  0x20   : > { %4760 = shalt.err (!%p4757_p9)
}
  0x21   : > { %s4878_s26 = smov 128   ;;  %s4879_s27 = smov 8  }
  0x22   : > { %4666 = dma.hbm_to_vmem [thread:$0]  (!%p4975_p13), %s128_s29, 16384, %s130_s3, %s118_s5, %s4878_s26, %s4878_s26, %s4879_s27  }
  0x23   : > { %p4999_p2 = pnand %p4522_p0, %p159_p1  ;;  %s148_s7 = scalar_lea.hbm %s8207_s1, %s4655_s24 }
  0x24   : > { %s149_s8 = sshll.u32 %s148_s7, 4  ;;  %s143_s14 = scalar_lea.vmem [#allocation5], %s4516_s25  ;;  %s150_s8 = int_to_ptr.hbm [resolvable:$true] %s149_s8 }
  0x25   : > { %s151_s16 = sshll.u32 %s143_s14, 4  ;;  %s140_s17 = scalar_lea.sflag [#allocation6], %s4962_s23  ;;  %s152_s16 = int_to_ptr.vmem [resolvable:$true] %s151_s16 }
  0x26   : > { %s4776_s19 = sshra.s32 %s150_s8, 4  ;;  %s4783_s30 = scalar_lea.hbm %s8207_s1, 2048  ;;  %s4777_s19 = int_to_ptr.hbm [resolvable:$true] %s4776_s19 }
  0x27   : > { %s4778_s29 = scalar_lea.hbm %s4777_s19, 1024  ;;  %p4784_p4 = scmp.lt.s32.totalorder %s4777_s19, %s8207_s1 }
  0x28   : > { %p4779_p9 = scmp.ne.s32.totalorder %s4777_s19, %s4778_s29  ;;  %p4785_p7 = scmp.lt.s32.totalorder %s4783_s30, %s4778_s29 }
  0x2a   : > { %p4781_p0 = pnand %p4779_p9, %p4750_p3  ;;  %p4786_p5 = por %p4785_p7, %p4784_p4 }
  0x2c   : > { %p4782_p1 = pneg %p4781_p0 }
  0x2e   : > { %p4787_p8 = pnand %p4786_p5, %p4782_p1 }
  0x30   : > { %4790 = shalt.err (!%p4787_p8)
}
  0x31   : > { %4669 = dma.hbm_to_vmem [thread:$0]  (!%p4975_p13), %s150_s8, 16384, %s152_s16, %s140_s17, %s4878_s26, %s4878_s26, %s4879_s27  }
  0x32   : > { %163 = sbr.rel (%p4999_p2) target bundleno = 5850 (0x16da), region = 28 }
  0x37   : > { %s5025_s23 = sand.u32 1, %s4868_s10  }
  0x38   : > { %s4523_s25 = sshll.u32 %s5025_s23, 10  ;;  %s166_s7 = scalar_lea.sflag [#allocation3], %s5025_s23 }
  0x39   : > { %s5029_s14 = scalar_lea.vmem [#allocation2], %s4523_s25 }
  0x3a   : > { %4851 = dma.done.wait (%p4946_p6), %s166_s7, 16384  }
  0x3b   : > { %4853 = vsyncadd (%p4946_p6), %s166_s7, 4294950912  ;;  %s176_s4 = scalar_lea.sflag [#allocation6], %s5025_s23  ;;  %s5036_s26 = scalar_lea.vmem [#allocation5], %s4523_s25 }
  0x3c   : > { %4855 = dma.done.wait (%p4946_p6), %s176_s4, 16384  }
  0x3d   : > { %4857 = vsyncadd (%p4946_p6), %s176_s4, 4294950912  ;;  %vm237_vm0 = vcmask 64512   ;;  %v5043_v0 = vld [vmem:[%s5029_s14 + $0x20] sm:$0xff]  ;;  %v5058_v6 = vld [vmem:[%s5029_s14 + $0x30] sm:$0xff]  ;;  %vm467_vm1 = vcmask 130112   ;;  %vm400_vm2 = vcmask 1041409   ;;  %s4420_s28 = scalar_lea.hbm %s8208_s2, %s4924_s13 }
  0x3e   : > { %v5046_v1 = vld [vmem:[%s5029_s14] sm:$0xff]  ;;  %v244_v3 = vsel %vm237_vm0, %v5043_v0, -inf  ;;  %v5061_v7 = vld [vmem:[%s5029_s14 + $0x10] sm:$0xff]  ;;  %v247_v9 = vsel %vm237_vm0, %v5058_v6, -inf  ;;  %vm402_vm3 = vcmask 1042434   ;;  %vm404_vm4 = vcmask 1043459  }
  0x3f   : > { %v5049_v2 = vld [vmem:[%s5029_s14 + $0x40] sm:$0xff]  ;;  %v238_v4 = vsel %vm237_vm0, %v5046_v1, -inf  ;;  %245 = vmax.xlane.f32.xlu1 %v244_v3  ;;  %v5064_v8 = vld [vmem:[%s5029_s14 + $0x50] sm:$0xff]  ;;  %v241_v10 = vsel %vm237_vm0, %v5061_v7, -inf  ;;  %v471_v3 = vsel %vm467_vm1, %v5061_v7, -inf  ;;  %vm406_vm5 = vcmask 1044484  }
  0x40   : > { %v250_v5 = vsel %vm237_vm0, %v5049_v2, -inf  ;;  %239 = vmax.xlane.f32.xlu0 %v238_v4  ;;  %v253_v11 = vsel %vm237_vm0, %v5064_v8, -inf  ;;  %v5073_v12 = vld [vmem:[%s5029_s14 + $0x70] sm:$0xff]  ;;  %v5076_v13 = vld [vmem:[%s5029_s14 + $0x60] sm:$0xff]  ;;  %v474_v4 = vsel %vm467_vm1, %v5043_v0, -inf  ;;  %v468_v0 = vsel %vm467_vm1, %v5046_v1, -inf }
  0x41   : > { %251 = vmax.xlane.f32.xlu2 %v250_v5  ;;  %v5079_v14 = vld [vmem:[%s5029_s14 + $0x100] sm:$0xff]  ;;  %v259_v15 = vsel %vm237_vm0, %v5073_v12, -inf  ;;  %v256_v16 = vsel %vm237_vm0, %v5076_v13, -inf  ;;  %v5091_v19 = vld [vmem:[%s5029_s14 + $0x110] sm:$0xff]  ;;  %v480_v5 = vsel %vm467_vm1, %v5049_v2, -inf  ;;  %vm408_vm6 = vcmask 1045509  }
  0x42   : > { %v262_v17 = vsel %vm237_vm0, %v5079_v14, -inf  ;;  %v5088_v18 = vld [vmem:[%s5029_s14 + $0x120] sm:$0xff]  ;;  %v5094_v20 = vld [vmem:[%s5029_s14 + $0x130] sm:$0xff]  ;;  %v265_v22 = vsel %vm237_vm0, %v5091_v19, -inf  ;;  %v492_v7 = vsel %vm467_vm1, %v5079_v14, -inf  ;;  %vm410_vm7 = vcmask 1046534  }
  0x43   : > { %v268_v21 = vsel %vm237_vm0, %v5088_v18, -inf  ;;  %v271_v23 = vsel %vm237_vm0, %v5094_v20, -inf  ;;  %v5103_v24 = vld [vmem:[%s5029_s14 + $0x150] sm:$0xff]  ;;  %v5106_v25 = vld [vmem:[%s5029_s14 + $0x140] sm:$0xff]  ;;  %vm412_vm8 = vcmask 1047559   ;;  %vm463_vm9 = vcmask 60416  }
  0x44   : > { %v5109_v26 = vld [vmem:[%s5029_s14 + $0x160] sm:$0xff]  ;;  %v277_v27 = vsel %vm237_vm0, %v5103_v24, -inf  ;;  %v274_v28 = vsel %vm237_vm0, %v5106_v25, -inf  ;;  %v5121_v31 = vld [vmem:[%s5029_s14 + $0x170] sm:$0xff]  ;;  %v507_v2 = vsel %vm467_vm1, %v5103_v24, -inf  ;;  %vm2098_vm10 = vcmask 7168  }
  0x45   : > { %v280_v29 = vsel %vm237_vm0, %v5109_v26, -inf  ;;  %v5118_v30 = vld [vmem:[%s5029_s14 + $0x200] sm:$0xff]  ;;  %v5124_v32 = vld [vmem:[%s5029_s14 + $0x210] sm:$0xff]  ;;  %v283_v34 = vsel %vm237_vm0, %v5121_v31, -inf  ;;  %v510_v1 = vsel %vm467_vm1, %v5109_v26, -inf  ;;  %vm2100_vm11 = vcmask 15360  }
  0x46   : > { %v286_v33 = vsel %vm237_vm0, %v5118_v30, -inf  ;;  %v289_v35 = vsel %vm237_vm0, %v5124_v32, -inf  ;;  %v5133_v36 = vld [vmem:[%s5029_s14 + $0x230] sm:$0xff]  ;;  %v5136_v37 = vld [vmem:[%s5029_s14 + $0x220] sm:$0xff]  ;;  %vm2102_vm12 = vcmask 23552   ;;  %vm2104_vm13 = vcmask 31744  }
  0x47   : > { %248 = vmax.xlane.f32.xlu1 %v247_v9  ;;  %v5139_v38 = vld [vmem:[%s5029_s14 + $0x240] sm:$0xff]  ;;  %v295_v39 = vsel %vm237_vm0, %v5133_v36, -inf  ;;  %v292_v40 = vsel %vm237_vm0, %v5136_v37, -inf  ;;  %v5151_v43 = vld [vmem:[%s5029_s14 + $0x250] sm:$0xff]  ;;  %v489_v9 = vsel %vm467_vm1, %v5073_v12, -inf  ;;  %v477_v12 = vsel %vm467_vm1, %v5058_v6, -inf }
  0x48   : > { %242 = vmax.xlane.f32.xlu0 %v241_v10  ;;  %v298_v41 = vsel %vm237_vm0, %v5139_v38, -inf  ;;  %v5148_v42 = vld [vmem:[%s5029_s14 + $0x260] sm:$0xff]  ;;  %v5154_v44 = vld [vmem:[%s5029_s14 + $0x270] sm:$0xff]  ;;  %v301_v46 = vsel %vm237_vm0, %v5151_v43, -inf  ;;  %v483_v10 = vsel %vm467_vm1, %v5064_v8, -inf  ;;  %v501_v8 = vsel %vm467_vm1, %v5094_v20, -inf }
  0x49   : > { %254 = vmax.xlane.f32.xlu2 %v253_v11  ;;  %v304_v45 = vsel %vm237_vm0, %v5148_v42, -inf  ;;  %v307_v47 = vsel %vm237_vm0, %v5154_v44, -inf  ;;  %v5163_v48 = vld [vmem:[%s5029_s14 + $0x310] sm:$0xff]  ;;  %v5166_v49 = vld [vmem:[%s5029_s14 + $0x300] sm:$0xff]  ;;  %v498_v11 = vsel %vm467_vm1, %v5088_v18, -inf  ;;  %v486_v18 = vsel %vm467_vm1, %v5076_v13, -inf }
  0x4a   : > { %v5169_v50 = vld [vmem:[%s5029_s14 + $0x320] sm:$0xff]  ;;  %v313_v51 = vsel %vm237_vm0, %v5163_v48, -inf  ;;  %v310_v52 = vsel %vm237_vm0, %v5166_v49, -inf  ;;  %v5178_v54 = vld [vmem:[%s5029_s14 + $0x330] sm:$0xff]  ;;  %vm2106_vm14 = vcmask 39936   ;;  %vm2108_vm15 = vcmask 48128  }
  0x4b   : > { %v316_v53 = vsel %vm237_vm0, %v5169_v50, -inf  ;;  %v5181_v55 = vld [vmem:[%s5029_s14 + $0x340] sm:$0xff]  ;;  %v5184_v56 = vld [vmem:[%s5029_s14 + $0x350] sm:$0xff]  ;;  %v319_v57 = vsel %vm237_vm0, %v5178_v54, -inf  ;;  %s204_s8 = scalar_lea.vmem [#allocation7], %s5025_s23  ;;  %s4424_s17 = sshll.u32 %s4420_s28, 4  ;;  %s4425_s17 = int_to_ptr.hbm [resolvable:$true] %s4424_s17 }
  0x4c   : > { %v322_v58 = vsel %vm237_vm0, %v5181_v55, -inf  ;;  %v325_v59 = vsel %vm237_vm0, %v5184_v56, -inf  ;;  %v5193_v60 = vld [vmem:[%s5029_s14 + $0x360] sm:$0xff]  ;;  %v5196_v61 = vld [vmem:[%s5029_s14 + $0x370] sm:$0xff]  ;;  %s4422_s16 = sshll.u32 %s204_s8, 4  ;;  %s4412_s19 = scalar_lea.sflag [#allocation4], %s5025_s23  ;;  %s4423_s16 = int_to_ptr.vmem [resolvable:$true] %s4422_s16 }
  0x4d   : > { %v328_v62 = vsel %vm237_vm0, %v5193_v60, -inf  ;;  %v331_v63 = vsel %vm237_vm0, %v5196_v61, -inf  ;;  %s4820_s29 = sshra.s32 %s4425_s17, 4  ;;  %s4826_s30 = scalar_lea.hbm %s8208_s2, 2  ;;  %s4821_s29 = int_to_ptr.hbm [resolvable:$true] %s4820_s29 }
  0x4e   : > { %s4822_s3 = scalar_lea.hbm %s4821_s29, 1  ;;  %p4827_p10 = scmp.lt.s32.totalorder %s4821_s29, %s8208_s2 }
  0x4f   : > { %260 = vmax.xlane.f32.xlu1 %v259_v15  ;;  %p4823_p6 = scmp.ne.s32.totalorder %s4821_s29, %s4822_s3  ;;  %p4828_p2 = scmp.lt.s32.totalorder %s4826_s30, %s4822_s3 }
  0x50   : > { %257 = vmax.xlane.f32.xlu0 %v256_v16  ;;  %v366_v16 = vlaneseq }
  0x51   : > { %263 = vmax.xlane.f32.xlu2 %v262_v17  ;;  %p4824_p13 = pnand %p4823_p6, %p4953_p11  ;;  %p4829_p9 = por %p4828_p2, %p4827_p10 }
  0x53   : > { %p4825_p3 = pneg %p4824_p13 }
  0x55   : > { %p4830_p0 = pnand %p4829_p9, %p4825_p3 }
  0x57   : > { %269 = vmax.xlane.f32.xlu1 %v268_v21  ;;  %v5228_v21 = vand.u32 127, %v366_v16 }
  0x58   : > { %266 = vmax.xlane.f32.xlu0 %v265_v22 }
  0x59   : > { %272 = vmax.xlane.f32.xlu2 %v271_v23 }
  0x5f   : > { %278 = vmax.xlane.f32.xlu1 %v277_v27 }
  0x60   : > { %275 = vmax.xlane.f32.xlu0 %v274_v28 }
  0x61   : > { %281 = vmax.xlane.f32.xlu2 %v280_v29 }
  0x67   : > { %287 = vmax.xlane.f32.xlu1 %v286_v33 }
  0x68   : > { %284 = vmax.xlane.f32.xlu0 %v283_v34  ;;  %v495_v34 = vsel %vm467_vm1, %v5091_v19, -inf }
  0x69   : > { %290 = vmax.xlane.f32.xlu2 %v289_v35 }
  0x6f   : > { %296 = vmax.xlane.f32.xlu1 %v295_v39 }
  0x70   : > { %293 = vmax.xlane.f32.xlu0 %v292_v40 }
  0x71   : > { %299 = vmax.xlane.f32.xlu2 %v298_v41 }
  0x77   : > { %305 = vmax.xlane.f32.xlu1 %v304_v45 }
  0x78   : > { %302 = vmax.xlane.f32.xlu0 %v301_v46 }
  0x79   : > { %308 = vmax.xlane.f32.xlu2 %v307_v47 }
  0x7f   : > { %314 = vmax.xlane.f32.xlu1 %v313_v51 }
  0x80   : > { %311 = vmax.xlane.f32.xlu0 %v310_v52 }
  0x81   : > { %317 = vmax.xlane.f32.xlu2 %v316_v53 }
  0x87   : > { %323 = vmax.xlane.f32.xlu1 %v322_v58 }
  0x88   : > { %320 = vmax.xlane.f32.xlu0 %v319_v57  ;;  %v504_v57 = vsel %vm467_vm1, %v5106_v25, -inf }
  0x89   : > { %326 = vmax.xlane.f32.xlu2 %v325_v59 }
  0x8f   : > { %332 = vmax.xlane.f32.xlu1 %v331_v63 }
  0x90   : > { %329 = vmax.xlane.f32.xlu0 %v328_v62 }
  0x91   : > { %472 = vmax.xlane.f32.xlu2 %v471_v3 }
  0x97   : > { %469 = vmax.xlane.f32.xlu1 %v468_v0 }
  0x98   : > { %475 = vmax.xlane.f32.xlu0 %v474_v4 }
  0x99   : > { %481 = vmax.xlane.f32.xlu2 %v480_v5 }
  0x9f   : > { %478 = vmax.xlane.f32.xlu1 %v477_v12 }
  0xa0   : > { %484 = vmax.xlane.f32.xlu0 %v483_v10 }
  0xa1   : > { %490 = vmax.xlane.f32.xlu2 %v489_v9 }
  0xa7   : > { %487 = vmax.xlane.f32.xlu1 %v486_v18 }
  0xa8   : > { %493 = vmax.xlane.f32.xlu0 %v492_v7 }
  0xa9   : > { %499 = vmax.xlane.f32.xlu2 %v498_v11 }
  0xaf   : > { %496 = vmax.xlane.f32.xlu1 %v495_v34 }
  0xb0   : > { %502 = vmax.xlane.f32.xlu0 %v501_v8 }
  0xb1   : > { %508 = vmax.xlane.f32.xlu2 %v507_v2 }
  0xb2   : > { %v246_v14 = vpop.xlane.xlu1 %245 }
  0xb3   : > { %v240_v15 = vpop.xlane.xlu0 %239  ;;  %v370_v26 = vperm.slane %v246_v14, %v5228_v21 }
  0xb4   : > { %v252_v17 = vpop.xlane.xlu2 %251  ;;  %v368_v6 = vperm.slane %v240_v15, %v5228_v21 }
  0xb5   : > { %v372_v29 = vperm.slane %v252_v17, %v5228_v21 }
  0xb7   : > { %505 = vmax.xlane.f32.xlu1 %v504_v57 }
  0xb8   : > { %511 = vmax.xlane.f32.xlu0 %v510_v1 }
  0xba   : > { %v249_v20 = vpop.xlane.xlu1 %248 }
  0xbb   : > { %v243_v22 = vpop.xlane.xlu0 %242  ;;  %v371_v23 = vperm.slane %v249_v20, %v5228_v21 }
  0xbc   : > { %v369_v24 = vperm.slane %v243_v22, %v5228_v21  ;;  %v255_v27 = vpop.xlane.xlu2 %254 }
  0xbd   : > { %v373_v35 = vperm.slane %v255_v27, %v5228_v21 }
  0xbe   : > { %v401_v13 = vsel %vm400_vm2, %v369_v24, %v368_v6 }
  0xbf   : > { %v403_v28 = vsel %vm402_vm3, %v370_v26, %v401_v13 }
  0xc0   : > { %v405_v33 = vsel %vm404_vm4, %v371_v23, %v403_v28 }
  0xc1   : > { %v407_v39 = vsel %vm406_vm5, %v372_v29, %v405_v33 }
  0xc2   : > { %v261_v40 = vpop.xlane.xlu1 %260  ;;  %v409_v51 = vsel %vm408_vm6, %v373_v35, %v407_v39  ;;  %v519_v39 = vsel %vm467_vm1, %v5124_v32, -inf }
  0xc3   : > { %v258_v41 = vpop.xlane.xlu0 %257  ;;  %v375_v45 = vperm.slane %v261_v40, %v5228_v21 }
  0xc4   : > { %v374_v46 = vperm.slane %v258_v41, %v5228_v21  ;;  %v264_v47 = vpop.xlane.xlu2 %263 }
  0xc5   : > { %v376_v62 = vperm.slane %v264_v47, %v5228_v21 }
  0xc6   : > { %v411_v52 = vsel %vm410_vm7, %v374_v46, %v409_v51 }
  0xc7   : > { %v413_v19 = vsel %vm412_vm8, %v375_v45, %v411_v52 }
  0xc8   : > { %v439_v53 = vsel %vm237_vm0, %v413_v19, -inf }
  0xc9   : > { %440 = vmax.xlane.f32.xlu2 %v439_v53 }
  0xca   : > { %v270_v58 = vpop.xlane.xlu1 %269 }
  0xcb   : > { %v267_v59 = vpop.xlane.xlu0 %266  ;;  %v378_v4 = vperm.slane %v270_v58, %v5228_v21 }
  0xcc   : > { %v377_v63 = vperm.slane %v267_v59, %v5228_v21  ;;  %v273_v3 = vpop.xlane.xlu2 %272 }
  0xcd   : > { %v379_v9 = vperm.slane %v273_v3, %v5228_v21 }
  0xce   : > { %v414_v5 = vsel %vm400_vm2, %v377_v63, %v376_v62 }
  0xcf   : > { %v415_v10 = vsel %vm402_vm3, %v378_v4, %v414_v5  ;;  %v513_v5 = vsel %vm467_vm1, %v5121_v31, -inf }
  0xd0   : > { %v416_v2 = vsel %vm404_vm4, %v379_v9, %v415_v10  ;;  %v528_v9 = vsel %vm467_vm1, %v5139_v38, -inf  ;;  %v522_v38 = vsel %vm467_vm1, %v5136_v37, -inf }
  0xd2   : > { %v279_v7 = vpop.xlane.xlu1 %278 }
  0xd3   : > { %v276_v11 = vpop.xlane.xlu0 %275  ;;  %v381_v8 = vperm.slane %v279_v7, %v5228_v21 }
  0xd4   : > { %v380_v25 = vperm.slane %v276_v11, %v5228_v21  ;;  %v282_v0 = vpop.xlane.xlu2 %281 }
  0xd5   : > { %v382_v14 = vperm.slane %v282_v0, %v5228_v21 }
  0xd6   : > { %v417_v12 = vsel %vm406_vm5, %v380_v25, %v416_v2 }
  0xd7   : > { %v418_v15 = vsel %vm408_vm6, %v381_v8, %v417_v12 }
  0xd8   : > { %v419_v20 = vsel %vm410_vm7, %v382_v14, %v418_v15  ;;  %v537_v15 = vsel %vm467_vm1, %v5154_v44, -inf }
  0xda   : > { %v288_v16 = vpop.xlane.xlu1 %287 }
  0xdb   : > { %v285_v17 = vpop.xlane.xlu0 %284  ;;  %v384_v23 = vperm.slane %v288_v16, %v5228_v21 }
  0xdc   : > { %v383_v1 = vperm.slane %v285_v17, %v5228_v21  ;;  %v291_v18 = vpop.xlane.xlu2 %290 }
  0xdd   : > { %v385_v24 = vperm.slane %v291_v18, %v5228_v21 }
  0xde   : > { %v420_v22 = vsel %vm412_vm8, %v383_v1, %v419_v20 }
  0xdf   : > { %v442_v6 = vsel %vm237_vm0, %v420_v22, -inf  ;;  %v421_v29 = vsel %vm400_vm2, %v385_v24, %v384_v23  ;;  %v531_v23 = vsel %vm467_vm1, %v5151_v43, -inf  ;;  %v546_v24 = vsel %vm467_vm1, %v5169_v50, -inf }
  0xe0   : > { %443 = vmax.xlane.f32.xlu0 %v442_v6  ;;  %v525_v43 = vsel %vm467_vm1, %v5133_v36, -inf  ;;  %v549_v50 = vsel %vm467_vm1, %v5178_v54, -inf  ;;  %v543_v54 = vsel %vm467_vm1, %v5163_v48, -inf }
  0xe2   : > { %v297_v27 = vpop.xlane.xlu1 %296 }
  0xe3   : > { %v294_v26 = vpop.xlane.xlu0 %293  ;;  %v387_v33 = vperm.slane %v297_v27, %v5228_v21  ;;  %v516_v27 = vsel %vm467_vm1, %v5118_v30, -inf  ;;  %v534_v30 = vsel %vm467_vm1, %v5148_v42, -inf }
  0xe4   : > { %v386_v13 = vperm.slane %v294_v26, %v5228_v21  ;;  %v300_v28 = vpop.xlane.xlu2 %299  ;;  %v540_v26 = vsel %vm467_vm1, %v5166_v49, -inf  ;;  %v558_v49 = vsel %vm467_vm1, %v5193_v60, -inf }
  0xe5   : > { %v388_v35 = vperm.slane %v300_v28, %v5228_v21 }
  0xe6   : > { %v422_v34 = vsel %vm402_vm3, %v386_v13, %v421_v29  ;;  %v555_v13 = vsel %vm467_vm1, %v5184_v56, -inf }
  0xe7   : > { %v423_v40 = vsel %vm404_vm4, %v387_v33, %v422_v34 }
  0xe8   : > { %520 = vmax.xlane.f32.xlu0 %v519_v39  ;;  %v424_v52 = vsel %vm406_vm5, %v388_v35, %v423_v40 }
  0xea   : > { %v306_v41 = vpop.xlane.xlu1 %305 }
  0xeb   : > { %v303_v45 = vpop.xlane.xlu0 %302  ;;  %v390_v46 = vperm.slane %v306_v41, %v5228_v21 }
  0xec   : > { %v389_v47 = vperm.slane %v303_v45, %v5228_v21  ;;  %v309_v51 = vpop.xlane.xlu2 %308  ;;  %v552_v45 = vsel %vm467_vm1, %v5181_v55, -inf }
  0xed   : > { %v391_v19 = vperm.slane %v309_v51, %v5228_v21 }
  0xee   : > { %v425_v53 = vsel %vm408_vm6, %v389_v47, %v424_v52 }
  0xef   : > { %v426_v57 = vsel %vm410_vm7, %v390_v46, %v425_v53 }
  0xf0   : > { %v427_v32 = vsel %vm412_vm8, %v391_v19, %v426_v57  ;;  %529 = vmax.xlane.f32.xlu0 %v528_v9 }
  0xf1   : > { %v445_v58 = vsel %vm237_vm0, %v427_v32, -inf }
  0xf2   : > { %446 = vmax.xlane.f32.xlu1 %v445_v58  ;;  %v315_v59 = vpop.xlane.xlu1 %314 }
  0xf3   : > { %v312_v62 = vpop.xlane.xlu0 %311  ;;  %v393_v3 = vperm.slane %v315_v59, %v5228_v21  ;;  %v561_v59 = vsel %vm467_vm1, %v5196_v61, -inf }
  0xf4   : > { %v318_v63 = vpop.xlane.xlu2 %317  ;;  %v392_v4 = vperm.slane %v312_v62, %v5228_v21 }
  0xf5   : > { %v394_v10 = vperm.slane %v318_v63, %v5228_v21 }
  0xf6   : > { %v428_v7 = vsel %vm400_vm2, %v393_v3, %v392_v4 }
  0xf7   : > { %v429_v2 = vsel %vm402_vm3, %v394_v10, %v428_v7 }
  0xf8   : > { %538 = vmax.xlane.f32.xlu0 %v537_v15 }
  0xfa   : > { %514 = vmax.xlane.f32.xlu1 %v513_v5  ;;  %v324_v25 = vpop.xlane.xlu1 %323 }
  0xfb   : > { %v321_v11 = vpop.xlane.xlu0 %320  ;;  %v396_v8 = vperm.slane %v324_v25, %v5228_v21 }
  0xfc   : > { %v395_v0 = vperm.slane %v321_v11, %v5228_v21  ;;  %v327_v12 = vpop.xlane.xlu2 %326 }
  0xfd   : > { %v397_v14 = vperm.slane %v327_v12, %v5228_v21 }
  0xfe   : > { %v430_v31 = vsel %vm404_vm4, %v395_v0, %v429_v2 }
  0xff   : > { %v431_v16 = vsel %vm406_vm5, %v396_v8, %v430_v31 }
 0x100   : > { %v432_v22 = vsel %vm408_vm6, %v397_v14, %v431_v16  ;;  %547 = vmax.xlane.f32.xlu0 %v546_v24 }
 0x102   : > { %523 = vmax.xlane.f32.xlu1 %v522_v38  ;;  %v333_v1 = vpop.xlane.xlu1 %332 }
 0x103   : > { %v330_v17 = vpop.xlane.xlu0 %329  ;;  %v399_v20 = vperm.slane %v333_v1, %v5228_v21 }
 0x104   : > { %v398_v18 = vperm.slane %v330_v17, %v5228_v21  ;;  %v473_v28 = vpop.xlane.xlu2 %472 }
 0x105   : > { %v597_v33 = vperm.slane %v473_v28, %v5228_v21 }
 0x106   : > { %v433_v6 = vsel %vm410_vm7, %v398_v18, %v432_v22 }
 0x107   : > { %v434_v37 = vsel %vm412_vm8, %v399_v20, %v433_v6 }
 0x108   : > { %v448_v44 = vsel %vm237_vm0, %v434_v37, -inf  ;;  %556 = vmax.xlane.f32.xlu0 %v555_v13 }
 0x109   : > { %449 = vmax.xlane.f32.xlu2 %v448_v44 }
 0x10a   : > { %532 = vmax.xlane.f32.xlu1 %v531_v23  ;;  %v470_v29 = vpop.xlane.xlu1 %469 }
 0x10b   : > { %v476_v56 = vpop.xlane.xlu0 %475  ;;  %v596_v36 = vperm.slane %v470_v29, %v5228_v21 }
 0x10c   : > { %v482_v35 = vpop.xlane.xlu2 %481  ;;  %v598_v39 = vperm.slane %v476_v56, %v5228_v21 }
 0x10d   : > { %v628_v42 = vsel %vm400_vm2, %v597_v33, %v596_v36  ;;  %v600_v41 = vperm.slane %v482_v35, %v5228_v21 }
 0x10e   : > { %v629_v60 = vsel %vm402_vm3, %v598_v39, %v628_v42 }
 0x111   : > { %517 = vmax.xlane.f32.xlu2 %v516_v27 }
 0x112   : > { %541 = vmax.xlane.f32.xlu1 %v540_v26  ;;  %v479_v34 = vpop.xlane.xlu1 %478 }
 0x113   : > { %v599_v40 = vperm.slane %v479_v34, %v5228_v21  ;;  %v485_v46 = vpop.xlane.xlu0 %484 }
 0x114   : > { %v601_v47 = vperm.slane %v485_v46, %v5228_v21  ;;  %v491_v52 = vpop.xlane.xlu2 %490 }
 0x115   : > { %v630_v51 = vsel %vm404_vm4, %v599_v40, %v629_v60  ;;  %v603_v53 = vperm.slane %v491_v52, %v5228_v21 }
 0x116   : > { %v631_v57 = vsel %vm406_vm5, %v600_v41, %v630_v51  ;;  %v5388_v51 = vld [vmem:[%s5029_s14 + $0x28] sm:$0xff] }
 0x117   : > { %v632_v32 = vsel %vm408_vm6, %v601_v47, %v631_v57  ;;  %v725_v52 = vsel %vm237_vm0, %v5388_v51, -inf  ;;  %v5394_v57 = vld [vmem:[%s5029_s14 + $0x8] sm:$0xff] }
 0x119   : > { %526 = vmax.xlane.f32.xlu2 %v525_v43 }
 0x11a   : > { %550 = vmax.xlane.f32.xlu1 %v549_v50  ;;  %v488_v48 = vpop.xlane.xlu1 %487 }
 0x11b   : > { %v602_v19 = vperm.slane %v488_v48, %v5228_v21  ;;  %v494_v3 = vpop.xlane.xlu0 %493 }
 0x11c   : > { %v604_v5 = vperm.slane %v494_v3, %v5228_v21  ;;  %v500_v10 = vpop.xlane.xlu2 %499 }
 0x11d   : > { %v633_v58 = vsel %vm410_vm7, %v602_v19, %v632_v32  ;;  %v606_v7 = vperm.slane %v500_v10, %v5228_v21 }
 0x11e   : > { %v634_v55 = vsel %vm412_vm8, %v603_v53, %v633_v58 }
 0x11f   : > { %v660_v62 = vsel %vm237_vm0, %v634_v55, -inf }
 0x120   : > { %661 = vmax.xlane.f32.xlu0 %v660_v62 }
 0x121   : > { %535 = vmax.xlane.f32.xlu2 %v534_v30 }
 0x122   : > { %559 = vmax.xlane.f32.xlu1 %v558_v49  ;;  %v497_v63 = vpop.xlane.xlu1 %496 }
 0x123   : > { %v605_v9 = vperm.slane %v497_v63, %v5228_v21  ;;  %v503_v11 = vpop.xlane.xlu0 %502  ;;  %v5402_v63 = vld [vmem:[%s5029_s14 + $0x58] sm:$0xff] }
 0x124   : > { %v607_v0 = vperm.slane %v503_v11, %v5228_v21  ;;  %v509_v31 = vpop.xlane.xlu2 %508  ;;  %v5410_v11 = vld [vmem:[%s5029_s14 + $0x38] sm:$0xff] }
 0x125   : > { %v635_v25 = vsel %vm400_vm2, %v605_v9, %v604_v5  ;;  %v609_v38 = vperm.slane %v509_v31, %v5228_v21 }
 0x126   : > { %v636_v61 = vsel %vm402_vm3, %v606_v7, %v635_v25 }
 0x127   : > { %v637_v12 = vsel %vm404_vm4, %v607_v0, %v636_v61 }
 0x129   : > { %544 = vmax.xlane.f32.xlu2 %v543_v54 }
 0x12a   : > { %v506_v4 = vpop.xlane.xlu1 %505 }
 0x12b   : > { %v608_v2 = vperm.slane %v506_v4, %v5228_v21  ;;  %v512_v15 = vpop.xlane.xlu0 %511  ;;  %v734_v4 = vsel %vm237_vm0, %v5402_v63, -inf }
 0x12c   : > { %v610_v16 = vperm.slane %v512_v15, %v5228_v21 }
 0x12d   : > { %v638_v14 = vsel %vm406_vm5, %v608_v2, %v637_v12  ;;  %v728_v12 = vsel %vm237_vm0, %v5410_v11, -inf }
 0x12e   : > { %v639_v17 = vsel %vm408_vm6, %v609_v38, %v638_v14  ;;  %v5419_v38 = vld [vmem:[%s5029_s14 + $0x108] sm:$0xff] }
 0x12f   : > { %v640_v20 = vsel %vm410_vm7, %v610_v16, %v639_v17  ;;  %v743_v14 = vsel %vm237_vm0, %v5419_v38, -inf }
 0x131   : > { %553 = vmax.xlane.f32.xlu2 %v552_v45 }
 0x139   : > { %562 = vmax.xlane.f32.xlu2 %v561_v59  ;;  %v719_v59 = vsel %vm237_vm0, %v5394_v57, -inf }
 0x13c   : > { %v5366_v37 = vpop.xlane.xlu2 %440 }
 0x153   : > { %v5368_v23 = vpop.xlane.xlu0 %443 }
 0x15b   : > { %v521_v24 = vpop.xlane.xlu0 %520 }
 0x15c   : > { %v613_v50 = vperm.slane %v521_v24, %v5228_v21 }
 0x163   : > { %v530_v13 = vpop.xlane.xlu0 %529 }
 0x164   : > { %v616_v36 = vperm.slane %v530_v13, %v5228_v21  ;;  %v5440_v13 = vld [vmem:[%s5029_s14 + $0x18] sm:$0xff] }
 0x165   : > { %v5355_v8 = vpop.xlane.xlu1 %446 }
 0x16b   : > { %v539_v35 = vpop.xlane.xlu0 %538 }
 0x16c   : > { %v619_v60 = vperm.slane %v539_v35, %v5228_v21 }
 0x16d   : > { %v515_v1 = vpop.xlane.xlu1 %514 }
 0x16e   : > { %v611_v18 = vperm.slane %v515_v1, %v5228_v21  ;;  %v5426_v1 = vld [vmem:[%s5029_s14 + $0x68] sm:$0xff] }
 0x170   : > { %v641_v22 = vsel %vm412_vm8, %v611_v18, %v640_v20 }
 0x171   : > { %v663_v6 = vsel %vm237_vm0, %v641_v22, -inf }
 0x172   : > { %664 = vmax.xlane.f32.xlu1 %v663_v6  ;;  %v737_v6 = vsel %vm237_vm0, %v5426_v1, -inf }
 0x173   : > { %v548_v19 = vpop.xlane.xlu0 %547 }
 0x174   : > { %v622_v62 = vperm.slane %v548_v19, %v5228_v21 }
 0x175   : > { %v524_v27 = vpop.xlane.xlu1 %523 }
 0x176   : > { %v614_v29 = vperm.slane %v524_v27, %v5228_v21  ;;  %v5435_v27 = vld [vmem:[%s5029_s14 + $0x138] sm:$0xff] }
 0x17a   : > { %726 = vmax.xlane.f32.xlu1 %v725_v52  ;;  %v5495_v52 = vld [vmem:[%s5029_s14 + $0x278] sm:$0xff] }
 0x17b   : > { %v557_v7 = vpop.xlane.xlu0 %556  ;;  %v788_v19 = vsel %vm237_vm0, %v5495_v52, -inf }
 0x17c   : > { %v5370_v44 = vpop.xlane.xlu2 %449  ;;  %v625_v61 = vperm.slane %v557_v7, %v5228_v21  ;;  %v457_v7 = vperm.slane %v5355_v8, %v5228_v21  ;;  %v5537_v8 = vld [vmem:[%s5029_s14 + $0x308] sm:$0xff] }
 0x17d   : > { %v533_v28 = vpop.xlane.xlu1 %532 }
 0x17e   : > { %v617_v54 = vperm.slane %v533_v28, %v5228_v21 }
 0x182   : > { %735 = vmax.xlane.f32.xlu1 %v734_v4 }
 0x184   : > { %v518_v26 = vpop.xlane.xlu2 %517 }
 0x185   : > { %v612_v43 = vperm.slane %v518_v26, %v5228_v21  ;;  %v542_v42 = vpop.xlane.xlu1 %541  ;;  %v752_v26 = vsel %vm237_vm0, %v5435_v27, -inf }
 0x186   : > { %v620_v32 = vperm.slane %v542_v42, %v5228_v21 }
 0x187   : > { %v642_v30 = vsel %vm400_vm2, %v613_v50, %v612_v43  ;;  %v5443_v43 = vld [vmem:[%s5029_s14 + $0x118] sm:$0xff]  ;;  %v722_v50 = vsel %vm237_vm0, %v5440_v13, -inf }
 0x188   : > { %v643_v33 = vsel %vm402_vm3, %v614_v29, %v642_v30  ;;  %v746_v28 = vsel %vm237_vm0, %v5443_v43, -inf  ;;  %v5450_v29 = vld [vmem:[%s5029_s14 + $0x168] sm:$0xff] }
 0x189   : > { %v761_v30 = vsel %vm237_vm0, %v5450_v29, -inf }
 0x18a   : > { %744 = vmax.xlane.f32.xlu1 %v743_v14 }
 0x18c   : > { %v527_v49 = vpop.xlane.xlu2 %526 }
 0x18d   : > { %v615_v56 = vperm.slane %v527_v49, %v5228_v21  ;;  %v551_v55 = vpop.xlane.xlu1 %550  ;;  %v5455_v49 = vld [vmem:[%s5029_s14 + $0x48] sm:$0xff] }
 0x18e   : > { %v623_v5 = vperm.slane %v551_v55, %v5228_v21 }
 0x18f   : > { %v644_v34 = vsel %vm404_vm4, %v615_v56, %v643_v33  ;;  %v5458_v56 = vld [vmem:[%s5029_s14 + $0x148] sm:$0xff]  ;;  %v731_v33 = vsel %vm237_vm0, %v5455_v49, -inf }
 0x190   : > { %v645_v39 = vsel %vm406_vm5, %v616_v36, %v644_v34  ;;  %v755_v36 = vsel %vm237_vm0, %v5458_v56, -inf  ;;  %v5465_v34 = vld [vmem:[%s5029_s14 + $0x218] sm:$0xff] }
 0x191   : > { %v646_v45 = vsel %vm408_vm6, %v617_v54, %v645_v39  ;;  %v770_v35 = vsel %vm237_vm0, %v5465_v34, -inf  ;;  %v5470_v54 = vld [vmem:[%s5029_s14 + $0x78] sm:$0xff] }
 0x192   : > { %753 = vmax.xlane.f32.xlu1 %v752_v26  ;;  %v5473_v39 = vld [vmem:[%s5029_s14 + $0x178] sm:$0xff]  ;;  %v740_v42 = vsel %vm237_vm0, %v5470_v54, -inf }
 0x193   : > { %v5562_v26 = vld [vmem:[%s5029_s14 + $0x378] sm:$0xff] }
 0x194   : > { %v536_v40 = vpop.xlane.xlu2 %535 }
 0x195   : > { %v618_v41 = vperm.slane %v536_v40, %v5228_v21  ;;  %v560_v2 = vpop.xlane.xlu1 %559  ;;  %v764_v40 = vsel %vm237_vm0, %v5473_v39, -inf }
 0x196   : > { %v626_v15 = vperm.slane %v560_v2, %v5228_v21 }
 0x197   : > { %v647_v46 = vsel %vm410_vm7, %v618_v41, %v646_v45  ;;  %v5485_v45 = vld [vmem:[%s5029_s14 + $0x128] sm:$0xff] }
 0x198   : > { %v648_v47 = vsel %vm412_vm8, %v619_v60, %v647_v46  ;;  %v5480_v60 = vld [vmem:[%s5029_s14 + $0x248] sm:$0xff] }
 0x199   : > { %v666_v48 = vsel %vm237_vm0, %v648_v47, -inf  ;;  %v779_v41 = vsel %vm237_vm0, %v5480_v60, -inf  ;;  %v5488_v46 = vld [vmem:[%s5029_s14 + $0x228] sm:$0xff]  ;;  %v749_v47 = vsel %vm237_vm0, %v5485_v45, -inf }
 0x19a   : > { %667 = vmax.xlane.f32.xlu2 %v666_v48  ;;  %762 = vmax.xlane.f32.xlu1 %v761_v30  ;;  %v773_v48 = vsel %vm237_vm0, %v5488_v46, -inf  ;;  %v662_v30 = vpop.xlane.xlu0 %661 }
 0x19c   : > { %v545_v53 = vpop.xlane.xlu2 %544 }
 0x19d   : > { %v621_v58 = vperm.slane %v545_v53, %v5228_v21  ;;  %v5500_v53 = vld [vmem:[%s5029_s14 + $0x158] sm:$0xff] }
 0x19f   : > { %v649_v3 = vsel %vm400_vm2, %v621_v58, %v620_v32  ;;  %v5503_v32 = vld [vmem:[%s5029_s14 + $0x258] sm:$0xff]  ;;  %v758_v58 = vsel %vm237_vm0, %v5500_v53, -inf }
 0x1a0   : > { %v650_v9 = vsel %vm402_vm3, %v622_v62, %v649_v3  ;;  %v782_v55 = vsel %vm237_vm0, %v5503_v32, -inf  ;;  %v5515_v3 = vld [vmem:[%s5029_s14 + $0x238] sm:$0xff] }
 0x1a1   : > { %v651_v0 = vsel %vm404_vm4, %v623_v5, %v650_v9  ;;  %v776_v4 = vsel %vm237_vm0, %v5515_v3, -inf  ;;  %v5520_v5 = vld [vmem:[%s5029_s14 + $0x268] sm:$0xff] }
 0x1a2   : > { %720 = vmax.xlane.f32.xlu2 %v719_v59  ;;  %771 = vmax.xlane.f32.xlu1 %v770_v35  ;;  %v5510_v59 = vld [vmem:[%s5029_s14 + $0x208] sm:$0xff]  ;;  %v785_v9 = vsel %vm237_vm0, %v5520_v5, -inf }
 0x1a3   : > { %v767_v62 = vsel %vm237_vm0, %v5510_v59, -inf }
 0x1a4   : > { %v554_v10 = vpop.xlane.xlu2 %553 }
 0x1a5   : > { %v624_v25 = vperm.slane %v554_v10, %v5228_v21  ;;  %v456_v10 = vperm.slane %v5368_v23, %v5228_v21 }
 0x1a7   : > { %v652_v31 = vsel %vm406_vm5, %v624_v25, %v651_v0  ;;  %v455_v25 = vperm.slane %v5366_v37, %v5228_v21  ;;  %v458_v0 = vperm.slane %v5370_v44, %v5228_v21  ;;  %v5540_v37 = vld [vmem:[%s5029_s14 + $0x318] sm:$0xff]  ;;  %v791_v44 = vsel %vm237_vm0, %v5537_v8, -inf }
 0x1a8   : > { %v653_v16 = vsel %vm408_vm6, %v625_v61, %v652_v31  ;;  %v794_v31 = vsel %vm237_vm0, %v5540_v37, -inf }
 0x1a9   : > { %v654_v20 = vsel %vm410_vm7, %v626_v15, %v653_v16  ;;  %v459_v61 = vsel %vm400_vm2, %v456_v10, %v455_v25  ;;  %v5547_v15 = vld [vmem:[%s5029_s14 + $0x338] sm:$0xff] }
 0x1aa   : > { %729 = vmax.xlane.f32.xlu2 %v728_v12  ;;  %780 = vmax.xlane.f32.xlu1 %v779_v41  ;;  %v460_v2 = vsel %vm402_vm3, %v457_v7, %v459_v61  ;;  %v800_v16 = vsel %vm237_vm0, %v5547_v15, -inf }
 0x1ab   : > { %v461_v12 = vsel %vm404_vm4, %v458_v0, %v460_v2 }
 0x1ac   : > { %v563_v17 = vpop.xlane.xlu2 %562  ;;  %v464_v23 = vsel %vm463_vm9, %v461_v12, -inf }
 0x1ad   : > { %v627_v18 = vperm.slane %v563_v17, %v5228_v21  ;;  %v5552_v17 = vld [vmem:[%s5029_s14 + $0x348] sm:$0xff] }
 0x1af   : > { %v655_v22 = vsel %vm412_vm8, %v627_v18, %v654_v20  ;;  %v803_v18 = vsel %vm237_vm0, %v5552_v17, -inf }
 0x1b0   : > { %v669_v24 = vsel %vm237_vm0, %v655_v22, -inf }
 0x1b1   : > { %670 = vmax.xlane.f32.xlu0 %v669_v24 }
 0x1b2   : > { %738 = vmax.xlane.f32.xlu2 %v737_v6  ;;  %789 = vmax.xlane.f32.xlu1 %v788_v19  ;;  %v5557_v6 = vld [vmem:[%s5029_s14 + $0x368] sm:$0xff] }
 0x1b3   : > { %v809_v24 = vsel %vm237_vm0, %v5557_v6, -inf }
 0x1b9   : > { %723 = vmax.xlane.f32.xlu0 %v722_v50  ;;  %v812_v50 = vsel %vm237_vm0, %v5562_v26, -inf }
 0x1ba   : > { %747 = vmax.xlane.f32.xlu2 %v746_v28 }
 0x1c1   : > { %732 = vmax.xlane.f32.xlu0 %v731_v33 }
 0x1c2   : > { %756 = vmax.xlane.f32.xlu2 %v755_v36 }
 0x1c9   : > { %741 = vmax.xlane.f32.xlu0 %v740_v42  ;;  %v676_v42 = vperm.slane %v662_v30, %v5228_v21 }
 0x1ca   : > { %765 = vmax.xlane.f32.xlu2 %v764_v40 }
 0x1d1   : > { %750 = vmax.xlane.f32.xlu0 %v749_v47 }
 0x1d2   : > { %774 = vmax.xlane.f32.xlu2 %v773_v48 }
 0x1d9   : > { %759 = vmax.xlane.f32.xlu0 %v758_v58 }
 0x1da   : > { %783 = vmax.xlane.f32.xlu2 %v782_v55 }
 0x1e1   : > { %768 = vmax.xlane.f32.xlu0 %v767_v62  ;;  %v5575_v62 = vld [vmem:[%s5029_s14 + $0x328] sm:$0xff] }
 0x1e2   : > { %792 = vmax.xlane.f32.xlu2 %v791_v44  ;;  %v797_v25 = vsel %vm237_vm0, %v5575_v62, -inf }
 0x1e5   : > { %v665_v20 = vpop.xlane.xlu1 %664 }
 0x1e6   : > { %v677_v33 = vperm.slane %v665_v20, %v5228_v21 }
 0x1e8   : > { %v680_v47 = vsel %vm400_vm2, %v677_v33, %v676_v42 }
 0x1e9   : > { %777 = vmax.xlane.f32.xlu0 %v776_v4 }
 0x1ea   : > { %801 = vmax.xlane.f32.xlu2 %v800_v16 }
 0x1ed   : > { %v727_v28 = vpop.xlane.xlu1 %726 }
 0x1ee   : > { %v849_v61 = vperm.slane %v727_v28, %v5228_v21 }
 0x1f1   : > { %786 = vmax.xlane.f32.xlu0 %v785_v9 }
 0x1f2   : > { %810 = vmax.xlane.f32.xlu2 %v809_v24 }
 0x1f5   : > { %v736_v48 = vpop.xlane.xlu1 %735 }
 0x1f9   : > { %465 = vmax.xlane.f32.xlu0 %v464_v23  ;;  %v5585_v23 = vld [vmem:[%s5029_s14 + $0x358] sm:$0xff] }
 0x1fd   : > { %v745_v0 = vpop.xlane.xlu1 %744 }
 0x201   : > { %795 = vmax.xlane.f32.xlu0 %v794_v31 }
 0x205   : > { %v754_v24 = vpop.xlane.xlu1 %753 }
 0x209   : > { %804 = vmax.xlane.f32.xlu0 %v803_v18  ;;  %v806_v18 = vsel %vm237_vm0, %v5585_v23, -inf }
 0x20d   : > { %v668_v14 = vpop.xlane.xlu2 %667 }
 0x20e   : > { %v678_v35 = vperm.slane %v668_v14, %v5228_v21 }
 0x210   : > { %v681_v19 = vsel %vm402_vm3, %v678_v35, %v680_v47 }
 0x211   : > { %813 = vmax.xlane.f32.xlu0 %v812_v50 }
 0x215   : > { %v721_v22 = vpop.xlane.xlu2 %720 }
 0x216   : > { %v847_v10 = vperm.slane %v721_v22, %v5228_v21  ;;  %v852_v22 = vperm.slane %v736_v48, %v5228_v21 }
 0x21d   : > { %v730_v36 = vpop.xlane.xlu2 %729 }
 0x21e   : > { %v850_v12 = vperm.slane %v730_v36, %v5228_v21 }
 0x224   : > { %v671_v40 = vpop.xlane.xlu0 %670 }
 0x225   : > { %v679_v41 = vperm.slane %v671_v40, %v5228_v21  ;;  %v739_v4 = vpop.xlane.xlu2 %738 }
 0x226   : > { %v853_v28 = vperm.slane %v739_v4, %v5228_v21 }
 0x227   : > { %v682_v58 = vsel %vm404_vm4, %v679_v41, %v681_v19  ;;  %v855_v41 = vperm.slane %v745_v0, %v5228_v21  ;;  %v763_v19 = vpop.xlane.xlu1 %762 }
 0x228   : > { %v684_v55 = vsel %vm463_vm9, %v682_v58, -inf }
 0x229   : > { %685 = vmax.xlane.f32.xlu1 %v684_v55 }
 0x22c   : > { %v724_v9 = vpop.xlane.xlu0 %723 }
 0x22d   : > { %v848_v7 = vperm.slane %v724_v9, %v5228_v21  ;;  %v748_v14 = vpop.xlane.xlu2 %747  ;;  %v858_v9 = vperm.slane %v754_v24, %v5228_v21 }
 0x22e   : > { %v856_v47 = vperm.slane %v748_v14, %v5228_v21 }
 0x22f   : > { %v879_v2 = vsel %vm400_vm2, %v848_v7, %v847_v10  ;;  %v772_v14 = vpop.xlane.xlu1 %771 }
 0x230   : > { %v880_v44 = vsel %vm402_vm3, %v849_v61, %v879_v2  ;;  %v886_v58 = vsel %vm400_vm2, %v856_v47, %v855_v41 }
 0x231   : > { %798 = vmax.xlane.f32.xlu1 %v797_v25  ;;  %v881_v20 = vsel %vm404_vm4, %v850_v12, %v880_v44  ;;  %v861_v12 = vperm.slane %v763_v19, %v5228_v21 }
 0x234   : > { %v733_v31 = vpop.xlane.xlu0 %732 }
 0x235   : > { %v851_v16 = vperm.slane %v733_v31, %v5228_v21  ;;  %v757_v42 = vpop.xlane.xlu2 %756 }
 0x236   : > { %v859_v7 = vperm.slane %v757_v42, %v5228_v21 }
 0x237   : > { %v882_v50 = vsel %vm406_vm5, %v851_v16, %v881_v20 }
 0x238   : > { %v883_v36 = vsel %vm408_vm6, %v852_v22, %v882_v50 }
 0x239   : > { %807 = vmax.xlane.f32.xlu1 %v806_v18  ;;  %v884_v35 = vsel %vm410_vm7, %v853_v28, %v883_v36 }
 0x23c   : > { %v742_v30 = vpop.xlane.xlu0 %741 }
 0x23d   : > { %v854_v33 = vperm.slane %v742_v30, %v5228_v21  ;;  %v766_v0 = vpop.xlane.xlu2 %765  ;;  %v864_v30 = vperm.slane %v772_v14, %v5228_v21 }
 0x23e   : > { %v862_v31 = vperm.slane %v766_v0, %v5228_v21 }
 0x23f   : > { %v885_v40 = vsel %vm412_vm8, %v854_v33, %v884_v35  ;;  %v781_v33 = vpop.xlane.xlu1 %780 }
 0x240   : > { %v911_v48 = vsel %vm237_vm0, %v885_v40, -inf  ;;  %v867_v47 = vperm.slane %v781_v33, %v5228_v21 }
 0x241   : > { %912 = vmax.xlane.f32.xlu1 %v911_v48 }
 0x244   : > { %v751_v55 = vpop.xlane.xlu0 %750 }
 0x245   : > { %v857_v4 = vperm.slane %v751_v55, %v5228_v21  ;;  %v775_v24 = vpop.xlane.xlu2 %774 }
 0x246   : > { %v865_v36 = vperm.slane %v775_v24, %v5228_v21 }
 0x247   : > { %v887_v10 = vsel %vm402_vm3, %v857_v4, %v886_v58  ;;  %v790_v4 = vpop.xlane.xlu1 %789 }
 0x248   : > { %v888_v25 = vsel %vm404_vm4, %v858_v9, %v887_v10  ;;  %v870_v10 = vperm.slane %v790_v4, %v5228_v21 }
 0x249   : > { %v889_v61 = vsel %vm406_vm5, %v859_v7, %v888_v25 }
 0x24c   : > { %v760_v2 = vpop.xlane.xlu0 %759 }
 0x24d   : > { %v860_v44 = vperm.slane %v760_v2, %v5228_v21  ;;  %v784_v48 = vpop.xlane.xlu2 %783 }
 0x24e   : > { %v868_v58 = vperm.slane %v784_v48, %v5228_v21 }
 0x24f   : > { %v890_v16 = vsel %vm408_vm6, %v860_v44, %v889_v61 }
 0x250   : > { %v891_v18 = vsel %vm410_vm7, %v861_v12, %v890_v16 }
 0x251   : > { %v892_v20 = vsel %vm412_vm8, %v862_v31, %v891_v18 }
 0x252   : > { %v914_v22 = vsel %vm237_vm0, %v892_v20, -inf }
 0x253   : > { %915 = vmax.xlane.f32.xlu2 %v914_v22 }
 0x254   : > { %v769_v50 = vpop.xlane.xlu0 %768 }
 0x255   : > { %v863_v28 = vperm.slane %v769_v50, %v5228_v21  ;;  %v793_v44 = vpop.xlane.xlu2 %792 }
 0x256   : > { %v871_v20 = vperm.slane %v793_v44, %v5228_v21 }
 0x257   : > { %v893_v35 = vsel %vm400_vm2, %v864_v30, %v863_v28 }
 0x258   : > { %v894_v42 = vsel %vm402_vm3, %v865_v36, %v893_v35 }
 0x25c   : > { %v778_v40 = vpop.xlane.xlu0 %777 }
 0x25d   : > { %v866_v41 = vperm.slane %v778_v40, %v5228_v21  ;;  %v802_v16 = vpop.xlane.xlu2 %801 }
 0x25e   : > { %v874_v30 = vperm.slane %v802_v16, %v5228_v21 }
 0x25f   : > { %v895_v19 = vsel %vm404_vm4, %v866_v41, %v894_v42 }
 0x260   : > { %v896_v55 = vsel %vm406_vm5, %v867_v47, %v895_v19 }
 0x261   : > { %v897_v7 = vsel %vm408_vm6, %v868_v58, %v896_v55 }
 0x264   : > { %v787_v9 = vpop.xlane.xlu0 %786 }
 0x265   : > { %v869_v25 = vperm.slane %v787_v9, %v5228_v21  ;;  %v811_v36 = vpop.xlane.xlu2 %810 }
 0x266   : > { %v877_v47 = vperm.slane %v811_v36, %v5228_v21  ;;  %v986_v36 = vsel %vm467_vm1, %v5510_v59, -inf  ;;  %v1004_v59 = vsel %vm467_vm1, %v5520_v5, -inf  ;;  %v1022_v5 = vsel %vm467_vm1, %v5552_v17, -inf }
 0x267   : > { %v898_v0 = vsel %vm410_vm7, %v869_v25, %v897_v7  ;;  %v938_v7 = vsel %vm467_vm1, %v5394_v57, -inf  ;;  %v941_v25 = vsel %vm467_vm1, %v5440_v13, -inf  ;;  %v959_v57 = vsel %vm467_vm1, %v5470_v54, -inf }
 0x268   : > { %v899_v61 = vsel %vm412_vm8, %v870_v10, %v898_v0  ;;  %v947_v0 = vsel %vm467_vm1, %v5410_v11, -inf  ;;  %v965_v13 = vsel %vm467_vm1, %v5443_v43, -inf  ;;  %v1025_v17 = vsel %vm467_vm1, %v5585_v23, -inf }
 0x269   : > { %v917_v2 = vsel %vm237_vm0, %v899_v61, -inf  ;;  %v950_v61 = vsel %vm467_vm1, %v5455_v49, -inf }
 0x26a   : > { %918 = vmax.xlane.f32.xlu0 %v917_v2  ;;  %v956_v2 = vsel %vm467_vm1, %v5426_v1, -inf }
 0x26c   : > { %v5632_v12 = vpop.xlane.xlu0 %465 }
 0x272   : > { %939 = vmax.xlane.f32.xlu0 %v938_v7 }
 0x274   : > { %v796_v31 = vpop.xlane.xlu0 %795 }
 0x275   : > { %v872_v22 = vperm.slane %v796_v31, %v5228_v21 }
 0x277   : > { %v900_v28 = vsel %vm400_vm2, %v872_v22, %v871_v20 }
 0x27a   : > { %948 = vmax.xlane.f32.xlu0 %v947_v0 }
 0x27c   : > { %v805_v18 = vpop.xlane.xlu0 %804 }
 0x27d   : > { %v875_v35 = vperm.slane %v805_v18, %v5228_v21  ;;  %v968_v18 = vsel %vm467_vm1, %v5485_v45, -inf  ;;  %v977_v45 = vsel %vm467_vm1, %v5500_v53, -inf  ;;  %v992_v53 = vsel %vm467_vm1, %v5488_v46, -inf }
 0x27e   : > { %v1010_v46 = vsel %vm467_vm1, %v5537_v8, -inf  ;;  %v1028_v8 = vsel %vm467_vm1, %v5557_v6, -inf }
 0x282   : > { %957 = vmax.xlane.f32.xlu0 %v956_v2 }
 0x284   : > { %v814_v42 = vpop.xlane.xlu0 %813 }
 0x285   : > { %v878_v19 = vperm.slane %v814_v42, %v5228_v21 }
 0x28a   : > { %966 = vmax.xlane.f32.xlu0 %v965_v13 }
 0x29c   : > { %v5634_v14 = vpop.xlane.xlu1 %685 }
 0x2a4   : > { %v799_v24 = vpop.xlane.xlu1 %798 }
 0x2a5   : > { %v873_v50 = vperm.slane %v799_v24, %v5228_v21 }
 0x2a7   : > { %v901_v33 = vsel %vm402_vm3, %v873_v50, %v900_v28  ;;  %v974_v28 = vsel %vm467_vm1, %v5458_v56, -inf  ;;  %v953_v56 = vsel %vm467_vm1, %v5402_v63, -inf  ;;  %v971_v63 = vsel %vm467_vm1, %v5435_v27, -inf }
 0x2a8   : > { %v902_v40 = vsel %vm404_vm4, %v874_v30, %v901_v33  ;;  %975 = vmax.xlane.f32.xlu0 %v974_v28  ;;  %v944_v30 = vsel %vm467_vm1, %v5388_v51, -inf  ;;  %v983_v33 = vsel %vm467_vm1, %v5473_v39, -inf  ;;  %v962_v51 = vsel %vm467_vm1, %v5419_v38, -inf }
 0x2a9   : > { %v903_v58 = vsel %vm406_vm5, %v875_v35, %v902_v40  ;;  %v995_v35 = vsel %vm467_vm1, %v5515_v3, -inf  ;;  %v1001_v39 = vsel %vm467_vm1, %v5503_v32, -inf  ;;  %v1013_v3 = vsel %vm467_vm1, %v5540_v37, -inf }
 0x2aa   : > { %v980_v38 = vsel %vm467_vm1, %v5450_v29, -inf  ;;  %v1019_v32 = vsel %vm467_vm1, %v5547_v15, -inf  ;;  %v989_v27 = vsel %vm467_vm1, %v5465_v34, -inf  ;;  %v1031_v37 = vsel %vm467_vm1, %v5562_v26, -inf }
 0x2ab   : > { %v998_v29 = vsel %vm467_vm1, %v5480_v60, -inf  ;;  %v1007_v15 = vsel %vm467_vm1, %v5495_v52, -inf  ;;  %v1016_v34 = vsel %vm467_vm1, %v5575_v62, -inf }
 0x2ac   : > { %v808_v41 = vpop.xlane.xlu1 %807 }
 0x2ad   : > { %v876_v48 = vperm.slane %v808_v41, %v5228_v21 }
 0x2af   : > { %v904_v55 = vsel %vm408_vm6, %v876_v48, %v903_v58 }
 0x2b0   : > { %v905_v4 = vsel %vm410_vm7, %v877_v47, %v904_v55  ;;  %984 = vmax.xlane.f32.xlu0 %v983_v33 }
 0x2b1   : > { %v906_v9 = vsel %vm412_vm8, %v878_v19, %v905_v4 }
 0x2b2   : > { %v920_v10 = vsel %vm237_vm0, %v906_v9, -inf }
 0x2b3   : > { %921 = vmax.xlane.f32.xlu1 %v920_v10 }
 0x2b4   : > { %v913_v44 = vpop.xlane.xlu1 %912 }
 0x2b5   : > { %v927_v16 = vperm.slane %v913_v44, %v5228_v21 }
 0x2b8   : > { %993 = vmax.xlane.f32.xlu0 %v992_v53 }
 0x2bb   : > { %942 = vmax.xlane.f32.xlu1 %v941_v25 }
 0x2c0   : > { %1002 = vmax.xlane.f32.xlu0 %v1001_v39 }
 0x2c3   : > { %951 = vmax.xlane.f32.xlu1 %v950_v61 }
 0x2c6   : > { %v916_v31 = vpop.xlane.xlu2 %915 }
 0x2c7   : > { %v928_v49 = vperm.slane %v916_v31, %v5228_v21 }
 0x2c8   : > { %1011 = vmax.xlane.f32.xlu0 %v1010_v46 }
 0x2c9   : > { %v931_v22 = vsel %vm400_vm2, %v928_v49, %v927_v16 }
 0x2cb   : > { %960 = vmax.xlane.f32.xlu1 %v959_v57 }
 0x2d0   : > { %1020 = vmax.xlane.f32.xlu0 %v1019_v32 }
 0x2d3   : > { %969 = vmax.xlane.f32.xlu1 %v968_v18 }
 0x2d8   : > { %1029 = vmax.xlane.f32.xlu0 %v1028_v8 }
 0x2db   : > { %978 = vmax.xlane.f32.xlu1 %v977_v45 }
 0x2dd   : > { %v919_v11 = vpop.xlane.xlu0 %918 }
 0x2de   : > { %v929_v1 = vperm.slane %v919_v11, %v5228_v21 }
 0x2e0   : > { %v932_v43 = vsel %vm402_vm3, %v929_v1, %v931_v22 }
 0x2e3   : > { %987 = vmax.xlane.f32.xlu1 %v986_v36 }
 0x2e5   : > { %v940_v6 = vpop.xlane.xlu0 %939 }
 0x2e6   : > { %v1066_v48 = vperm.slane %v940_v6, %v5228_v21 }
 0x2eb   : > { %996 = vmax.xlane.f32.xlu1 %v995_v35 }
 0x2ed   : > { %v949_v42 = vpop.xlane.xlu0 %948 }
 0x2ee   : > { %v1069_v4 = vperm.slane %v949_v42, %v5228_v21 }
 0x2f3   : > { %1005 = vmax.xlane.f32.xlu1 %v1004_v59 }
 0x2f5   : > { %v958_v41 = vpop.xlane.xlu0 %957 }
 0x2f6   : > { %v1072_v0 = vperm.slane %v958_v41, %v5228_v21 }
 0x2fb   : > { %1014 = vmax.xlane.f32.xlu1 %v1013_v3 }
 0x2fd   : > { %v967_v19 = vpop.xlane.xlu0 %966 }
 0x303   : > { %1023 = vmax.xlane.f32.xlu1 %v1022_v5 }
 0x30b   : > { %1032 = vmax.xlane.f32.xlu1 %v1031_v37 }
 0x31b   : > { %v976_v57 = vpop.xlane.xlu0 %975 }
 0x323   : > { %v985_v1 = vpop.xlane.xlu0 %984 }
 0x324   : > { %v1081_v39 = vperm.slane %v985_v1, %v5228_v21 }
 0x326   : > { %v922_v20 = vpop.xlane.xlu1 %921 }
 0x327   : > { %v930_v54 = vperm.slane %v922_v20, %v5228_v21 }
 0x329   : > { %v933_v24 = vsel %vm404_vm4, %v930_v54, %v932_v43  ;;  %v1075_v54 = vperm.slane %v967_v19, %v5228_v21 }
 0x32a   : > { %v935_v50 = vsel %vm463_vm9, %v933_v24, -inf }
 0x32b   : > { %936 = vmax.xlane.f32.xlu2 %v935_v50  ;;  %v994_v36 = vpop.xlane.xlu0 %993 }
 0x32e   : > { %v943_v26 = vpop.xlane.xlu1 %942 }
 0x32f   : > { %v1067_v52 = vperm.slane %v943_v26, %v5228_v21 }
 0x331   : > { %v1098_v23 = vsel %vm400_vm2, %v1067_v52, %v1066_v48 }
 0x333   : > { %945 = vmax.xlane.f32.xlu2 %v944_v30  ;;  %v1078_v30 = vperm.slane %v976_v57, %v5228_v21  ;;  %v1003_v32 = vpop.xlane.xlu0 %1002 }
 0x336   : > { %v952_v40 = vpop.xlane.xlu1 %951 }
 0x337   : > { %v1070_v10 = vperm.slane %v952_v40, %v5228_v21 }
 0x33b   : > { %954 = vmax.xlane.f32.xlu2 %v953_v56  ;;  %v1012_v42 = vpop.xlane.xlu0 %1011 }
 0x33e   : > { %v961_v47 = vpop.xlane.xlu1 %960 }
 0x33f   : > { %v1073_v2 = vperm.slane %v961_v47, %v5228_v21  ;;  %v1087_v47 = vperm.slane %v1003_v32, %v5228_v21 }
 0x343   : > { %963 = vmax.xlane.f32.xlu2 %v962_v51 }
 0x346   : > { %v970_v62 = vpop.xlane.xlu1 %969 }
 0x347   : > { %v1076_v43 = vperm.slane %v970_v62, %v5228_v21 }
 0x34b   : > { %972 = vmax.xlane.f32.xlu2 %v971_v63 }
 0x34e   : > { %v979_v44 = vpop.xlane.xlu1 %978 }
 0x34f   : > { %v1079_v56 = vperm.slane %v979_v44, %v5228_v21 }
 0x353   : > { %981 = vmax.xlane.f32.xlu2 %v980_v38 }
 0x356   : > { %v988_v22 = vpop.xlane.xlu1 %987 }
 0x357   : > { %v1082_v37 = vperm.slane %v988_v22, %v5228_v21 }
 0x35b   : > { %990 = vmax.xlane.f32.xlu2 %v989_v27 }
 0x35e   : > { %v997_v53 = vpop.xlane.xlu1 %996 }
 0x363   : > { %999 = vmax.xlane.f32.xlu2 %v998_v29  ;;  %v1084_v29 = vperm.slane %v994_v36, %v5228_v21  ;;  %v5801_v36 = vld [vmem:[%s5029_s14 + $0xb0] sm:$0xff] }
 0x366   : > { %v1006_v27 = vpop.xlane.xlu1 %1005 }
 0x367   : > { %v1088_v52 = vperm.slane %v1006_v27, %v5228_v21  ;;  %v5826_v27 = vld [vmem:[%s5029_s14 + $0x1a0] sm:$0xff] }
 0x36b   : > { %1008 = vmax.xlane.f32.xlu2 %v1007_v15 }
 0x36e   : > { %v1015_v40 = vpop.xlane.xlu1 %1014 }
 0x373   : > { %1017 = vmax.xlane.f32.xlu2 %v1016_v34  ;;  %v1085_v34 = vperm.slane %v997_v53, %v5228_v21  ;;  %v5806_v53 = vld [vmem:[%s5029_s14 + $0xc0] sm:$0xff] }
 0x37b   : > { %1026 = vmax.xlane.f32.xlu2 %v1025_v17 }
 0x39e   : > { %v5724_v60 = vpop.xlane.xlu2 %936 }
 0x3a6   : > { %v946_v58 = vpop.xlane.xlu2 %945 }
 0x3a7   : > { %v1068_v55 = vperm.slane %v946_v58, %v5228_v21 }
 0x3a9   : > { %v1099_v9 = vsel %vm402_vm3, %v1068_v55, %v1098_v23 }
 0x3aa   : > { %v1100_v7 = vsel %vm404_vm4, %v1069_v4, %v1099_v9  ;;  %v1021_v4 = vpop.xlane.xlu0 %1020 }
 0x3ab   : > { %v1101_v13 = vsel %vm406_vm5, %v1070_v10, %v1100_v7  ;;  %v1024_v10 = vpop.xlane.xlu1 %1023  ;;  %v1091_v7 = vperm.slane %v1015_v40, %v5228_v21  ;;  %v1093_v57 = vperm.slane %v1021_v4, %v5228_v21 }
 0x3ae   : > { %v955_v25 = vpop.xlane.xlu2 %954 }
 0x3af   : > { %v1071_v61 = vperm.slane %v955_v25, %v5228_v21  ;;  %v1090_v25 = vperm.slane %v1012_v42, %v5228_v21 }
 0x3b1   : > { %v1102_v31 = vsel %vm408_vm6, %v1071_v61, %v1101_v13 }
 0x3b2   : > { %v1103_v11 = vsel %vm410_vm7, %v1072_v0, %v1102_v31  ;;  %v1030_v44 = vpop.xlane.xlu0 %1029  ;;  %v1094_v31 = vperm.slane %v1024_v10, %v5228_v21 }
 0x3b3   : > { %v1104_v16 = vsel %vm412_vm8, %v1073_v2, %v1103_v11  ;;  %v1119_v2 = vsel %vm400_vm2, %v1091_v7, %v1090_v25  ;;  %v1033_v11 = vpop.xlane.xlu1 %1032  ;;  %v5869_v7 = vld [vmem:[%s5029_s14 + $0x2a0] sm:$0xff]  ;;  %v5872_v25 = vld [vmem:[%s5029_s14 + $0x2b0] sm:$0xff] }
 0x3b4   : > { %v1130_v49 = vsel %vm237_vm0, %v1104_v16, -inf }
 0x3b5   : > { %1131 = vmax.xlane.f32.xlu2 %v1130_v49 }
 0x3b6   : > { %v964_v18 = vpop.xlane.xlu2 %963 }
 0x3b7   : > { %v1074_v20 = vperm.slane %v964_v18, %v5228_v21  ;;  %v1096_v18 = vperm.slane %v1030_v44, %v5228_v21  ;;  %v5887_v44 = vld [vmem:[%s5029_s14 + $0x2e0] sm:$0xff] }
 0x3b9   : > { %v1105_v24 = vsel %vm400_vm2, %v1075_v54, %v1074_v20  ;;  %v1097_v20 = vperm.slane %v1033_v11, %v5228_v21  ;;  %v1256_v11 = vsel %vm237_vm0, %v5887_v44, -inf }
 0x3ba   : > { %v1106_v45 = vsel %vm402_vm3, %v1076_v43, %v1105_v24 }
 0x3be   : > { %v973_v50 = vpop.xlane.xlu2 %972 }
 0x3bf   : > { %v1077_v28 = vperm.slane %v973_v50, %v5228_v21 }
 0x3c1   : > { %v1107_v33 = vsel %vm404_vm4, %v1077_v28, %v1106_v45  ;;  %v5791_v28 = vld [vmem:[%s5029_s14 + $0x80] sm:$0xff] }
 0x3c2   : > { %v1108_v35 = vsel %vm406_vm5, %v1078_v30, %v1107_v33  ;;  %v1190_v45 = vsel %vm237_vm0, %v5791_v28, -inf  ;;  %v5796_v30 = vld [vmem:[%s5029_s14 + $0x90] sm:$0xff] }
 0x3c3   : > { %v1109_v63 = vsel %vm408_vm6, %v1079_v56, %v1108_v35  ;;  %v1193_v33 = vsel %vm237_vm0, %v5796_v30, -inf  ;;  %v1199_v56 = vsel %vm237_vm0, %v5801_v36, -inf  ;;  %v1202_v35 = vsel %vm237_vm0, %v5806_v53, -inf }
 0x3c6   : > { %v982_v51 = vpop.xlane.xlu2 %981 }
 0x3c7   : > { %v1080_v59 = vperm.slane %v982_v51, %v5228_v21  ;;  %v5811_v51 = vld [vmem:[%s5029_s14 + $0xe0] sm:$0xff] }
 0x3c9   : > { %v1110_v46 = vsel %vm410_vm7, %v1080_v59, %v1109_v63  ;;  %v5816_v59 = vld [vmem:[%s5029_s14 + $0xf0] sm:$0xff] }
 0x3ca   : > { %v1111_v3 = vsel %vm412_vm8, %v1081_v39, %v1110_v46  ;;  %v1208_v39 = vsel %vm237_vm0, %v5811_v51, -inf  ;;  %v1211_v63 = vsel %vm237_vm0, %v5816_v59, -inf  ;;  %v5821_v46 = vld [vmem:[%s5029_s14 + $0x190] sm:$0xff] }
 0x3cb   : > { %v1133_v38 = vsel %vm237_vm0, %v1111_v3, -inf }
 0x3cc   : > { %1134 = vmax.xlane.f32.xlu0 %v1133_v38  ;;  %v1217_v38 = vsel %vm237_vm0, %v5821_v46, -inf }
 0x3ce   : > { %v991_v5 = vpop.xlane.xlu2 %990 }
 0x3cf   : > { %v1083_v8 = vperm.slane %v991_v5, %v5228_v21 }
 0x3d1   : > { %v1112_v15 = vsel %vm400_vm2, %v1083_v8, %v1082_v37  ;;  %v1220_v37 = vsel %vm237_vm0, %v5826_v27, -inf }
 0x3d2   : > { %v1113_v17 = vsel %vm402_vm3, %v1084_v29, %v1112_v15 }
 0x3d3   : > { %v1114_v41 = vsel %vm404_vm4, %v1085_v34, %v1113_v17 }
 0x3d6   : > { %v1000_v6 = vpop.xlane.xlu2 %999 }
 0x3d7   : > { %v1086_v26 = vperm.slane %v1000_v6, %v5228_v21 }
 0x3d9   : > { %v1115_v48 = vsel %vm406_vm5, %v1086_v26, %v1114_v41  ;;  %v5839_v41 = vld [vmem:[%s5029_s14 + $0x1c0] sm:$0xff] }
 0x3da   : > { %v1116_v19 = vsel %vm408_vm6, %v1087_v47, %v1115_v48  ;;  %v5842_v47 = vld [vmem:[%s5029_s14 + $0x1d0] sm:$0xff]  ;;  %v1226_v48 = vsel %vm237_vm0, %v5839_v41, -inf }
 0x3db   : > { %v1117_v55 = vsel %vm410_vm7, %v1088_v52, %v1116_v19  ;;  %v1229_v52 = vsel %vm237_vm0, %v5842_v47, -inf  ;;  %v5849_v19 = vld [vmem:[%s5029_s14 + $0xa0] sm:$0xff] }
 0x3de   : > { %v1009_v58 = vpop.xlane.xlu2 %1008 }
 0x3df   : > { %v1089_v62 = vperm.slane %v1009_v58, %v5228_v21  ;;  %v1196_v58 = vsel %vm237_vm0, %v5849_v19, -inf }
 0x3e1   : > { %v1118_v23 = vsel %vm412_vm8, %v1089_v62, %v1117_v55  ;;  %v5854_v62 = vld [vmem:[%s5029_s14 + $0x1f0] sm:$0xff]  ;;  %v5857_v55 = vld [vmem:[%s5029_s14 + $0x280] sm:$0xff] }
 0x3e2   : > { %v1136_v9 = vsel %vm237_vm0, %v1118_v23, -inf  ;;  %v1235_v23 = vsel %vm237_vm0, %v5854_v62, -inf  ;;  %v1238_v4 = vsel %vm237_vm0, %v5857_v55, -inf }
 0x3e3   : > { %1137 = vmax.xlane.f32.xlu1 %v1136_v9  ;;  %v5864_v9 = vld [vmem:[%s5029_s14 + $0xd0] sm:$0xff] }
 0x3e4   : > { %v1205_v10 = vsel %vm237_vm0, %v5864_v9, -inf }
 0x3e6   : > { %v1018_v0 = vpop.xlane.xlu2 %1017 }
 0x3e7   : > { %v1092_v61 = vperm.slane %v1018_v0, %v5228_v21  ;;  %v1244_v0 = vsel %vm237_vm0, %v5869_v7, -inf }
 0x3e9   : > { %v1120_v13 = vsel %vm402_vm3, %v1092_v61, %v1119_v2  ;;  %v1247_v61 = vsel %vm237_vm0, %v5872_v25, -inf  ;;  %v5879_v2 = vld [vmem:[%s5029_s14 + $0x180] sm:$0xff] }
 0x3ea   : > { %v1121_v16 = vsel %vm404_vm4, %v1093_v57, %v1120_v13  ;;  %v1214_v57 = vsel %vm237_vm0, %v5879_v2, -inf  ;;  %v5884_v13 = vld [vmem:[%s5029_s14 + $0x2d0] sm:$0xff] }
 0x3eb   : > { %v1122_v54 = vsel %vm406_vm5, %v1094_v31, %v1121_v16  ;;  %1191 = vmax.xlane.f32.xlu1 %v1190_v45  ;;  %v1253_v31 = vsel %vm237_vm0, %v5884_v13, -inf  ;;  %v5894_v16 = vld [vmem:[%s5029_s14 + $0x1b0] sm:$0xff]  ;;  %v5919_v45 = vld [vmem:[%s5029_s14 + $0x3c0] sm:$0xff] }
 0x3ee   : > { %v1027_v49 = vpop.xlane.xlu2 %1026 }
 0x3ef   : > { %v1095_v1 = vperm.slane %v1027_v49, %v5228_v21  ;;  %v1223_v49 = vsel %vm237_vm0, %v5894_v16, -inf }
 0x3f1   : > { %v1123_v22 = vsel %vm408_vm6, %v1095_v1, %v1122_v54  ;;  %v5902_v1 = vld [vmem:[%s5029_s14 + $0x390] sm:$0xff] }
 0x3f2   : > { %v1124_v43 = vsel %vm410_vm7, %v1096_v18, %v1123_v22  ;;  %v5899_v18 = vld [vmem:[%s5029_s14 + $0x380] sm:$0xff]  ;;  %v1265_v54 = vsel %vm237_vm0, %v5902_v1, -inf }
 0x3f3   : > { %v1125_v24 = vsel %vm412_vm8, %v1097_v20, %v1124_v43  ;;  %1200 = vmax.xlane.f32.xlu1 %v1199_v56  ;;  %v1262_v20 = vsel %vm237_vm0, %v5899_v18, -inf  ;;  %v5909_v22 = vld [vmem:[%s5029_s14 + $0x1e0] sm:$0xff]  ;;  %v5924_v56 = vld [vmem:[%s5029_s14 + $0x290] sm:$0xff] }
 0x3f4   : > { %v1139_v50 = vsel %vm237_vm0, %v1125_v24, -inf  ;;  %v1232_v43 = vsel %vm237_vm0, %v5909_v22, -inf  ;;  %v5914_v24 = vld [vmem:[%s5029_s14 + $0x3b0] sm:$0xff] }
 0x3f5   : > { %1140 = vmax.xlane.f32.xlu2 %v1139_v50  ;;  %v1271_v50 = vsel %vm237_vm0, %v5914_v24, -inf }
 0x3fb   : > { %1209 = vmax.xlane.f32.xlu1 %v1208_v39  ;;  %v5929_v39 = vld [vmem:[%s5029_s14 + $0x3e0] sm:$0xff] }
 0x3fd   : > { %1194 = vmax.xlane.f32.xlu2 %v1193_v33  ;;  %v1274_v33 = vsel %vm237_vm0, %v5919_v45, -inf }
 0x403   : > { %1218 = vmax.xlane.f32.xlu1 %v1217_v38 }
 0x405   : > { %1203 = vmax.xlane.f32.xlu2 %v1202_v35  ;;  %v1241_v35 = vsel %vm237_vm0, %v5924_v56, -inf }
 0x40b   : > { %1227 = vmax.xlane.f32.xlu1 %v1226_v48 }
 0x40d   : > { %1212 = vmax.xlane.f32.xlu2 %v1211_v63  ;;  %v1280_v63 = vsel %vm237_vm0, %v5929_v39, -inf }
 0x413   : > { %1236 = vmax.xlane.f32.xlu1 %v1235_v23 }
 0x415   : > { %1221 = vmax.xlane.f32.xlu2 %v1220_v37 }
 0x41b   : > { %1245 = vmax.xlane.f32.xlu1 %v1244_v0 }
 0x41d   : > { %1230 = vmax.xlane.f32.xlu2 %v1229_v52 }
 0x423   : > { %1254 = vmax.xlane.f32.xlu1 %v1253_v31 }
 0x425   : > { %1239 = vmax.xlane.f32.xlu2 %v1238_v4 }
 0x428   : > { %v1132_v3 = vpop.xlane.xlu2 %1131 }
 0x429   : > { %v1146_v15 = vperm.slane %v1132_v3, %v5228_v21  ;;  %v5934_v3 = vld [vmem:[%s5029_s14 + $0x3f0] sm:$0xff] }
 0x42a   : > { %v1283_v38 = vsel %vm237_vm0, %v5934_v3, -inf }
 0x42b   : > { %1263 = vmax.xlane.f32.xlu1 %v1262_v20 }
 0x42d   : > { %1248 = vmax.xlane.f32.xlu2 %v1247_v61 }
 0x433   : > { %1272 = vmax.xlane.f32.xlu1 %v1271_v50 }
 0x435   : > { %1257 = vmax.xlane.f32.xlu2 %v1256_v11 }
 0x43b   : > { %1281 = vmax.xlane.f32.xlu1 %v1280_v63 }
 0x43d   : > { %1266 = vmax.xlane.f32.xlu2 %v1265_v54 }
 0x43f   : > { %v1135_v32 = vpop.xlane.xlu0 %1134 }
 0x440   : > { %v1147_v8 = vperm.slane %v1135_v32, %v5228_v21  ;;  %v5939_v32 = vld [vmem:[%s5029_s14 + $0x2c0] sm:$0xff] }
 0x442   : > { %v1150_v17 = vsel %vm400_vm2, %v1147_v8, %v1146_v15  ;;  %v5944_v8 = vld [vmem:[%s5029_s14 + $0x2f0] sm:$0xff] }
 0x443   : > { %v1259_v37 = vsel %vm237_vm0, %v5944_v8, -inf }
 0x445   : > { %1275 = vmax.xlane.f32.xlu2 %v1274_v33 }
 0x44d   : > { %1284 = vmax.xlane.f32.xlu2 %v1283_v38 }
 0x456   : > { %v1138_v5 = vpop.xlane.xlu1 %1137 }
 0x457   : > { %v1148_v29 = vperm.slane %v1138_v5, %v5228_v21  ;;  %v1250_v5 = vsel %vm237_vm0, %v5939_v32, -inf }
 0x459   : > { %v1151_v26 = vsel %vm402_vm3, %v1148_v29, %v1150_v17  ;;  %v5949_v29 = vld [vmem:[%s5029_s14 + $0x3a0] sm:$0xff] }
 0x45a   : > { %v1268_v15 = vsel %vm237_vm0, %v5949_v29, -inf }
 0x468   : > { %v1141_v34 = vpop.xlane.xlu2 %1140 }
 0x469   : > { %v1149_v6 = vperm.slane %v1141_v34, %v5228_v21  ;;  %v5954_v34 = vld [vmem:[%s5029_s14 + $0x3d0] sm:$0xff] }
 0x46a   : > { %v1277_v17 = vsel %vm237_vm0, %v5954_v34, -inf }
 0x46b   : > { %v1152_v42 = vsel %vm404_vm4, %v1149_v6, %v1151_v26  ;;  %v1192_v6 = vpop.xlane.xlu1 %1191 }
 0x46c   : > { %v1154_v40 = vsel %vm463_vm9, %v1152_v42, -inf  ;;  %v1318_v23 = vperm.slane %v1192_v6, %v5228_v21 }
 0x46d   : > { %1155 = vmax.xlane.f32.xlu0 %v1154_v40 }
 0x470   : > { %v1195_v26 = vpop.xlane.xlu2 %1194 }
 0x471   : > { %v1319_v4 = vperm.slane %v1195_v26, %v5228_v21 }
 0x473   : > { %v1201_v42 = vpop.xlane.xlu1 %1200  ;;  %v1350_v31 = vsel %vm400_vm2, %v1319_v4, %v1318_v23 }
 0x474   : > { %v1321_v11 = vperm.slane %v1201_v42, %v5228_v21 }
 0x475   : > { %1197 = vmax.xlane.f32.xlu0 %v1196_v58 }
 0x478   : > { %v1204_v40 = vpop.xlane.xlu2 %1203 }
 0x479   : > { %v1322_v20 = vperm.slane %v1204_v40, %v5228_v21 }
 0x47b   : > { %v1210_v48 = vpop.xlane.xlu1 %1209 }
 0x47d   : > { %1206 = vmax.xlane.f32.xlu0 %v1205_v10 }
 0x480   : > { %v1213_v52 = vpop.xlane.xlu2 %1212 }
 0x483   : > { %v1219_v10 = vpop.xlane.xlu1 %1218 }
 0x484   : > { %v1327_v40 = vperm.slane %v1219_v10, %v5228_v21 }
 0x485   : > { %1215 = vmax.xlane.f32.xlu0 %v1214_v57 }
 0x488   : > { %v1222_v61 = vpop.xlane.xlu2 %1221 }
 0x489   : > { %v1328_v23 = vperm.slane %v1222_v61, %v5228_v21 }
 0x48b   : > { %v1228_v63 = vpop.xlane.xlu1 %1227 }
 0x48d   : > { %1224 = vmax.xlane.f32.xlu0 %v1223_v49 }
 0x493   : > { %v1237_v42 = vpop.xlane.xlu1 %1236 }
 0x494   : > { %v1333_v61 = vperm.slane %v1237_v42, %v5228_v21 }
 0x495   : > { %1233 = vmax.xlane.f32.xlu0 %v1232_v43  ;;  %v1324_v43 = vperm.slane %v1210_v48, %v5228_v21 }
 0x49d   : > { %1242 = vmax.xlane.f32.xlu0 %v1241_v35  ;;  %v1325_v35 = vperm.slane %v1213_v52, %v5228_v21 }
 0x4a5   : > { %1251 = vmax.xlane.f32.xlu0 %v1250_v5  ;;  %v1231_v5 = vpop.xlane.xlu2 %1230 }
 0x4ad   : > { %1260 = vmax.xlane.f32.xlu0 %v1259_v37  ;;  %v1240_v52 = vpop.xlane.xlu2 %1239 }
 0x4b5   : > { %1269 = vmax.xlane.f32.xlu0 %v1268_v15  ;;  %v1249_v10 = vpop.xlane.xlu2 %1248 }
 0x4bd   : > { %1278 = vmax.xlane.f32.xlu0 %v1277_v17 }
 0x4e0   : > { %v5958_v58 = vpop.xlane.xlu0 %1155 }
 0x4e8   : > { %v1198_v0 = vpop.xlane.xlu0 %1197 }
 0x4e9   : > { %v1320_v57 = vperm.slane %v1198_v0, %v5228_v21 }
 0x4eb   : > { %v1351_v49 = vsel %vm402_vm3, %v1320_v57, %v1350_v31 }
 0x4ec   : > { %v1352_v54 = vsel %vm404_vm4, %v1321_v11, %v1351_v49  ;;  %v1330_v11 = vperm.slane %v1228_v63, %v5228_v21 }
 0x4ed   : > { %v1353_v38 = vsel %vm406_vm5, %v1322_v20, %v1352_v54  ;;  %v1246_v20 = vpop.xlane.xlu1 %1245  ;;  %v1331_v54 = vperm.slane %v1231_v5, %v5228_v21  ;;  %v1258_v5 = vpop.xlane.xlu2 %1257 }
 0x4ee   : > { %v1336_v42 = vperm.slane %v1246_v20, %v5228_v21 }
 0x4f0   : > { %v1207_v50 = vpop.xlane.xlu0 %1206 }
 0x4f1   : > { %v1323_v33 = vperm.slane %v1207_v50, %v5228_v21 }
 0x4f3   : > { %v1354_v37 = vsel %vm408_vm6, %v1323_v33, %v1353_v38 }
 0x4f4   : > { %v1355_v15 = vsel %vm410_vm7, %v1324_v43, %v1354_v37 }
 0x4f5   : > { %v1356_v17 = vsel %vm412_vm8, %v1325_v35, %v1355_v15  ;;  %v1255_v15 = vpop.xlane.xlu1 %1254 }
 0x4f6   : > { %v1382_v6 = vsel %vm237_vm0, %v1356_v17, -inf }
 0x4f7   : > { %1383 = vmax.xlane.f32.xlu0 %v1382_v6 }
 0x4f8   : > { %v1216_v26 = vpop.xlane.xlu0 %1215 }
 0x4f9   : > { %v1326_v48 = vperm.slane %v1216_v26, %v5228_v21  ;;  %v1334_v26 = vperm.slane %v1240_v52, %v5228_v21  ;;  %v1340_v52 = vperm.slane %v1258_v5, %v5228_v21 }
 0x4fb   : > { %v1357_v4 = vsel %vm400_vm2, %v1327_v40, %v1326_v48  ;;  %v1337_v48 = vperm.slane %v1249_v10, %v5228_v21 }
 0x4fc   : > { %v1358_v31 = vsel %vm402_vm3, %v1328_v23, %v1357_v4 }
 0x500   : > { %v1225_v0 = vpop.xlane.xlu0 %1224 }
 0x501   : > { %v1329_v57 = vperm.slane %v1225_v0, %v5228_v21 }
 0x503   : > { %v1359_v49 = vsel %vm404_vm4, %v1329_v57, %v1358_v31  ;;  %v1264_v57 = vpop.xlane.xlu1 %1263  ;;  %v1267_v31 = vpop.xlane.xlu2 %1266 }
 0x504   : > { %v1360_v43 = vsel %vm406_vm5, %v1330_v11, %v1359_v49  ;;  %v1339_v49 = vperm.slane %v1255_v15, %v5228_v21 }
 0x505   : > { %v1361_v35 = vsel %vm408_vm6, %v1331_v54, %v1360_v43 }
 0x508   : > { %v1234_v50 = vpop.xlane.xlu0 %1233 }
 0x509   : > { %v1332_v33 = vperm.slane %v1234_v50, %v5228_v21 }
 0x50b   : > { %v1362_v38 = vsel %vm410_vm7, %v1332_v33, %v1361_v35  ;;  %v1273_v33 = vpop.xlane.xlu1 %1272 }
 0x50c   : > { %v1363_v37 = vsel %vm412_vm8, %v1333_v61, %v1362_v38  ;;  %v1276_v38 = vpop.xlane.xlu2 %1275 }
 0x50d   : > { %v1385_v63 = vsel %vm237_vm0, %v1363_v37, -inf  ;;  %v1342_v37 = vperm.slane %v1264_v57, %v5228_v21 }
 0x50e   : > { %1386 = vmax.xlane.f32.xlu1 %v1385_v63  ;;  %v1343_v63 = vperm.slane %v1267_v31, %v5228_v21 }
 0x510   : > { %v1243_v17 = vpop.xlane.xlu0 %1242  ;;  %v1371_v5 = vsel %vm400_vm2, %v1343_v63, %v1342_v37 }
 0x511   : > { %v1335_v6 = vperm.slane %v1243_v17, %v5228_v21 }
 0x513   : > { %v1364_v40 = vsel %vm400_vm2, %v1335_v6, %v1334_v26  ;;  %v1345_v6 = vperm.slane %v1273_v33, %v5228_v21  ;;  %v1427_v33 = vsel %vm467_vm1, %v5811_v51, -inf }
 0x514   : > { %v1365_v23 = vsel %vm402_vm3, %v1336_v42, %v1364_v40  ;;  %v1282_v42 = vpop.xlane.xlu1 %1281  ;;  %v1346_v40 = vperm.slane %v1276_v38, %v5228_v21 }
 0x515   : > { %v1366_v11 = vsel %vm404_vm4, %v1337_v48, %v1365_v23  ;;  %v1285_v48 = vpop.xlane.xlu2 %1284 }
 0x516   : > { %v1349_v31 = vperm.slane %v1285_v48, %v5228_v21  ;;  %v1457_v48 = vsel %vm467_vm1, %v5857_v55, -inf  ;;  %v1475_v55 = vsel %vm467_vm1, %v5887_v44, -inf  ;;  %v1493_v44 = vsel %vm467_vm1, %v5919_v45, -inf }
 0x517   : > { %v1487_v45 = vsel %vm467_vm1, %v5949_v29, -inf }
 0x518   : > { %v1252_v4 = vpop.xlane.xlu0 %1251 }
 0x519   : > { %v1338_v0 = vperm.slane %v1252_v4, %v5228_v21 }
 0x51b   : > { %v1367_v54 = vsel %vm406_vm5, %v1338_v0, %v1366_v11  ;;  %v1348_v0 = vperm.slane %v1282_v42, %v5228_v21  ;;  %v1415_v42 = vsel %vm467_vm1, %v5849_v19, -inf  ;;  %v1433_v19 = vsel %vm467_vm1, %v5879_v2, -inf }
 0x51c   : > { %v1368_v20 = vsel %vm408_vm6, %v1339_v49, %v1367_v54  ;;  %v1451_v2 = vsel %vm467_vm1, %v5909_v22, -inf  ;;  %v1469_v22 = vsel %vm467_vm1, %v5939_v32, -inf }
 0x51d   : > { %v1369_v50 = vsel %vm410_vm7, %v1340_v52, %v1368_v20 }
 0x520   : > { %v1261_v43 = vpop.xlane.xlu0 %1260 }
 0x521   : > { %v1341_v10 = vperm.slane %v1261_v43, %v5228_v21  ;;  %v1409_v43 = vsel %vm467_vm1, %v5791_v28, -inf  ;;  %v1430_v28 = vsel %vm467_vm1, %v5816_v59, -inf }
 0x523   : > { %v1370_v61 = vsel %vm412_vm8, %v1341_v10, %v1369_v50  ;;  %v1412_v10 = vsel %vm467_vm1, %v5796_v30, -inf  ;;  %v1418_v50 = vsel %vm467_vm1, %v5801_v36, -inf  ;;  %v1436_v30 = vsel %vm467_vm1, %v5821_v46, -inf }
 0x524   : > { %v1388_v35 = vsel %vm237_vm0, %v1370_v61, -inf  ;;  %v1421_v61 = vsel %vm467_vm1, %v5806_v53, -inf  ;;  %v1439_v53 = vsel %vm467_vm1, %v5826_v27, -inf  ;;  %v1445_v27 = vsel %vm467_vm1, %v5839_v41, -inf }
 0x525   : > { %1389 = vmax.xlane.f32.xlu2 %v1388_v35  ;;  %v1424_v41 = vsel %vm467_vm1, %v5864_v9, -inf  ;;  %v1442_v9 = vsel %vm467_vm1, %v5894_v16, -inf  ;;  %v1460_v16 = vsel %vm467_vm1, %v5924_v56, -inf  ;;  %v1496_v56 = vsel %vm467_vm1, %v5954_v34, -inf }
 0x528   : > { %v1270_v15 = vpop.xlane.xlu0 %1269 }
 0x529   : > { %v1344_v17 = vperm.slane %v1270_v15, %v5228_v21 }
 0x52b   : > { %v1372_v26 = vsel %vm402_vm3, %v1344_v17, %v1371_v5 }
 0x52c   : > { %v1373_v23 = vsel %vm404_vm4, %v1345_v6, %v1372_v26  ;;  %v1448_v26 = vsel %vm467_vm1, %v5842_v47, -inf  ;;  %v1463_v47 = vsel %vm467_vm1, %v5869_v7, -inf  ;;  %v1481_v7 = vsel %vm467_vm1, %v5899_v18, -inf }
 0x52d   : > { %v1374_v11 = vsel %vm406_vm5, %v1346_v40, %v1373_v23  ;;  %1410 = vmax.xlane.f32.xlu2 %v1409_v43  ;;  %v1454_v40 = vsel %vm467_vm1, %v5854_v62, -inf  ;;  %v1466_v23 = vsel %vm467_vm1, %v5872_v25, -inf  ;;  %v1472_v62 = vsel %vm467_vm1, %v5884_v13, -inf }
 0x52e   : > { %v1484_v25 = vsel %vm467_vm1, %v5902_v1, -inf  ;;  %v1490_v13 = vsel %vm467_vm1, %v5914_v24, -inf  ;;  %v1499_v18 = vsel %vm467_vm1, %v5929_v39, -inf  ;;  %v1502_v1 = vsel %vm467_vm1, %v5934_v3, -inf }
 0x52f   : > { %v1478_v24 = vsel %vm467_vm1, %v5944_v8, -inf }
 0x530   : > { %v1279_v4 = vpop.xlane.xlu0 %1278 }
 0x531   : > { %v1347_v57 = vperm.slane %v1279_v4, %v5228_v21 }
 0x533   : > { %v1375_v49 = vsel %vm408_vm6, %v1347_v57, %v1374_v11 }
 0x534   : > { %v1376_v54 = vsel %vm410_vm7, %v1348_v0, %v1375_v49 }
 0x535   : > { %v1377_v52 = vsel %vm412_vm8, %v1349_v31, %v1376_v54  ;;  %1419 = vmax.xlane.f32.xlu2 %v1418_v50 }
 0x536   : > { %v1391_v20 = vsel %vm237_vm0, %v1377_v52, -inf }
 0x537   : > { %1392 = vmax.xlane.f32.xlu0 %v1391_v20 }
 0x53d   : > { %1428 = vmax.xlane.f32.xlu2 %v1427_v33 }
 0x53f   : > { %1413 = vmax.xlane.f32.xlu0 %v1412_v10 }
 0x545   : > { %1437 = vmax.xlane.f32.xlu2 %v1436_v30 }
 0x547   : > { %1422 = vmax.xlane.f32.xlu0 %v1421_v61 }
 0x54d   : > { %1446 = vmax.xlane.f32.xlu2 %v1445_v27 }
 0x54f   : > { %1431 = vmax.xlane.f32.xlu0 %v1430_v28 }
 0x555   : > { %1455 = vmax.xlane.f32.xlu2 %v1454_v40 }
 0x557   : > { %1440 = vmax.xlane.f32.xlu0 %v1439_v53 }
 0x55d   : > { %1464 = vmax.xlane.f32.xlu2 %v1463_v47 }
 0x55f   : > { %1449 = vmax.xlane.f32.xlu0 %v1448_v26 }
 0x565   : > { %1473 = vmax.xlane.f32.xlu2 %v1472_v62 }
 0x567   : > { %1458 = vmax.xlane.f32.xlu0 %v1457_v48 }
 0x56a   : > { %v1384_v35 = vpop.xlane.xlu0 %1383 }
 0x56b   : > { %v1398_v51 = vperm.slane %v1384_v35, %v5228_v21 }
 0x56d   : > { %1482 = vmax.xlane.f32.xlu2 %v1481_v7 }
 0x56f   : > { %1467 = vmax.xlane.f32.xlu0 %v1466_v23 }
 0x575   : > { %1491 = vmax.xlane.f32.xlu2 %v1490_v13 }
 0x577   : > { %1476 = vmax.xlane.f32.xlu0 %v1475_v55 }
 0x57d   : > { %1500 = vmax.xlane.f32.xlu2 %v1499_v18 }
 0x57f   : > { %1485 = vmax.xlane.f32.xlu0 %v1484_v25 }
 0x581   : > { %v1387_v38 = vpop.xlane.xlu1 %1386 }
 0x582   : > { %v1399_v37 = vperm.slane %v1387_v38, %v5228_v21 }
 0x584   : > { %v1402_v59 = vsel %vm400_vm2, %v1399_v37, %v1398_v51 }
 0x587   : > { %1494 = vmax.xlane.f32.xlu0 %v1493_v44 }
 0x58f   : > { %1503 = vmax.xlane.f32.xlu0 %v1502_v1 }
 0x598   : > { %v1390_v36 = vpop.xlane.xlu2 %1389 }
 0x599   : > { %v1400_v63 = vperm.slane %v1390_v36, %v5228_v21 }
 0x59b   : > { %v1403_v46 = vsel %vm402_vm3, %v1400_v63, %v1402_v59 }
 0x5a0   : > { %v1411_v39 = vpop.xlane.xlu2 %1410 }
 0x5a1   : > { %v1537_v11 = vperm.slane %v1411_v39, %v5228_v21 }
 0x5a8   : > { %v1420_v4 = vpop.xlane.xlu2 %1419 }
 0x5a9   : > { %v1540_v20 = vperm.slane %v1420_v4, %v5228_v21 }
 0x5aa   : > { %v1393_v15 = vpop.xlane.xlu0 %1392 }
 0x5ab   : > { %v1401_v17 = vperm.slane %v1393_v15, %v5228_v21 }
 0x5ad   : > { %v1404_v5 = vsel %vm404_vm4, %v1401_v17, %v1403_v46 }
 0x5ae   : > { %v1406_v6 = vsel %vm463_vm9, %v1404_v5, -inf }
 0x5af   : > { %1407 = vmax.xlane.f32.xlu1 %v1406_v6 }
 0x5b0   : > { %v1429_v57 = vpop.xlane.xlu2 %1428 }
 0x5b1   : > { %v1543_v61 = vperm.slane %v1429_v57, %v5228_v21 }
 0x5b2   : > { %v1414_v3 = vpop.xlane.xlu0 %1413 }
 0x5b3   : > { %v1538_v8 = vperm.slane %v1414_v3, %v5228_v21 }
 0x5b5   : > { %v1569_v34 = vsel %vm400_vm2, %v1538_v8, %v1537_v11 }
 0x5b7   : > { %1416 = vmax.xlane.f32.xlu1 %v1415_v42 }
 0x5b8   : > { %v1438_v49 = vpop.xlane.xlu2 %1437 }
 0x5b9   : > { %v1546_v17 = vperm.slane %v1438_v49, %v5228_v21 }
 0x5ba   : > { %v1423_v0 = vpop.xlane.xlu0 %1422 }
 0x5bb   : > { %v1541_v10 = vperm.slane %v1423_v0, %v5228_v21 }
 0x5bf   : > { %1425 = vmax.xlane.f32.xlu1 %v1424_v41 }
 0x5c0   : > { %v1447_v35 = vpop.xlane.xlu2 %1446 }
 0x5c1   : > { %v1549_v48 = vperm.slane %v1447_v35, %v5228_v21 }
 0x5c2   : > { %v1432_v31 = vpop.xlane.xlu0 %1431 }
 0x5c3   : > { %v1544_v30 = vperm.slane %v1432_v31, %v5228_v21 }
 0x5c7   : > { %1434 = vmax.xlane.f32.xlu1 %v1433_v19 }
 0x5c8   : > { %v1456_v59 = vpop.xlane.xlu2 %1455 }
 0x5ca   : > { %v1441_v29 = vpop.xlane.xlu0 %1440 }
 0x5cb   : > { %v1547_v6 = vperm.slane %v1441_v29, %v5228_v21 }
 0x5cf   : > { %1443 = vmax.xlane.f32.xlu1 %v1442_v9  ;;  %v1552_v9 = vperm.slane %v1456_v59, %v5228_v21 }
 0x5d0   : > { %v1465_v47 = vpop.xlane.xlu2 %1464 }
 0x5d2   : > { %v1450_v36 = vpop.xlane.xlu0 %1449 }
 0x5d3   : > { %v1550_v23 = vperm.slane %v1450_v36, %v5228_v21 }
 0x5d7   : > { %1452 = vmax.xlane.f32.xlu1 %v1451_v2 }
 0x5da   : > { %v1459_v5 = vpop.xlane.xlu0 %1458 }
 0x5df   : > { %1461 = vmax.xlane.f32.xlu1 %v1460_v16  ;;  %v1474_v16 = vpop.xlane.xlu2 %1473 }
 0x5e0   : > { %v1558_v8 = vperm.slane %v1474_v16, %v5228_v21 }
 0x5e2   : > { %v1468_v19 = vpop.xlane.xlu0 %1467 }
 0x5e3   : > { %v1556_v39 = vperm.slane %v1468_v19, %v5228_v21  ;;  %v6173_v19 = vld [vmem:[%s5029_s14 + $0xb8] sm:$0xff] }
 0x5e7   : > { %1470 = vmax.xlane.f32.xlu1 %v1469_v22  ;;  %v1483_v57 = vpop.xlane.xlu2 %1482 }
 0x5ea   : > { %v1477_v1 = vpop.xlane.xlu0 %1476 }
 0x5ef   : > { %1479 = vmax.xlane.f32.xlu1 %v1478_v24  ;;  %v1553_v24 = vperm.slane %v1459_v5, %v5228_v21 }
 0x5f2   : > { %v1486_v31 = vpop.xlane.xlu0 %1485 }
 0x5f7   : > { %1488 = vmax.xlane.f32.xlu1 %v1487_v45  ;;  %v1555_v45 = vperm.slane %v1465_v47, %v5228_v21  ;;  %v6168_v47 = vld [vmem:[%s5029_s14 + $0x98] sm:$0xff] }
 0x5ff   : > { %1497 = vmax.xlane.f32.xlu1 %v1496_v56 }
 0x622   : > { %v6096_v32 = vpop.xlane.xlu1 %1407 }
 0x623   : > { %8215 = vst [vmem:[#allocation11_spill] sm:$0xff] %v6096_v32 }
 0x62a   : > { %v1417_v54 = vpop.xlane.xlu1 %1416 }
 0x62b   : > { %v1539_v52 = vperm.slane %v1417_v54, %v5228_v21  ;;  %v1559_v54 = vperm.slane %v1477_v1, %v5228_v21 }
 0x62d   : > { %v1570_v43 = vsel %vm402_vm3, %v1539_v52, %v1569_v34 }
 0x62e   : > { %v1571_v50 = vsel %vm404_vm4, %v1540_v20, %v1570_v43 }
 0x62f   : > { %v1572_v38 = vsel %vm406_vm5, %v1541_v10, %v1571_v50  ;;  %v1492_v10 = vpop.xlane.xlu2 %1491 }
 0x630   : > { %v1564_v36 = vperm.slane %v1492_v10, %v5228_v21  ;;  %v6229_v10 = vld [vmem:[%s5029_s14 + $0x288] sm:$0xff] }
 0x632   : > { %v1426_v33 = vpop.xlane.xlu1 %1425 }
 0x633   : > { %v1542_v28 = vperm.slane %v1426_v33, %v5228_v21  ;;  %v1561_v33 = vperm.slane %v1483_v57, %v5228_v21 }
 0x635   : > { %v1573_v37 = vsel %vm408_vm6, %v1542_v28, %v1572_v38  ;;  %v1562_v28 = vperm.slane %v1486_v31, %v5228_v21 }
 0x636   : > { %v1574_v53 = vsel %vm410_vm7, %v1543_v61, %v1573_v37  ;;  %v1495_v61 = vpop.xlane.xlu0 %1494 }
 0x637   : > { %v1575_v63 = vsel %vm412_vm8, %v1544_v30, %v1574_v53  ;;  %v1590_v38 = vsel %vm400_vm2, %v1562_v28, %v1561_v33  ;;  %v1501_v53 = vpop.xlane.xlu2 %1500  ;;  %v6236_v33 = vld [vmem:[%s5029_s14 + $0xd8] sm:$0xff] }
 0x638   : > { %v1601_v51 = vsel %vm237_vm0, %v1575_v63, -inf  ;;  %v1565_v63 = vperm.slane %v1495_v61, %v5228_v21  ;;  %v1708_v61 = vsel %vm237_vm0, %v6229_v10, -inf  ;;  %v1675_v28 = vsel %vm237_vm0, %v6236_v33, -inf }
 0x639   : > { %1602 = vmax.xlane.f32.xlu1 %v1601_v51 }
 0x63a   : > { %v1435_v15 = vpop.xlane.xlu1 %1434 }
 0x63b   : > { %v1545_v46 = vperm.slane %v1435_v15, %v5228_v21 }
 0x63d   : > { %v1576_v27 = vsel %vm400_vm2, %v1546_v17, %v1545_v46  ;;  %v1567_v17 = vperm.slane %v1501_v53, %v5228_v21 }
 0x63e   : > { %v1577_v40 = vsel %vm402_vm3, %v1547_v6, %v1576_v27  ;;  %v1504_v51 = vpop.xlane.xlu0 %1503 }
 0x63f   : > { %v1568_v5 = vperm.slane %v1504_v51, %v5228_v21  ;;  %v6259_v51 = vld [vmem:[%s5029_s14 + $0x2e8] sm:$0xff] }
 0x642   : > { %v1444_v26 = vpop.xlane.xlu1 %1443 }
 0x643   : > { %v1548_v42 = vperm.slane %v1444_v26, %v5228_v21 }
 0x645   : > { %v1578_v41 = vsel %vm404_vm4, %v1548_v42, %v1577_v40 }
 0x646   : > { %v1579_v62 = vsel %vm406_vm5, %v1549_v48, %v1578_v41  ;;  %v6163_v48 = vld [vmem:[%s5029_s14 + $0x88] sm:$0xff] }
 0x647   : > { %v1580_v25 = vsel %vm408_vm6, %v1550_v23, %v1579_v62  ;;  %v1660_v41 = vsel %vm237_vm0, %v6163_v48, -inf  ;;  %v1663_v23 = vsel %vm237_vm0, %v6168_v47, -inf  ;;  %v1669_v62 = vsel %vm237_vm0, %v6173_v19, -inf }
 0x64a   : > { %v1453_v55 = vpop.xlane.xlu1 %1452 }
 0x64b   : > { %v1551_v7 = vperm.slane %v1453_v55, %v5228_v21  ;;  %v6178_v55 = vld [vmem:[%s5029_s14 + $0xc8] sm:$0xff] }
 0x64d   : > { %v1581_v2 = vsel %vm410_vm7, %v1551_v7, %v1580_v25  ;;  %v6183_v7 = vld [vmem:[%s5029_s14 + $0xe8] sm:$0xff] }
 0x64e   : > { %v1582_v13 = vsel %vm412_vm8, %v1552_v9, %v1581_v2  ;;  %v1672_v9 = vsel %vm237_vm0, %v6178_v55, -inf  ;;  %v1678_v25 = vsel %vm237_vm0, %v6183_v7, -inf  ;;  %v6188_v2 = vld [vmem:[%s5029_s14 + $0xf8] sm:$0xff] }
 0x64f   : > { %v1604_v44 = vsel %vm237_vm0, %v1582_v13, -inf  ;;  %v1681_v13 = vsel %vm237_vm0, %v6188_v2, -inf }
 0x650   : > { %1605 = vmax.xlane.f32.xlu2 %v1604_v44  ;;  %v6193_v44 = vld [vmem:[%s5029_s14 + $0x198] sm:$0xff] }
 0x652   : > { %v1462_v18 = vpop.xlane.xlu1 %1461 }
 0x653   : > { %v1554_v22 = vperm.slane %v1462_v18, %v5228_v21  ;;  %v1687_v18 = vsel %vm237_vm0, %v6193_v44, -inf }
 0x655   : > { %v1583_v56 = vsel %vm400_vm2, %v1554_v22, %v1553_v24  ;;  %v6198_v24 = vld [vmem:[%s5029_s14 + $0x1a8] sm:$0xff] }
 0x656   : > { %v1584_v3 = vsel %vm402_vm3, %v1555_v45, %v1583_v56  ;;  %v1690_v56 = vsel %vm237_vm0, %v6198_v24, -inf }
 0x657   : > { %v1585_v11 = vsel %vm404_vm4, %v1556_v39, %v1584_v3 }
 0x65a   : > { %v1471_v4 = vpop.xlane.xlu1 %1470 }
 0x65b   : > { %v1557_v0 = vperm.slane %v1471_v4, %v5228_v21 }
 0x65d   : > { %v1586_v49 = vsel %vm406_vm5, %v1557_v0, %v1585_v11 }
 0x65e   : > { %v1587_v29 = vsel %vm408_vm6, %v1558_v8, %v1586_v49  ;;  %v6211_v49 = vld [vmem:[%s5029_s14 + $0x1c8] sm:$0xff] }
 0x65f   : > { %v1588_v20 = vsel %vm410_vm7, %v1559_v54, %v1587_v29  ;;  %v6214_v54 = vld [vmem:[%s5029_s14 + $0x1d8] sm:$0xff]  ;;  %v1696_v29 = vsel %vm237_vm0, %v6211_v49, -inf }
 0x662   : > { %v1480_v52 = vpop.xlane.xlu1 %1479 }
 0x663   : > { %v1560_v34 = vperm.slane %v1480_v52, %v5228_v21  ;;  %v1699_v52 = vsel %vm237_vm0, %v6214_v54, -inf }
 0x665   : > { %v1589_v43 = vsel %vm412_vm8, %v1560_v34, %v1588_v20  ;;  %v6221_v34 = vld [vmem:[%s5029_s14 + $0xa8] sm:$0xff] }
 0x666   : > { %v1607_v50 = vsel %vm237_vm0, %v1589_v43, -inf  ;;  %v1666_v20 = vsel %vm237_vm0, %v6221_v34, -inf  ;;  %v6226_v43 = vld [vmem:[%s5029_s14 + $0x1f8] sm:$0xff] }
 0x667   : > { %1608 = vmax.xlane.f32.xlu0 %v1607_v50  ;;  %v1705_v50 = vsel %vm237_vm0, %v6226_v43, -inf }
 0x66a   : > { %v1489_v30 = vpop.xlane.xlu1 %1488 }
 0x66b   : > { %v1563_v35 = vperm.slane %v1489_v30, %v5228_v21  ;;  %v6241_v30 = vld [vmem:[%s5029_s14 + $0x2a8] sm:$0xff] }
 0x66d   : > { %v1591_v37 = vsel %vm402_vm3, %v1563_v35, %v1590_v38  ;;  %v6244_v35 = vld [vmem:[%s5029_s14 + $0x2b8] sm:$0xff]  ;;  %v1714_v38 = vsel %vm237_vm0, %v6241_v30, -inf }
 0x66e   : > { %v1592_v15 = vsel %vm404_vm4, %v1564_v36, %v1591_v37  ;;  %v1717_v36 = vsel %vm237_vm0, %v6244_v35, -inf  ;;  %v6251_v37 = vld [vmem:[%s5029_s14 + $0x188] sm:$0xff] }
 0x66f   : > { %v1593_v6 = vsel %vm406_vm5, %v1565_v63, %v1592_v15  ;;  %1661 = vmax.xlane.f32.xlu0 %v1660_v41  ;;  %v1684_v53 = vsel %vm237_vm0, %v6251_v37, -inf  ;;  %v6256_v63 = vld [vmem:[%s5029_s14 + $0x2d8] sm:$0xff] }
 0x670   : > { %v1723_v15 = vsel %vm237_vm0, %v6256_v63, -inf  ;;  %v6286_v41 = vld [vmem:[%s5029_s14 + $0x3b8] sm:$0xff] }
 0x672   : > { %v1498_v59 = vpop.xlane.xlu1 %1497 }
 0x673   : > { %v1566_v46 = vperm.slane %v1498_v59, %v5228_v21  ;;  %v1726_v59 = vsel %vm237_vm0, %v6259_v51, -inf }
 0x675   : > { %v1594_v27 = vsel %vm408_vm6, %v1566_v46, %v1593_v6  ;;  %v6274_v6 = vld [vmem:[%s5029_s14 + $0x398] sm:$0xff] }
 0x676   : > { %v1595_v26 = vsel %vm410_vm7, %v1567_v17, %v1594_v27  ;;  %v6266_v17 = vld [vmem:[%s5029_s14 + $0x1b8] sm:$0xff] }
 0x677   : > { %v1596_v42 = vsel %vm412_vm8, %v1568_v5, %v1595_v26  ;;  %1670 = vmax.xlane.f32.xlu0 %v1669_v62  ;;  %v1693_v46 = vsel %vm237_vm0, %v6266_v17, -inf  ;;  %v6271_v5 = vld [vmem:[%s5029_s14 + $0x388] sm:$0xff]  ;;  %v1735_v26 = vsel %vm237_vm0, %v6274_v6, -inf }
 0x678   : > { %v1610_v40 = vsel %vm237_vm0, %v1596_v42, -inf  ;;  %v1732_v27 = vsel %vm237_vm0, %v6271_v5, -inf  ;;  %v6281_v42 = vld [vmem:[%s5029_s14 + $0x1e8] sm:$0xff] }
 0x679   : > { %1611 = vmax.xlane.f32.xlu1 %v1610_v40  ;;  %v1702_v40 = vsel %vm237_vm0, %v6281_v42, -inf  ;;  %v6291_v62 = vld [vmem:[%s5029_s14 + $0x3c8] sm:$0xff] }
 0x67f   : > { %1679 = vmax.xlane.f32.xlu0 %v1678_v25  ;;  %v6296_v25 = vld [vmem:[%s5029_s14 + $0x298] sm:$0xff] }
 0x681   : > { %1664 = vmax.xlane.f32.xlu1 %v1663_v23  ;;  %v1741_v23 = vsel %vm237_vm0, %v6286_v41, -inf }
 0x687   : > { %1688 = vmax.xlane.f32.xlu0 %v1687_v18 }
 0x689   : > { %1673 = vmax.xlane.f32.xlu1 %v1672_v9  ;;  %v1744_v9 = vsel %vm237_vm0, %v6291_v62, -inf }
 0x68f   : > { %1697 = vmax.xlane.f32.xlu0 %v1696_v29 }
 0x691   : > { %1682 = vmax.xlane.f32.xlu1 %v1681_v13  ;;  %v1711_v13 = vsel %vm237_vm0, %v6296_v25, -inf }
 0x697   : > { %1706 = vmax.xlane.f32.xlu0 %v1705_v50 }
 0x699   : > { %1691 = vmax.xlane.f32.xlu1 %v1690_v56 }
 0x69f   : > { %1715 = vmax.xlane.f32.xlu0 %v1714_v38 }
 0x6a1   : > { %1700 = vmax.xlane.f32.xlu1 %v1699_v52 }
 0x6a7   : > { %1724 = vmax.xlane.f32.xlu0 %v1723_v15 }
 0x6a9   : > { %1709 = vmax.xlane.f32.xlu1 %v1708_v61 }
 0x6ac   : > { %v1603_v16 = vpop.xlane.xlu1 %1602 }
 0x6ad   : > { %v1617_v3 = vperm.slane %v1603_v16, %v5228_v21  ;;  %v6301_v16 = vld [vmem:[%s5029_s14 + $0x3e8] sm:$0xff] }
 0x6ae   : > { %v1750_v18 = vsel %vm237_vm0, %v6301_v16, -inf }
 0x6af   : > { %1733 = vmax.xlane.f32.xlu0 %v1732_v27 }
 0x6b1   : > { %1718 = vmax.xlane.f32.xlu1 %v1717_v36 }
 0x6b7   : > { %1742 = vmax.xlane.f32.xlu0 %v1741_v23 }
 0x6b9   : > { %1727 = vmax.xlane.f32.xlu1 %v1726_v59 }
 0x6bf   : > { %1751 = vmax.xlane.f32.xlu0 %v1750_v18 }
 0x6c1   : > { %1736 = vmax.xlane.f32.xlu1 %v1735_v26 }
 0x6c3   : > { %v1606_v1 = vpop.xlane.xlu2 %1605 }
 0x6c4   : > { %v1618_v45 = vperm.slane %v1606_v1, %v5228_v21  ;;  %v6306_v1 = vld [vmem:[%s5029_s14 + $0x3f8] sm:$0xff] }
 0x6c6   : > { %v1621_v0 = vsel %vm400_vm2, %v1618_v45, %v1617_v3  ;;  %v6311_v45 = vld [vmem:[%s5029_s14 + $0x2c8] sm:$0xff] }
 0x6c7   : > { %v1720_v56 = vsel %vm237_vm0, %v6311_v45, -inf }
 0x6c9   : > { %1745 = vmax.xlane.f32.xlu1 %v1744_v9 }
 0x6da   : > { %v1609_v22 = vpop.xlane.xlu0 %1608 }
 0x6db   : > { %v1619_v39 = vperm.slane %v1609_v22, %v5228_v21  ;;  %v1753_v22 = vsel %vm237_vm0, %v6306_v1, -inf }
 0x6dc   : > { %1754 = vmax.xlane.f32.xlu1 %v1753_v22 }
 0x6dd   : > { %v1622_v31 = vsel %vm402_vm3, %v1619_v39, %v1621_v0  ;;  %v6316_v39 = vld [vmem:[%s5029_s14 + $0x2f8] sm:$0xff] }
 0x6de   : > { %v1729_v3 = vsel %vm237_vm0, %v6316_v39, -inf }
 0x6ec   : > { %v1612_v4 = vpop.xlane.xlu1 %1611 }
 0x6ed   : > { %v1620_v57 = vperm.slane %v1612_v4, %v5228_v21  ;;  %v6321_v4 = vld [vmem:[%s5029_s14 + $0x3a8] sm:$0xff] }
 0x6ee   : > { %v1738_v0 = vsel %vm237_vm0, %v6321_v4, -inf }
 0x6ef   : > { %v1623_v11 = vsel %vm404_vm4, %v1620_v57, %v1622_v31  ;;  %v6326_v57 = vld [vmem:[%s5029_s14 + $0x3d8] sm:$0xff] }
 0x6f0   : > { %v1625_v8 = vsel %vm463_vm9, %v1623_v11, -inf  ;;  %v1747_v31 = vsel %vm237_vm0, %v6326_v57, -inf  ;;  %v1662_v11 = vpop.xlane.xlu0 %1661 }
 0x6f1   : > { %1626 = vmax.xlane.f32.xlu2 %v1625_v8 }
 0x6f4   : > { %v1665_v8 = vpop.xlane.xlu1 %1664 }
 0x6f5   : > { %v1789_v38 = vperm.slane %v1665_v8, %v5228_v21 }
 0x6f8   : > { %v1671_v29 = vpop.xlane.xlu0 %1670 }
 0x6f9   : > { %1667 = vmax.xlane.f32.xlu2 %v1666_v20  ;;  %v1791_v27 = vperm.slane %v1671_v29, %v5228_v21 }
 0x6fc   : > { %v1674_v52 = vpop.xlane.xlu1 %1673 }
 0x700   : > { %v1680_v20 = vpop.xlane.xlu0 %1679 }
 0x701   : > { %1676 = vmax.xlane.f32.xlu2 %v1675_v28  ;;  %v1788_v28 = vperm.slane %v1662_v11, %v5228_v21 }
 0x704   : > { %v1683_v50 = vpop.xlane.xlu1 %1682 }
 0x705   : > { %v1795_v22 = vperm.slane %v1683_v50, %v5228_v21 }
 0x708   : > { %v1689_v36 = vpop.xlane.xlu0 %1688 }
 0x709   : > { %1685 = vmax.xlane.f32.xlu2 %v1684_v53 }
 0x70c   : > { %v1692_v15 = vpop.xlane.xlu1 %1691 }
 0x711   : > { %1694 = vmax.xlane.f32.xlu2 %v1693_v46  ;;  %v1820_v46 = vsel %vm400_vm2, %v1789_v38, %v1788_v28  ;;  %v1797_v38 = vperm.slane %v1689_v36, %v5228_v21 }
 0x719   : > { %1703 = vmax.xlane.f32.xlu2 %v1702_v40  ;;  %v1792_v40 = vperm.slane %v1674_v52, %v5228_v21 }
 0x721   : > { %1712 = vmax.xlane.f32.xlu2 %v1711_v13  ;;  %v1794_v13 = vperm.slane %v1680_v20, %v5228_v21 }
 0x729   : > { %1721 = vmax.xlane.f32.xlu2 %v1720_v56  ;;  %v1698_v56 = vpop.xlane.xlu0 %1697 }
 0x731   : > { %1730 = vmax.xlane.f32.xlu2 %v1729_v3  ;;  %v1707_v28 = vpop.xlane.xlu0 %1706 }
 0x739   : > { %1739 = vmax.xlane.f32.xlu2 %v1738_v0  ;;  %v1701_v0 = vpop.xlane.xlu1 %1700 }
 0x741   : > { %1748 = vmax.xlane.f32.xlu2 %v1747_v31  ;;  %v1710_v50 = vpop.xlane.xlu1 %1709 }
 0x764   : > { %v6330_v61 = vpop.xlane.xlu2 %1626 }
 0x765   : > { %8216 = vst [vmem:[#allocation12_spill] sm:$0xff] %v6330_v61 }
 0x76c   : > { %v1668_v53 = vpop.xlane.xlu2 %1667 }
 0x76d   : > { %v1790_v59 = vperm.slane %v1668_v53, %v5228_v21  ;;  %v1798_v53 = vperm.slane %v1692_v15, %v5228_v21  ;;  %v1803_v15 = vperm.slane %v1707_v28, %v5228_v21 }
 0x76f   : > { %v1821_v26 = vsel %vm402_vm3, %v1790_v59, %v1820_v46 }
 0x770   : > { %v1822_v23 = vsel %vm404_vm4, %v1791_v27, %v1821_v26 }
 0x771   : > { %v1823_v3 = vsel %vm406_vm5, %v1792_v40, %v1822_v23  ;;  %v1800_v40 = vperm.slane %v1698_v56, %v5228_v21 }
 0x774   : > { %v1677_v9 = vpop.xlane.xlu2 %1676 }
 0x775   : > { %v1793_v18 = vperm.slane %v1677_v9, %v5228_v21  ;;  %v1716_v9 = vpop.xlane.xlu0 %1715 }
 0x776   : > { %v1806_v28 = vperm.slane %v1716_v9, %v5228_v21 }
 0x777   : > { %v1824_v31 = vsel %vm408_vm6, %v1793_v18, %v1823_v3  ;;  %v1719_v18 = vpop.xlane.xlu1 %1718 }
 0x778   : > { %v1825_v11 = vsel %vm410_vm7, %v1794_v13, %v1824_v31  ;;  %v1801_v13 = vperm.slane %v1701_v0, %v5228_v21 }
 0x779   : > { %v1826_v8 = vsel %vm412_vm8, %v1795_v22, %v1825_v11 }
 0x77a   : > { %v1852_v29 = vsel %vm237_vm0, %v1826_v8, -inf }
 0x77b   : > { %1853 = vmax.xlane.f32.xlu2 %v1852_v29 }
 0x77c   : > { %v1686_v52 = vpop.xlane.xlu2 %1685 }
 0x77d   : > { %v1796_v20 = vperm.slane %v1686_v52, %v5228_v21  ;;  %v1725_v29 = vpop.xlane.xlu0 %1724 }
 0x77f   : > { %v1827_v59 = vsel %vm400_vm2, %v1797_v38, %v1796_v20  ;;  %v1728_v0 = vpop.xlane.xlu1 %1727  ;;  %v1804_v38 = vperm.slane %v1710_v50, %v5228_v21 }
 0x780   : > { %v1828_v26 = vsel %vm402_vm3, %v1798_v53, %v1827_v59  ;;  %v1807_v59 = vperm.slane %v1719_v18, %v5228_v21  ;;  %v1810_v50 = vperm.slane %v1728_v0, %v5228_v21 }
 0x784   : > { %v1695_v46 = vpop.xlane.xlu2 %1694 }
 0x785   : > { %v1799_v27 = vperm.slane %v1695_v46, %v5228_v21 }
 0x787   : > { %v1829_v23 = vsel %vm404_vm4, %v1799_v27, %v1828_v26 }
 0x788   : > { %v1830_v36 = vsel %vm406_vm5, %v1800_v40, %v1829_v23  ;;  %v1734_v40 = vpop.xlane.xlu0 %1733  ;;  %v1737_v23 = vpop.xlane.xlu1 %1736 }
 0x789   : > { %v1831_v31 = vsel %vm408_vm6, %v1801_v13, %v1830_v36  ;;  %v1809_v36 = vperm.slane %v1725_v29, %v5228_v21  ;;  %v1813_v29 = vperm.slane %v1737_v23, %v5228_v21 }
 0x78c   : > { %v1704_v22 = vpop.xlane.xlu2 %1703 }
 0x78d   : > { %v1802_v3 = vperm.slane %v1704_v22, %v5228_v21 }
 0x78f   : > { %v1832_v11 = vsel %vm410_vm7, %v1802_v3, %v1831_v31 }
 0x790   : > { %v1833_v8 = vsel %vm412_vm8, %v1803_v15, %v1832_v11  ;;  %v1743_v11 = vpop.xlane.xlu0 %1742 }
 0x791   : > { %v1855_v56 = vsel %vm237_vm0, %v1833_v8, -inf }
 0x792   : > { %1856 = vmax.xlane.f32.xlu0 %v1855_v56  ;;  %v1746_v56 = vpop.xlane.xlu1 %1745 }
 0x794   : > { %v1713_v52 = vpop.xlane.xlu2 %1712 }
 0x795   : > { %v1805_v20 = vperm.slane %v1713_v52, %v5228_v21  ;;  %v1812_v52 = vperm.slane %v1734_v40, %v5228_v21 }
 0x797   : > { %v1834_v53 = vsel %vm400_vm2, %v1805_v20, %v1804_v38  ;;  %v1841_v38 = vsel %vm400_vm2, %v1813_v29, %v1812_v52 }
 0x798   : > { %v1835_v46 = vsel %vm402_vm3, %v1806_v28, %v1834_v53  ;;  %v1815_v28 = vperm.slane %v1743_v11, %v5228_v21  ;;  %v1888_v11 = vsel %vm467_vm1, %v6173_v19, -inf }
 0x799   : > { %v1836_v13 = vsel %vm404_vm4, %v1807_v59, %v1835_v46  ;;  %v1752_v59 = vpop.xlane.xlu0 %1751  ;;  %v1816_v46 = vperm.slane %v1746_v56, %v5228_v21  ;;  %v1897_v56 = vsel %vm467_vm1, %v6183_v7, -inf }
 0x79a   : > { %v1818_v23 = vperm.slane %v1752_v59, %v5228_v21 }
 0x79c   : > { %v1722_v27 = vpop.xlane.xlu2 %1721 }
 0x79d   : > { %v1808_v26 = vperm.slane %v1722_v27, %v5228_v21  ;;  %v1755_v27 = vpop.xlane.xlu1 %1754 }
 0x79f   : > { %v1837_v22 = vsel %vm406_vm5, %v1808_v26, %v1836_v13 }
 0x7a0   : > { %v1838_v9 = vsel %vm408_vm6, %v1809_v36, %v1837_v22  ;;  %v1819_v36 = vperm.slane %v1755_v27, %v5228_v21  ;;  %v1885_v27 = vsel %vm467_vm1, %v6221_v34, -inf  ;;  %v1903_v34 = vsel %vm467_vm1, %v6251_v37, -inf }
 0x7a1   : > { %v1839_v3 = vsel %vm410_vm7, %v1810_v50, %v1838_v9  ;;  %v1921_v37 = vsel %vm467_vm1, %v6281_v42, -inf  ;;  %v1939_v42 = vsel %vm467_vm1, %v6311_v45, -inf }
 0x7a4   : > { %v1731_v15 = vpop.xlane.xlu2 %1730 }
 0x7a5   : > { %v1811_v18 = vperm.slane %v1731_v15, %v5228_v21 }
 0x7a7   : > { %v1840_v31 = vsel %vm412_vm8, %v1811_v18, %v1839_v3  ;;  %v1879_v3 = vsel %vm467_vm1, %v6163_v48, -inf  ;;  %v1900_v48 = vsel %vm467_vm1, %v6188_v2, -inf }
 0x7a8   : > { %v1858_v8 = vsel %vm237_vm0, %v1840_v31, -inf  ;;  %v1882_v31 = vsel %vm467_vm1, %v6168_v47, -inf  ;;  %v1906_v47 = vsel %vm467_vm1, %v6193_v44, -inf }
 0x7a9   : > { %1859 = vmax.xlane.f32.xlu1 %v1858_v8  ;;  %v1891_v8 = vsel %vm467_vm1, %v6178_v55, -inf  ;;  %v1909_v55 = vsel %vm467_vm1, %v6198_v24, -inf  ;;  %v1915_v24 = vsel %vm467_vm1, %v6211_v49, -inf  ;;  %v1894_v49 = vsel %vm467_vm1, %v6236_v33, -inf }
 0x7aa   : > { %v1912_v33 = vsel %vm467_vm1, %v6266_v17, -inf  ;;  %v1930_v17 = vsel %vm467_vm1, %v6296_v25, -inf  ;;  %v1966_v25 = vsel %vm467_vm1, %v6326_v57, -inf }
 0x7ac   : > { %v1740_v20 = vpop.xlane.xlu2 %1739 }
 0x7ad   : > { %v1814_v0 = vperm.slane %v1740_v20, %v5228_v21 }
 0x7af   : > { %v1842_v53 = vsel %vm402_vm3, %v1814_v0, %v1841_v38 }
 0x7b0   : > { %v1843_v26 = vsel %vm404_vm4, %v1815_v28, %v1842_v53 }
 0x7b1   : > { %v1844_v22 = vsel %vm406_vm5, %v1816_v46, %v1843_v26  ;;  %1880 = vmax.xlane.f32.xlu1 %v1879_v3  ;;  %v1918_v46 = vsel %vm467_vm1, %v6214_v54, -inf  ;;  %v1924_v26 = vsel %vm467_vm1, %v6226_v43, -inf  ;;  %v1933_v54 = vsel %vm467_vm1, %v6241_v30, -inf }
 0x7b2   : > { %v1942_v43 = vsel %vm467_vm1, %v6256_v63, -inf  ;;  %v1951_v30 = vsel %vm467_vm1, %v6271_v5, -inf  ;;  %v1960_v63 = vsel %vm467_vm1, %v6286_v41, -inf  ;;  %v1969_v5 = vsel %vm467_vm1, %v6301_v16, -inf }
 0x7b3   : > { %v1948_v41 = vsel %vm467_vm1, %v6316_v39, -inf }
 0x7b4   : > { %v1749_v13 = vpop.xlane.xlu2 %1748 }
 0x7b5   : > { %v1817_v40 = vperm.slane %v1749_v13, %v5228_v21  ;;  %v1927_v13 = vsel %vm467_vm1, %v6229_v10, -inf  ;;  %v1945_v10 = vsel %vm467_vm1, %v6259_v51, -inf  ;;  %v1963_v51 = vsel %vm467_vm1, %v6291_v62, -inf }
 0x7b6   : > { %v1957_v62 = vsel %vm467_vm1, %v6321_v4, -inf }
 0x7b7   : > { %v1845_v50 = vsel %vm408_vm6, %v1817_v40, %v1844_v22 }
 0x7b8   : > { %v1846_v9 = vsel %vm410_vm7, %v1818_v23, %v1845_v50  ;;  %v1936_v23 = vsel %vm467_vm1, %v6244_v35, -inf  ;;  %v1954_v35 = vsel %vm467_vm1, %v6274_v6, -inf  ;;  %v1972_v6 = vsel %vm467_vm1, %v6306_v1, -inf }
 0x7b9   : > { %v1847_v15 = vsel %vm412_vm8, %v1819_v36, %v1846_v9  ;;  %1889 = vmax.xlane.f32.xlu1 %v1888_v11 }
 0x7ba   : > { %v1861_v18 = vsel %vm237_vm0, %v1847_v15, -inf }
 0x7bb   : > { %1862 = vmax.xlane.f32.xlu2 %v1861_v18 }
 0x7c1   : > { %1898 = vmax.xlane.f32.xlu1 %v1897_v56 }
 0x7c3   : > { %1883 = vmax.xlane.f32.xlu2 %v1882_v31 }
 0x7c9   : > { %1907 = vmax.xlane.f32.xlu1 %v1906_v47 }
 0x7cb   : > { %1892 = vmax.xlane.f32.xlu2 %v1891_v8 }
 0x7d1   : > { %1916 = vmax.xlane.f32.xlu1 %v1915_v24 }
 0x7d3   : > { %1901 = vmax.xlane.f32.xlu2 %v1900_v48 }
 0x7d9   : > { %1925 = vmax.xlane.f32.xlu1 %v1924_v26 }
 0x7db   : > { %1910 = vmax.xlane.f32.xlu2 %v1909_v55 }
 0x7e1   : > { %1934 = vmax.xlane.f32.xlu1 %v1933_v54 }
 0x7e3   : > { %1919 = vmax.xlane.f32.xlu2 %v1918_v46 }
 0x7e9   : > { %1943 = vmax.xlane.f32.xlu1 %v1942_v43 }
 0x7eb   : > { %1928 = vmax.xlane.f32.xlu2 %v1927_v13 }
 0x7ee   : > { %v1854_v29 = vpop.xlane.xlu2 %1853 }
 0x7ef   : > { %v1868_v7 = vperm.slane %v1854_v29, %v5228_v21 }
 0x7f1   : > { %1952 = vmax.xlane.f32.xlu1 %v1951_v30 }
 0x7f3   : > { %1937 = vmax.xlane.f32.xlu2 %v1936_v23 }
 0x7f9   : > { %1961 = vmax.xlane.f32.xlu1 %v1960_v63 }
 0x7fb   : > { %1946 = vmax.xlane.f32.xlu2 %v1945_v10 }
 0x801   : > { %1970 = vmax.xlane.f32.xlu1 %v1969_v5 }
 0x803   : > { %1955 = vmax.xlane.f32.xlu2 %v1954_v35 }
 0x805   : > { %v1857_v52 = vpop.xlane.xlu0 %1856 }
 0x806   : > { %v1869_v20 = vperm.slane %v1857_v52, %v5228_v21 }
 0x808   : > { %v1872_v2 = vsel %vm400_vm2, %v1869_v20, %v1868_v7 }
 0x80b   : > { %1964 = vmax.xlane.f32.xlu2 %v1963_v51 }
 0x813   : > { %1973 = vmax.xlane.f32.xlu2 %v1972_v6 }
 0x81c   : > { %v1860_v19 = vpop.xlane.xlu1 %1859 }
 0x81d   : > { %v1870_v0 = vperm.slane %v1860_v19, %v5228_v21 }
 0x81f   : > { %v1873_v44 = vsel %vm402_vm3, %v1870_v0, %v1872_v2 }
 0x824   : > { %v1881_v16 = vpop.xlane.xlu1 %1880 }
 0x825   : > { %v2007_v9 = vperm.slane %v1881_v16, %v5228_v21 }
 0x82c   : > { %v1890_v40 = vpop.xlane.xlu1 %1889 }
 0x82d   : > { %v2010_v31 = vperm.slane %v1890_v40, %v5228_v21 }
 0x82e   : > { %v1863_v38 = vpop.xlane.xlu2 %1862 }
 0x82f   : > { %v1871_v28 = vperm.slane %v1863_v38, %v5228_v21 }
 0x831   : > { %v1874_v53 = vsel %vm404_vm4, %v1871_v28, %v1873_v44 }
 0x832   : > { %v1876_v59 = vsel %vm463_vm9, %v1874_v53, -inf }
 0x833   : > { %1877 = vmax.xlane.f32.xlu0 %v1876_v59 }
 0x834   : > { %v1899_v22 = vpop.xlane.xlu1 %1898 }
 0x835   : > { %v2013_v48 = vperm.slane %v1899_v22, %v5228_v21 }
 0x836   : > { %v1884_v1 = vpop.xlane.xlu2 %1883 }
 0x837   : > { %v2008_v39 = vperm.slane %v1884_v1, %v5228_v21 }
 0x839   : > { %v2039_v57 = vsel %vm400_vm2, %v2008_v39, %v2007_v9 }
 0x83b   : > { %1886 = vmax.xlane.f32.xlu0 %v1885_v27 }
 0x83c   : > { %v1908_v15 = vpop.xlane.xlu1 %1907 }
 0x83d   : > { %v2016_v53 = vperm.slane %v1908_v15, %v5228_v21 }
 0x83e   : > { %v1893_v36 = vpop.xlane.xlu2 %1892 }
 0x83f   : > { %v2011_v8 = vperm.slane %v1893_v36, %v5228_v21 }
 0x843   : > { %1895 = vmax.xlane.f32.xlu0 %v1894_v49 }
 0x844   : > { %v1917_v19 = vpop.xlane.xlu1 %1916 }
 0x845   : > { %v2019_v54 = vperm.slane %v1917_v19, %v5228_v21 }
 0x846   : > { %v1902_v50 = vpop.xlane.xlu2 %1901 }
 0x847   : > { %v2014_v52 = vperm.slane %v1902_v50, %v5228_v21 }
 0x84b   : > { %1904 = vmax.xlane.f32.xlu0 %v1903_v34 }
 0x84c   : > { %v1926_v44 = vpop.xlane.xlu1 %1925 }
 0x84d   : > { %v2022_v35 = vperm.slane %v1926_v44, %v5228_v21 }
 0x84e   : > { %v1911_v4 = vpop.xlane.xlu2 %1910 }
 0x84f   : > { %v2017_v46 = vperm.slane %v1911_v4, %v5228_v21 }
 0x853   : > { %1913 = vmax.xlane.f32.xlu0 %v1912_v33 }
 0x854   : > { %v1935_v34 = vpop.xlane.xlu1 %1934 }
 0x855   : > { %v2025_v16 = vperm.slane %v1935_v34, %v5228_v21  ;;  %v6535_v34 = vld [vmem:[%s5036_s26] sm:$0xff] }
 0x856   : > { %v1920_v55 = vpop.xlane.xlu2 %1919 }
 0x857   : > { %v2020_v43 = vperm.slane %v1920_v55, %v5228_v21 }
 0x85b   : > { %1922 = vmax.xlane.f32.xlu0 %v1921_v37 }
 0x85c   : > { %v1944_v6 = vpop.xlane.xlu1 %1943 }
 0x85e   : > { %v1929_v24 = vpop.xlane.xlu2 %1928 }
 0x863   : > { %1931 = vmax.xlane.f32.xlu0 %v1930_v17 }
 0x864   : > { %v1953_v9 = vpop.xlane.xlu1 %1952 }
 0x866   : > { %v1938_v10 = vpop.xlane.xlu2 %1937 }
 0x867   : > { %v2026_v40 = vperm.slane %v1938_v10, %v5228_v21  ;;  %v6540_v10 = vld [vmem:[%s5036_s26 + $0x10] sm:$0xff] }
 0x86b   : > { %1940 = vmax.xlane.f32.xlu0 %v1939_v42 }
 0x873   : > { %1949 = vmax.xlane.f32.xlu0 %v1948_v41  ;;  %v1947_v41 = vpop.xlane.xlu2 %1946 }
 0x87b   : > { %1958 = vmax.xlane.f32.xlu0 %v1957_v62  ;;  %v1956_v39 = vpop.xlane.xlu2 %1955 }
 0x87c   : > { %v2032_v19 = vperm.slane %v1956_v39, %v5228_v21 }
 0x883   : > { %1967 = vmax.xlane.f32.xlu0 %v1966_v25  ;;  %v2023_v25 = vperm.slane %v1929_v24, %v5228_v21 }
 0x8a6   : > { %v6468_v45 = vpop.xlane.xlu0 %1877 }
 0x8a7   : > { %8217 = vst [vmem:[#allocation13_spill] sm:$0xff] %v6468_v45 }
 0x8ae   : > { %v1887_v18 = vpop.xlane.xlu0 %1886 }
 0x8af   : > { %v2009_v3 = vperm.slane %v1887_v18, %v5228_v21  ;;  %v2028_v18 = vperm.slane %v1944_v6, %v5228_v21 }
 0x8b1   : > { %v2040_v11 = vsel %vm402_vm3, %v2009_v3, %v2039_v57  ;;  %v2029_v3 = vperm.slane %v1947_v41, %v5228_v21 }
 0x8b2   : > { %v2041_v56 = vsel %vm404_vm4, %v2010_v31, %v2040_v11 }
 0x8b3   : > { %v2042_v20 = vsel %vm406_vm5, %v2011_v8, %v2041_v56 }
 0x8b6   : > { %v1896_v47 = vpop.xlane.xlu0 %1895 }
 0x8b7   : > { %v2012_v29 = vperm.slane %v1896_v47, %v5228_v21 }
 0x8b9   : > { %v2043_v0 = vsel %vm408_vm6, %v2012_v29, %v2042_v20  ;;  %v1965_v29 = vpop.xlane.xlu2 %1964 }
 0x8ba   : > { %v2044_v7 = vsel %vm410_vm7, %v2013_v48, %v2043_v0  ;;  %v1962_v48 = vpop.xlane.xlu1 %1961 }
 0x8bb   : > { %v2045_v38 = vsel %vm412_vm8, %v2014_v52, %v2044_v7  ;;  %v2031_v52 = vperm.slane %v1953_v9, %v5228_v21  ;;  %v2034_v7 = vperm.slane %v1962_v48, %v5228_v21 }
 0x8bc   : > { %v2071_v2 = vsel %vm237_vm0, %v2045_v38, -inf }
 0x8bd   : > { %2072 = vmax.xlane.f32.xlu0 %v2071_v2  ;;  %v2060_v0 = vsel %vm400_vm2, %v2032_v19, %v2031_v52 }
 0x8be   : > { %v1905_v28 = vpop.xlane.xlu0 %1904 }
 0x8bf   : > { %v2015_v59 = vperm.slane %v1905_v28, %v5228_v21  ;;  %v2035_v28 = vperm.slane %v1965_v29, %v5228_v21  ;;  %v6601_v29 = vld [vmem:[%s5036_s26 + $0x200] sm:$0xff] }
 0x8c0   : > { %v2192_v19 = vsel %vm237_vm0, %v6601_v29, -inf }
 0x8c1   : > { %v2046_v27 = vsel %vm400_vm2, %v2016_v53, %v2015_v59  ;;  %v1974_v44 = vpop.xlane.xlu2 %1973 }
 0x8c2   : > { %v2047_v49 = vsel %vm402_vm3, %v2017_v46, %v2046_v27  ;;  %v1971_v2 = vpop.xlane.xlu1 %1970  ;;  %v2038_v27 = vperm.slane %v1974_v44, %v5228_v21 }
 0x8c3   : > { %v2037_v24 = vperm.slane %v1971_v2, %v5228_v21 }
 0x8c6   : > { %v1914_v26 = vpop.xlane.xlu0 %1913 }
 0x8c7   : > { %v2018_v13 = vperm.slane %v1914_v26, %v5228_v21 }
 0x8c9   : > { %v2048_v23 = vsel %vm404_vm4, %v2018_v13, %v2047_v49 }
 0x8ca   : > { %v2049_v33 = vsel %vm406_vm5, %v2019_v54, %v2048_v23 }
 0x8cb   : > { %v2050_v63 = vsel %vm408_vm6, %v2020_v43, %v2049_v33  ;;  %v2144_v43 = vsel %vm237_vm0, %v6535_v34, -inf  ;;  %v2147_v33 = vsel %vm237_vm0, %v6540_v10, -inf }
 0x8ce   : > { %v1923_v30 = vpop.xlane.xlu0 %1922 }
 0x8cf   : > { %v2021_v37 = vperm.slane %v1923_v30, %v5228_v21  ;;  %v6545_v30 = vld [vmem:[%s5036_s26 + $0x30] sm:$0xff] }
 0x8d1   : > { %v2051_v51 = vsel %vm410_vm7, %v2021_v37, %v2050_v63  ;;  %v6550_v37 = vld [vmem:[%s5036_s26 + $0x40] sm:$0xff] }
 0x8d2   : > { %v2052_v17 = vsel %vm412_vm8, %v2022_v35, %v2051_v51  ;;  %v2153_v35 = vsel %vm237_vm0, %v6545_v30, -inf  ;;  %v2156_v63 = vsel %vm237_vm0, %v6550_v37, -inf  ;;  %v6555_v51 = vld [vmem:[%s5036_s26 + $0x60] sm:$0xff] }
 0x8d3   : > { %v2074_v5 = vsel %vm237_vm0, %v2052_v17, -inf  ;;  %v2162_v17 = vsel %vm237_vm0, %v6555_v51, -inf }
 0x8d4   : > { %2075 = vmax.xlane.f32.xlu1 %v2074_v5  ;;  %v6560_v5 = vld [vmem:[%s5036_s26 + $0x70] sm:$0xff] }
 0x8d5   : > { %v2165_v6 = vsel %vm237_vm0, %v6560_v5, -inf }
 0x8d6   : > { %v1932_v42 = vpop.xlane.xlu0 %1931 }
 0x8d7   : > { %v2024_v62 = vperm.slane %v1932_v42, %v5228_v21  ;;  %v6565_v42 = vld [vmem:[%s5036_s26 + $0x110] sm:$0xff] }
 0x8d9   : > { %v2053_v1 = vsel %vm400_vm2, %v2024_v62, %v2023_v25  ;;  %v2171_v62 = vsel %vm237_vm0, %v6565_v42, -inf }
 0x8da   : > { %v2054_v36 = vsel %vm402_vm3, %v2025_v16, %v2053_v1  ;;  %v6570_v1 = vld [vmem:[%s5036_s26 + $0x120] sm:$0xff] }
 0x8db   : > { %v2055_v15 = vsel %vm404_vm4, %v2026_v40, %v2054_v36  ;;  %v2174_v36 = vsel %vm237_vm0, %v6570_v1, -inf }
 0x8de   : > { %v1941_v22 = vpop.xlane.xlu0 %1940 }
 0x8df   : > { %v2027_v50 = vperm.slane %v1941_v22, %v5228_v21 }
 0x8e1   : > { %v2056_v4 = vsel %vm406_vm5, %v2027_v50, %v2055_v15 }
 0x8e2   : > { %v2057_v57 = vsel %vm408_vm6, %v2028_v18, %v2056_v4 }
 0x8e3   : > { %v2058_v8 = vsel %vm410_vm7, %v2029_v3, %v2057_v57  ;;  %v6583_v57 = vld [vmem:[%s5036_s26 + $0x140] sm:$0xff] }
 0x8e6   : > { %v1950_v31 = vpop.xlane.xlu0 %1949 }
 0x8e7   : > { %v2030_v11 = vperm.slane %v1950_v31, %v5228_v21  ;;  %v6586_v31 = vld [vmem:[%s5036_s26 + $0x150] sm:$0xff] }
 0x8e9   : > { %v2059_v56 = vsel %vm412_vm8, %v2030_v11, %v2058_v8  ;;  %v2180_v11 = vsel %vm237_vm0, %v6583_v57, -inf  ;;  %v2183_v8 = vsel %vm237_vm0, %v6586_v31, -inf }
 0x8ea   : > { %v2077_v47 = vsel %vm237_vm0, %v2059_v56, -inf  ;;  %v6593_v56 = vld [vmem:[%s5036_s26 + $0x20] sm:$0xff] }
 0x8eb   : > { %2078 = vmax.xlane.f32.xlu2 %v2077_v47  ;;  %v2150_v48 = vsel %vm237_vm0, %v6593_v56, -inf  ;;  %v6598_v47 = vld [vmem:[%s5036_s26 + $0x170] sm:$0xff] }
 0x8ec   : > { %v2189_v52 = vsel %vm237_vm0, %v6598_v47, -inf }
 0x8ee   : > { %v1959_v20 = vpop.xlane.xlu0 %1958 }
 0x8ef   : > { %v2033_v55 = vperm.slane %v1959_v20, %v5228_v21  ;;  %v6608_v20 = vld [vmem:[%s5036_s26 + $0x50] sm:$0xff] }
 0x8f1   : > { %v2061_v38 = vsel %vm402_vm3, %v2033_v55, %v2060_v0  ;;  %v2159_v55 = vsel %vm237_vm0, %v6608_v20, -inf  ;;  %v6613_v0 = vld [vmem:[%s5036_s26 + $0x220] sm:$0xff] }
 0x8f2   : > { %v2062_v53 = vsel %vm404_vm4, %v2034_v7, %v2061_v38  ;;  %v6616_v7 = vld [vmem:[%s5036_s26 + $0x230] sm:$0xff]  ;;  %v2198_v38 = vsel %vm237_vm0, %v6613_v0, -inf }
 0x8f3   : > { %v2063_v26 = vsel %vm406_vm5, %v2035_v28, %v2062_v53  ;;  %2145 = vmax.xlane.f32.xlu2 %v2144_v43  ;;  %v2201_v2 = vsel %vm237_vm0, %v6616_v7, -inf  ;;  %v6623_v28 = vld [vmem:[%s5036_s26 + $0x100] sm:$0xff]  ;;  %v6628_v53 = vld [vmem:[%s5036_s26 + $0x250] sm:$0xff] }
 0x8f4   : > { %v2168_v44 = vsel %vm237_vm0, %v6623_v28, -inf  ;;  %v6653_v43 = vld [vmem:[%s5036_s26 + $0x160] sm:$0xff] }
 0x8f6   : > { %v1968_v59 = vpop.xlane.xlu0 %1967 }
 0x8f7   : > { %v2036_v46 = vperm.slane %v1968_v59, %v5228_v21  ;;  %v6631_v59 = vld [vmem:[%s5036_s26 + $0x260] sm:$0xff] }
 0x8f9   : > { %v2064_v13 = vsel %vm408_vm6, %v2036_v46, %v2063_v26  ;;  %v2210_v46 = vsel %vm237_vm0, %v6631_v59, -inf }
 0x8fa   : > { %v2065_v49 = vsel %vm410_vm7, %v2037_v24, %v2064_v13  ;;  %v2207_v24 = vsel %vm237_vm0, %v6628_v53, -inf  ;;  %v6643_v13 = vld [vmem:[%s5036_s26 + $0x300] sm:$0xff] }
 0x8fb   : > { %v2066_v54 = vsel %vm412_vm8, %v2038_v27, %v2065_v49  ;;  %2154 = vmax.xlane.f32.xlu2 %v2153_v35  ;;  %v6638_v27 = vld [vmem:[%s5036_s26 + $0x130] sm:$0xff] }
 0x8fc   : > { %v2080_v23 = vsel %vm237_vm0, %v2066_v54, -inf  ;;  %v2177_v26 = vsel %vm237_vm0, %v6638_v27, -inf  ;;  %v6646_v49 = vld [vmem:[%s5036_s26 + $0x310] sm:$0xff]  ;;  %v2216_v54 = vsel %vm237_vm0, %v6643_v13, -inf }
 0x8fd   : > { %2081 = vmax.xlane.f32.xlu0 %v2080_v23  ;;  %v2219_v23 = vsel %vm237_vm0, %v6646_v49, -inf  ;;  %v6658_v35 = vld [vmem:[%s5036_s26 + $0x330] sm:$0xff] }
 0x903   : > { %2163 = vmax.xlane.f32.xlu2 %v2162_v17  ;;  %v6663_v17 = vld [vmem:[%s5036_s26 + $0x340] sm:$0xff] }
 0x905   : > { %2148 = vmax.xlane.f32.xlu0 %v2147_v33  ;;  %v2186_v33 = vsel %vm237_vm0, %v6653_v43, -inf }
 0x90b   : > { %2172 = vmax.xlane.f32.xlu2 %v2171_v62 }
 0x90d   : > { %2157 = vmax.xlane.f32.xlu0 %v2156_v63  ;;  %v2225_v63 = vsel %vm237_vm0, %v6658_v35, -inf }
 0x913   : > { %2181 = vmax.xlane.f32.xlu2 %v2180_v11 }
 0x915   : > { %2166 = vmax.xlane.f32.xlu0 %v2165_v6  ;;  %v2228_v6 = vsel %vm237_vm0, %v6663_v17, -inf }
 0x91b   : > { %2190 = vmax.xlane.f32.xlu2 %v2189_v52 }
 0x91d   : > { %2175 = vmax.xlane.f32.xlu0 %v2174_v36 }
 0x923   : > { %2199 = vmax.xlane.f32.xlu2 %v2198_v38 }
 0x925   : > { %2184 = vmax.xlane.f32.xlu0 %v2183_v8 }
 0x92b   : > { %2208 = vmax.xlane.f32.xlu2 %v2207_v24 }
 0x92d   : > { %2193 = vmax.xlane.f32.xlu0 %v2192_v19 }
 0x930   : > { %v2073_v41 = vpop.xlane.xlu0 %2072 }
 0x931   : > { %v2087_v50 = vperm.slane %v2073_v41, %v5228_v21  ;;  %v6668_v41 = vld [vmem:[%s5036_s26 + $0x210] sm:$0xff] }
 0x932   : > { %v2195_v62 = vsel %vm237_vm0, %v6668_v41, -inf }
 0x933   : > { %2217 = vmax.xlane.f32.xlu2 %v2216_v54 }
 0x935   : > { %2202 = vmax.xlane.f32.xlu0 %v2201_v2 }
 0x93b   : > { %2226 = vmax.xlane.f32.xlu2 %v2225_v63 }
 0x93d   : > { %2211 = vmax.xlane.f32.xlu0 %v2210_v46 }
 0x945   : > { %2220 = vmax.xlane.f32.xlu0 %v2219_v23 }
 0x947   : > { %v2076_v25 = vpop.xlane.xlu1 %2075 }
 0x948   : > { %v2088_v40 = vperm.slane %v2076_v25, %v5228_v21  ;;  %v6673_v25 = vld [vmem:[%s5036_s26 + $0x360] sm:$0xff] }
 0x94a   : > { %v2091_v39 = vsel %vm400_vm2, %v2088_v40, %v2087_v50  ;;  %v6678_v40 = vld [vmem:[%s5036_s26 + $0x370] sm:$0xff] }
 0x94b   : > { %v2237_v36 = vsel %vm237_vm0, %v6678_v40, -inf }
 0x94d   : > { %2229 = vmax.xlane.f32.xlu0 %v2228_v6 }
 0x955   : > { %2238 = vmax.xlane.f32.xlu0 %v2237_v36 }
 0x95e   : > { %v2079_v16 = vpop.xlane.xlu2 %2078 }
 0x95f   : > { %v2089_v22 = vperm.slane %v2079_v16, %v5228_v21  ;;  %v2234_v16 = vsel %vm237_vm0, %v6673_v25, -inf }
 0x960   : > { %2235 = vmax.xlane.f32.xlu2 %v2234_v16 }
 0x961   : > { %v2092_v18 = vsel %vm402_vm3, %v2089_v22, %v2091_v39  ;;  %v6683_v22 = vld [vmem:[%s5036_s26 + $0x240] sm:$0xff] }
 0x962   : > { %v2204_v50 = vsel %vm237_vm0, %v6683_v22, -inf }
 0x966   : > { %v2146_v11 = vpop.xlane.xlu2 %2145 }
 0x967   : > { %v2272_v2 = vperm.slane %v2146_v11, %v5228_v21 }
 0x970   : > { %v2082_v9 = vpop.xlane.xlu0 %2081 }
 0x971   : > { %v2090_v15 = vperm.slane %v2082_v9, %v5228_v21  ;;  %v6688_v9 = vld [vmem:[%s5036_s26 + $0x270] sm:$0xff] }
 0x972   : > { %v2213_v39 = vsel %vm237_vm0, %v6688_v9, -inf }
 0x973   : > { %v2093_v4 = vsel %vm404_vm4, %v2090_v15, %v2092_v18  ;;  %v6693_v15 = vld [vmem:[%s5036_s26 + $0x320] sm:$0xff] }
 0x974   : > { %v2095_v3 = vsel %vm463_vm9, %v2093_v4, -inf  ;;  %v2222_v18 = vsel %vm237_vm0, %v6693_v15, -inf  ;;  %v6698_v4 = vld [vmem:[%s5036_s26 + $0x350] sm:$0xff] }
 0x975   : > { %2096 = vmax.xlane.f32.xlu1 %v2095_v3  ;;  %v2231_v3 = vsel %vm237_vm0, %v6698_v4, -inf }
 0x978   : > { %v2149_v8 = vpop.xlane.xlu0 %2148 }
 0x97d   : > { %2151 = vmax.xlane.f32.xlu1 %v2150_v48  ;;  %v2155_v48 = vpop.xlane.xlu2 %2154 }
 0x980   : > { %v2158_v52 = vpop.xlane.xlu0 %2157 }
 0x981   : > { %v2276_v6 = vperm.slane %v2158_v52, %v5228_v21 }
 0x985   : > { %2160 = vmax.xlane.f32.xlu1 %v2159_v55  ;;  %v2164_v19 = vpop.xlane.xlu2 %2163 }
 0x986   : > { %v2278_v16 = vperm.slane %v2164_v19, %v5228_v21 }
 0x988   : > { %v2167_v55 = vpop.xlane.xlu0 %2166 }
 0x98d   : > { %2169 = vmax.xlane.f32.xlu1 %v2168_v44  ;;  %v2273_v44 = vperm.slane %v2149_v8, %v5228_v21  ;;  %v2173_v24 = vpop.xlane.xlu2 %2172 }
 0x98f   : > { %v2304_v23 = vsel %vm400_vm2, %v2273_v44, %v2272_v2 }
 0x995   : > { %2178 = vmax.xlane.f32.xlu1 %v2177_v26  ;;  %v2176_v26 = vpop.xlane.xlu0 %2175 }
 0x99d   : > { %2187 = vmax.xlane.f32.xlu1 %v2186_v33  ;;  %v2275_v33 = vperm.slane %v2155_v48, %v5228_v21  ;;  %v2185_v11 = vpop.xlane.xlu0 %2184 }
 0x9a5   : > { %2196 = vmax.xlane.f32.xlu1 %v2195_v62 }
 0x9ad   : > { %2205 = vmax.xlane.f32.xlu1 %v2204_v50 }
 0x9b5   : > { %2214 = vmax.xlane.f32.xlu1 %v2213_v39  ;;  %v2279_v39 = vperm.slane %v2167_v55, %v5228_v21  ;;  %v2194_v55 = vpop.xlane.xlu0 %2193 }
 0x9bd   : > { %2223 = vmax.xlane.f32.xlu1 %v2222_v18  ;;  %v2182_v18 = vpop.xlane.xlu2 %2181 }
 0x9c5   : > { %2232 = vmax.xlane.f32.xlu1 %v2231_v3  ;;  %v2191_v19 = vpop.xlane.xlu2 %2190 }
 0x9e8   : > { %v6702_v38 = vpop.xlane.xlu1 %2096 }
 0x9e9   : > { %8218 = vst [vmem:[#allocation14_spill] sm:$0xff] %v6702_v38 }
 0x9f0   : > { %v2152_v46 = vpop.xlane.xlu1 %2151 }
 0x9f1   : > { %v2274_v54 = vperm.slane %v2152_v46, %v5228_v21  ;;  %v2281_v46 = vperm.slane %v2173_v24, %v5228_v21  ;;  %v2203_v24 = vpop.xlane.xlu0 %2202 }
 0x9f3   : > { %v2305_v63 = vsel %vm402_vm3, %v2274_v54, %v2304_v23  ;;  %v2282_v23 = vperm.slane %v2176_v26, %v5228_v21  ;;  %v2287_v26 = vperm.slane %v2191_v19, %v5228_v21 }
 0x9f4   : > { %v2306_v62 = vsel %vm404_vm4, %v2275_v33, %v2305_v63 }
 0x9f5   : > { %v2307_v3 = vsel %vm406_vm5, %v2276_v6, %v2306_v62 }
 0x9f8   : > { %v2161_v36 = vpop.xlane.xlu1 %2160 }
 0x9f9   : > { %v2277_v50 = vperm.slane %v2161_v36, %v5228_v21 }
 0x9fb   : > { %v2308_v8 = vsel %vm408_vm6, %v2277_v50, %v2307_v3  ;;  %v2200_v50 = vpop.xlane.xlu2 %2199 }
 0x9fc   : > { %v2309_v48 = vsel %vm410_vm7, %v2278_v16, %v2308_v8  ;;  %v2284_v16 = vperm.slane %v2182_v18, %v5228_v21  ;;  %v2290_v19 = vperm.slane %v2200_v50, %v5228_v21 }
 0x9fd   : > { %v2310_v2 = vsel %vm412_vm8, %v2279_v39, %v2309_v48  ;;  %v2285_v39 = vperm.slane %v2185_v11, %v5228_v21  ;;  %v2212_v11 = vpop.xlane.xlu0 %2211 }
 0x9fe   : > { %v2336_v52 = vsel %vm237_vm0, %v2310_v2, -inf }
 0x9ff   : > { %2337 = vmax.xlane.f32.xlu1 %v2336_v52 }
 0xa00   : > { %v2170_v44 = vpop.xlane.xlu1 %2169 }
 0xa01   : > { %v2280_v54 = vperm.slane %v2170_v44, %v5228_v21 }
 0xa03   : > { %v2311_v33 = vsel %vm400_vm2, %v2281_v46, %v2280_v54  ;;  %v2209_v46 = vpop.xlane.xlu2 %2208 }
 0xa04   : > { %v2312_v62 = vsel %vm402_vm3, %v2282_v23, %v2311_v33  ;;  %v2288_v33 = vperm.slane %v2194_v55, %v5228_v21  ;;  %v2294_v55 = vperm.slane %v2212_v11, %v5228_v21 }
 0xa08   : > { %v2179_v63 = vpop.xlane.xlu1 %2178 }
 0xa09   : > { %v2283_v6 = vperm.slane %v2179_v63, %v5228_v21 }
 0xa0b   : > { %v2313_v36 = vsel %vm404_vm4, %v2283_v6, %v2312_v62  ;;  %v2291_v6 = vperm.slane %v2203_v24, %v5228_v21 }
 0xa0c   : > { %v2314_v3 = vsel %vm406_vm5, %v2284_v16, %v2313_v36 }
 0xa0d   : > { %v2315_v2 = vsel %vm408_vm6, %v2285_v39, %v2314_v3  ;;  %v2218_v39 = vpop.xlane.xlu2 %2217  ;;  %v2221_v3 = vpop.xlane.xlu0 %2220 }
 0xa10   : > { %v2188_v8 = vpop.xlane.xlu1 %2187 }
 0xa11   : > { %v2286_v48 = vperm.slane %v2188_v8, %v5228_v21 }
 0xa13   : > { %v2316_v52 = vsel %vm410_vm7, %v2286_v48, %v2315_v2 }
 0xa14   : > { %v2317_v44 = vsel %vm412_vm8, %v2287_v26, %v2316_v52  ;;  %v2293_v26 = vperm.slane %v2209_v46, %v5228_v21  ;;  %v2296_v46 = vperm.slane %v2218_v39, %v5228_v21 }
 0xa15   : > { %v2339_v18 = vsel %vm237_vm0, %v2317_v44, -inf }
 0xa16   : > { %2340 = vmax.xlane.f32.xlu2 %v2339_v18  ;;  %v2227_v18 = vpop.xlane.xlu2 %2226 }
 0xa18   : > { %v2197_v54 = vpop.xlane.xlu1 %2196 }
 0xa19   : > { %v2289_v23 = vperm.slane %v2197_v54, %v5228_v21 }
 0xa1b   : > { %v2318_v63 = vsel %vm400_vm2, %v2289_v23, %v2288_v33  ;;  %v2230_v23 = vpop.xlane.xlu0 %2229  ;;  %v2297_v33 = vperm.slane %v2221_v3, %v5228_v21 }
 0xa1c   : > { %v2319_v62 = vsel %vm402_vm3, %v2290_v19, %v2318_v63 }
 0xa1d   : > { %v2320_v8 = vsel %vm404_vm4, %v2291_v6, %v2319_v62  ;;  %v2325_v63 = vsel %vm400_vm2, %v2297_v33, %v2296_v46  ;;  %v2299_v6 = vperm.slane %v2227_v18, %v5228_v21  ;;  %v2363_v18 = vsel %vm467_vm1, %v6535_v34, -inf }
 0xa1e   : > { %v2375_v46 = vsel %vm467_vm1, %v6550_v37, -inf  ;;  %v2381_v33 = vsel %vm467_vm1, %v6555_v51, -inf  ;;  %v2384_v34 = vsel %vm467_vm1, %v6560_v5, -inf  ;;  %v2393_v37 = vsel %vm467_vm1, %v6570_v1, -inf }
 0xa1f   : > { %v2399_v1 = vsel %vm467_vm1, %v6583_v57, -inf  ;;  %v2378_v57 = vsel %vm467_vm1, %v6608_v20, -inf  ;;  %v2396_v20 = vsel %vm467_vm1, %v6638_v27, -inf  ;;  %v2414_v27 = vsel %vm467_vm1, %v6668_v41, -inf }
 0xa20   : > { %v2206_v16 = vpop.xlane.xlu1 %2205  ;;  %v2450_v41 = vsel %vm467_vm1, %v6698_v4, -inf }
 0xa21   : > { %v2292_v36 = vperm.slane %v2206_v16, %v5228_v21  ;;  %v2236_v16 = vpop.xlane.xlu2 %2235 }
 0xa22   : > { %v2302_v39 = vperm.slane %v2236_v16, %v5228_v21 }
 0xa23   : > { %v2321_v48 = vsel %vm406_vm5, %v2292_v36, %v2320_v8  ;;  %v2300_v36 = vperm.slane %v2230_v23, %v5228_v21  ;;  %v2239_v8 = vpop.xlane.xlu0 %2238  ;;  %v2372_v23 = vsel %vm467_vm1, %v6545_v30, -inf }
 0xa24   : > { %v2322_v50 = vsel %vm408_vm6, %v2293_v26, %v2321_v48 }
 0xa25   : > { %v2323_v52 = vsel %vm410_vm7, %v2294_v55, %v2322_v50  ;;  %v2303_v55 = vperm.slane %v2239_v8, %v5228_v21 }
 0xa28   : > { %v2215_v2 = vpop.xlane.xlu1 %2214 }
 0xa29   : > { %v2295_v24 = vperm.slane %v2215_v2, %v5228_v21 }
 0xa2b   : > { %v2324_v44 = vsel %vm412_vm8, %v2295_v24, %v2323_v52 }
 0xa2c   : > { %v2342_v54 = vsel %vm237_vm0, %v2324_v44, -inf }
 0xa2d   : > { %2343 = vmax.xlane.f32.xlu0 %v2342_v54  ;;  %v2366_v54 = vsel %vm467_vm1, %v6540_v10, -inf  ;;  %v2390_v10 = vsel %vm467_vm1, %v6565_v42, -inf }
 0xa30   : > { %v2224_v19 = vpop.xlane.xlu1 %2223 }
 0xa31   : > { %v2298_v11 = vperm.slane %v2224_v19, %v5228_v21 }
 0xa33   : > { %v2326_v62 = vsel %vm402_vm3, %v2298_v11, %v2325_v63 }
 0xa34   : > { %v2327_v26 = vsel %vm404_vm4, %v2299_v6, %v2326_v62 }
 0xa35   : > { %v2328_v50 = vsel %vm406_vm5, %v2300_v36, %v2327_v26  ;;  %2364 = vmax.xlane.f32.xlu0 %v2363_v18  ;;  %v2402_v26 = vsel %vm467_vm1, %v6586_v31, -inf  ;;  %v2417_v31 = vsel %vm467_vm1, %v6613_v0, -inf  ;;  %v2435_v0 = vsel %vm467_vm1, %v6643_v13, -inf }
 0xa36   : > { %v2453_v13 = vsel %vm467_vm1, %v6673_v25, -inf }
 0xa38   : > { %v2233_v48 = vpop.xlane.xlu1 %2232 }
 0xa39   : > { %v2301_v3 = vperm.slane %v2233_v48, %v5228_v21  ;;  %v2369_v48 = vsel %vm467_vm1, %v6593_v56, -inf  ;;  %v2387_v56 = vsel %vm467_vm1, %v6623_v28, -inf  ;;  %v2405_v28 = vsel %vm467_vm1, %v6653_v43, -inf }
 0xa3a   : > { %v2423_v43 = vsel %vm467_vm1, %v6683_v22, -inf }
 0xa3b   : > { %v2329_v2 = vsel %vm408_vm6, %v2301_v3, %v2328_v50  ;;  %v2411_v3 = vsel %vm467_vm1, %v6601_v29, -inf  ;;  %v2429_v29 = vsel %vm467_vm1, %v6631_v59, -inf  ;;  %v2447_v59 = vsel %vm467_vm1, %v6663_v17, -inf }
 0xa3c   : > { %v2330_v24 = vsel %vm410_vm7, %v2302_v39, %v2329_v2  ;;  %v2408_v39 = vsel %vm467_vm1, %v6598_v47, -inf  ;;  %v2426_v47 = vsel %vm467_vm1, %v6628_v53, -inf  ;;  %v2444_v53 = vsel %vm467_vm1, %v6658_v35, -inf }
 0xa3d   : > { %v2331_v52 = vsel %vm412_vm8, %v2303_v55, %v2330_v24  ;;  %2373 = vmax.xlane.f32.xlu0 %v2372_v23  ;;  %v2420_v55 = vsel %vm467_vm1, %v6616_v7, -inf  ;;  %v2438_v7 = vsel %vm467_vm1, %v6646_v49, -inf  ;;  %v2456_v49 = vsel %vm467_vm1, %v6678_v40, -inf }
 0xa3e   : > { %v2345_v44 = vsel %vm237_vm0, %v2331_v52, -inf  ;;  %v2432_v35 = vsel %vm467_vm1, %v6688_v9, -inf  ;;  %v2441_v17 = vsel %vm467_vm1, %v6693_v15, -inf }
 0xa3f   : > { %2346 = vmax.xlane.f32.xlu1 %v2345_v44 }
 0xa45   : > { %2382 = vmax.xlane.f32.xlu0 %v2381_v33 }
 0xa47   : > { %2367 = vmax.xlane.f32.xlu1 %v2366_v54 }
 0xa4d   : > { %2391 = vmax.xlane.f32.xlu0 %v2390_v10 }
 0xa4f   : > { %2376 = vmax.xlane.f32.xlu1 %v2375_v46 }
 0xa55   : > { %2400 = vmax.xlane.f32.xlu0 %v2399_v1 }
 0xa57   : > { %2385 = vmax.xlane.f32.xlu1 %v2384_v34 }
 0xa5d   : > { %2409 = vmax.xlane.f32.xlu0 %v2408_v39 }
 0xa5f   : > { %2394 = vmax.xlane.f32.xlu1 %v2393_v37 }
 0xa65   : > { %2418 = vmax.xlane.f32.xlu0 %v2417_v31 }
 0xa67   : > { %2403 = vmax.xlane.f32.xlu1 %v2402_v26 }
 0xa6d   : > { %2427 = vmax.xlane.f32.xlu0 %v2426_v47 }
 0xa6f   : > { %2412 = vmax.xlane.f32.xlu1 %v2411_v3 }
 0xa72   : > { %v2338_v19 = vpop.xlane.xlu1 %2337 }
 0xa73   : > { %v2352_v51 = vperm.slane %v2338_v19, %v5228_v21 }
 0xa75   : > { %2436 = vmax.xlane.f32.xlu0 %v2435_v0 }
 0xa77   : > { %2421 = vmax.xlane.f32.xlu1 %v2420_v55 }
 0xa7d   : > { %2445 = vmax.xlane.f32.xlu0 %v2444_v53 }
 0xa7f   : > { %2430 = vmax.xlane.f32.xlu1 %v2429_v29 }
 0xa85   : > { %2454 = vmax.xlane.f32.xlu0 %v2453_v13 }
 0xa87   : > { %2439 = vmax.xlane.f32.xlu1 %v2438_v7 }
 0xa89   : > { %v2341_v11 = vpop.xlane.xlu2 %2340 }
 0xa8a   : > { %v2353_v63 = vperm.slane %v2341_v11, %v5228_v21 }
 0xa8c   : > { %v2356_v5 = vsel %vm400_vm2, %v2353_v63, %v2352_v51 }
 0xa8f   : > { %2448 = vmax.xlane.f32.xlu1 %v2447_v59 }
 0xa97   : > { %2457 = vmax.xlane.f32.xlu1 %v2456_v49 }
 0xaa0   : > { %v2344_v30 = vpop.xlane.xlu0 %2343 }
 0xaa1   : > { %v2354_v6 = vperm.slane %v2344_v30, %v5228_v21 }
 0xaa3   : > { %v2357_v42 = vsel %vm402_vm3, %v2354_v6, %v2356_v5 }
 0xaa8   : > { %v2365_v25 = vpop.xlane.xlu0 %2364 }
 0xaa9   : > { %v2491_v44 = vperm.slane %v2365_v25, %v5228_v21 }
 0xab0   : > { %v2374_v50 = vpop.xlane.xlu0 %2373 }
 0xab1   : > { %v2494_v46 = vperm.slane %v2374_v50, %v5228_v21 }
 0xab2   : > { %v2347_v62 = vpop.xlane.xlu1 %2346 }
 0xab3   : > { %v2355_v16 = vperm.slane %v2347_v62, %v5228_v21 }
 0xab5   : > { %v2358_v36 = vsel %vm404_vm4, %v2355_v16, %v2357_v42 }
 0xab6   : > { %v2360_v8 = vsel %vm463_vm9, %v2358_v36, -inf }
 0xab7   : > { %2361 = vmax.xlane.f32.xlu2 %v2360_v8 }
 0xab8   : > { %v2383_v24 = vpop.xlane.xlu0 %2382 }
 0xab9   : > { %v2497_v11 = vperm.slane %v2383_v24, %v5228_v21 }
 0xaba   : > { %v2368_v40 = vpop.xlane.xlu1 %2367 }
 0xabb   : > { %v2492_v9 = vperm.slane %v2368_v40, %v5228_v21 }
 0xabd   : > { %v2523_v4 = vsel %vm400_vm2, %v2492_v9, %v2491_v44 }
 0xabf   : > { %2370 = vmax.xlane.f32.xlu2 %v2369_v48 }
 0xac0   : > { %v2392_v18 = vpop.xlane.xlu0 %2391 }
 0xac1   : > { %v2500_v26 = vperm.slane %v2392_v18, %v5228_v21 }
 0xac2   : > { %v2377_v2 = vpop.xlane.xlu1 %2376 }
 0xac3   : > { %v2495_v34 = vperm.slane %v2377_v2, %v5228_v21 }
 0xac7   : > { %2379 = vmax.xlane.f32.xlu2 %v2378_v57 }
 0xac8   : > { %v2401_v37 = vpop.xlane.xlu0 %2400 }
 0xaca   : > { %v2386_v52 = vpop.xlane.xlu1 %2385 }
 0xacb   : > { %v2498_v63 = vperm.slane %v2386_v52, %v5228_v21 }
 0xacf   : > { %2388 = vmax.xlane.f32.xlu2 %v2387_v56  ;;  %v2503_v56 = vperm.slane %v2401_v37, %v5228_v21 }
 0xad0   : > { %v2410_v8 = vpop.xlane.xlu0 %2409 }
 0xad1   : > { %v2506_v53 = vperm.slane %v2410_v8, %v5228_v21 }
 0xad2   : > { %v2395_v15 = vpop.xlane.xlu1 %2394 }
 0xad3   : > { %v2501_v39 = vperm.slane %v2395_v15, %v5228_v21 }
 0xad7   : > { %2397 = vmax.xlane.f32.xlu2 %v2396_v20 }
 0xad8   : > { %v2419_v29 = vpop.xlane.xlu0 %2418 }
 0xad9   : > { %v2509_v50 = vperm.slane %v2419_v29, %v5228_v21 }
 0xada   : > { %v2404_v51 = vpop.xlane.xlu1 %2403 }
 0xadb   : > { %v2504_v20 = vperm.slane %v2404_v51, %v5228_v21 }
 0xadf   : > { %2406 = vmax.xlane.f32.xlu2 %v2405_v28 }
 0xae2   : > { %v2413_v48 = vpop.xlane.xlu1 %2412 }
 0xae3   : > { %v2507_v40 = vperm.slane %v2413_v48, %v5228_v21 }
 0xae7   : > { %2415 = vmax.xlane.f32.xlu2 %v2414_v27 }
 0xaea   : > { %v2422_v0 = vpop.xlane.xlu1 %2421 }
 0xaeb   : > { %v2510_v24 = vperm.slane %v2422_v0, %v5228_v21  ;;  %v6907_v0 = vld [vmem:[%s5036_s26 + $0x8] sm:$0xff] }
 0xaef   : > { %2424 = vmax.xlane.f32.xlu2 %v2423_v43 }
 0xaf7   : > { %2433 = vmax.xlane.f32.xlu2 %v2432_v35  ;;  %v2428_v35 = vpop.xlane.xlu0 %2427 }
 0xaff   : > { %2442 = vmax.xlane.f32.xlu2 %v2441_v17  ;;  %v2437_v18 = vpop.xlane.xlu0 %2436 }
 0xb00   : > { %v2515_v51 = vperm.slane %v2437_v18, %v5228_v21 }
 0xb07   : > { %2451 = vmax.xlane.f32.xlu2 %v2450_v41  ;;  %v2431_v41 = vpop.xlane.xlu1 %2430 }
 0xb2a   : > { %v6840_v22 = vpop.xlane.xlu2 %2361 }
 0xb32   : > { %v2371_v54 = vpop.xlane.xlu2 %2370 }
 0xb33   : > { %v2493_v23 = vperm.slane %v2371_v54, %v5228_v21  ;;  %v2440_v54 = vpop.xlane.xlu1 %2439 }
 0xb35   : > { %v2524_v33 = vsel %vm402_vm3, %v2493_v23, %v2523_v4  ;;  %v2512_v23 = vperm.slane %v2428_v35, %v5228_v21 }
 0xb36   : > { %v2525_v10 = vsel %vm404_vm4, %v2494_v46, %v2524_v33  ;;  %v2513_v46 = vperm.slane %v2431_v41, %v5228_v21 }
 0xb37   : > { %v2526_v6 = vsel %vm406_vm5, %v2495_v34, %v2525_v10 }
 0xb3a   : > { %v2380_v19 = vpop.xlane.xlu2 %2379 }
 0xb3b   : > { %v2496_v30 = vperm.slane %v2380_v19, %v5228_v21  ;;  %v2449_v37 = vpop.xlane.xlu1 %2448 }
 0xb3d   : > { %v2527_v62 = vsel %vm408_vm6, %v2496_v30, %v2526_v6  ;;  %v2446_v30 = vpop.xlane.xlu0 %2445  ;;  %v2516_v6 = vperm.slane %v2440_v54, %v5228_v21 }
 0xb3e   : > { %v2528_v5 = vsel %vm410_vm7, %v2497_v11, %v2527_v62 }
 0xb3f   : > { %v2529_v16 = vsel %vm412_vm8, %v2498_v63, %v2528_v5 }
 0xb40   : > { %v2555_v42 = vsel %vm237_vm0, %v2529_v16, -inf  ;;  %v2544_v16 = vsel %vm400_vm2, %v2516_v6, %v2515_v51  ;;  %v6970_v6 = vld [vmem:[%s5036_s26 + $0x178] sm:$0xff]  ;;  %v6973_v51 = vld [vmem:[%s5036_s26 + $0x208] sm:$0xff] }
 0xb41   : > { %2556 = vmax.xlane.f32.xlu2 %v2555_v42  ;;  %v2518_v42 = vperm.slane %v2446_v30, %v5228_v21 }
 0xb42   : > { %v2389_v36 = vpop.xlane.xlu2 %2388 }
 0xb43   : > { %v2499_v1 = vperm.slane %v2389_v36, %v5228_v21 }
 0xb45   : > { %v2530_v3 = vsel %vm400_vm2, %v2500_v26, %v2499_v1  ;;  %v2455_v8 = vpop.xlane.xlu0 %2454  ;;  %v2519_v1 = vperm.slane %v2449_v37, %v5228_v21  ;;  %v2458_v26 = vpop.xlane.xlu1 %2457 }
 0xb46   : > { %v2531_v55 = vsel %vm402_vm3, %v2501_v39, %v2530_v3  ;;  %v2521_v3 = vperm.slane %v2455_v8, %v5228_v21  ;;  %v6988_v8 = vld [vmem:[%s5036_s26 + $0x238] sm:$0xff] }
 0xb4a   : > { %v2398_v57 = vpop.xlane.xlu2 %2397 }
 0xb4b   : > { %v2502_v31 = vperm.slane %v2398_v57, %v5228_v21 }
 0xb4d   : > { %v2532_v47 = vsel %vm404_vm4, %v2502_v31, %v2531_v55  ;;  %v2522_v31 = vperm.slane %v2458_v26, %v5228_v21  ;;  %v2671_v26 = vsel %vm237_vm0, %v6988_v8, -inf }
 0xb4e   : > { %v2533_v7 = vsel %vm406_vm5, %v2503_v56, %v2532_v47 }
 0xb4f   : > { %v2534_v27 = vsel %vm408_vm6, %v2504_v20, %v2533_v7  ;;  %v2614_v7 = vsel %vm237_vm0, %v6907_v0, -inf }
 0xb52   : > { %v2407_v28 = vpop.xlane.xlu2 %2406 }
 0xb53   : > { %v2505_v59 = vperm.slane %v2407_v28, %v5228_v21  ;;  %v6912_v28 = vld [vmem:[%s5036_s26 + $0x18] sm:$0xff] }
 0xb55   : > { %v2535_v13 = vsel %vm410_vm7, %v2505_v59, %v2534_v27  ;;  %v6917_v59 = vld [vmem:[%s5036_s26 + $0x38] sm:$0xff] }
 0xb56   : > { %v2536_v49 = vsel %vm412_vm8, %v2506_v53, %v2535_v13  ;;  %v2617_v53 = vsel %vm237_vm0, %v6912_v28, -inf  ;;  %v2623_v27 = vsel %vm237_vm0, %v6917_v59, -inf  ;;  %v6922_v13 = vld [vmem:[%s5036_s26 + $0x48] sm:$0xff] }
 0xb57   : > { %v2558_v43 = vsel %vm237_vm0, %v2536_v49, -inf  ;;  %v2626_v49 = vsel %vm237_vm0, %v6922_v13, -inf }
 0xb58   : > { %2559 = vmax.xlane.f32.xlu0 %v2558_v43  ;;  %v6927_v43 = vld [vmem:[%s5036_s26 + $0x68] sm:$0xff] }
 0xb59   : > { %v2632_v35 = vsel %vm237_vm0, %v6927_v43, -inf }
 0xb5a   : > { %v2416_v17 = vpop.xlane.xlu2 %2415 }
 0xb5b   : > { %v2508_v25 = vperm.slane %v2416_v17, %v5228_v21  ;;  %v6932_v17 = vld [vmem:[%s5036_s26 + $0x78] sm:$0xff] }
 0xb5c   : > { %v2635_v41 = vsel %vm237_vm0, %v6932_v17, -inf }
 0xb5d   : > { %v2537_v2 = vsel %vm400_vm2, %v2508_v25, %v2507_v40  ;;  %v6937_v25 = vld [vmem:[%s5036_s26 + $0x118] sm:$0xff] }
 0xb5e   : > { %v2538_v52 = vsel %vm402_vm3, %v2509_v50, %v2537_v2  ;;  %v2641_v50 = vsel %vm237_vm0, %v6937_v25, -inf }
 0xb5f   : > { %v2539_v15 = vsel %vm404_vm4, %v2510_v24, %v2538_v52  ;;  %v6942_v52 = vld [vmem:[%s5036_s26 + $0x128] sm:$0xff] }
 0xb62   : > { %v2425_v44 = vpop.xlane.xlu2 %2424 }
 0xb63   : > { %v2511_v9 = vperm.slane %v2425_v44, %v5228_v21 }
 0xb65   : > { %v2540_v4 = vsel %vm406_vm5, %v2511_v9, %v2539_v15  ;;  %v2644_v9 = vsel %vm237_vm0, %v6942_v52, -inf }
 0xb66   : > { %v2541_v33 = vsel %vm408_vm6, %v2512_v23, %v2540_v4 }
 0xb67   : > { %v2542_v19 = vsel %vm410_vm7, %v2513_v46, %v2541_v33 }
 0xb6a   : > { %v2434_v34 = vpop.xlane.xlu2 %2433 }
 0xb6b   : > { %v2514_v10 = vperm.slane %v2434_v34, %v5228_v21 }
 0xb6d   : > { %v2543_v11 = vsel %vm412_vm8, %v2514_v10, %v2542_v19  ;;  %v6955_v10 = vld [vmem:[%s5036_s26 + $0x148] sm:$0xff]  ;;  %v6958_v19 = vld [vmem:[%s5036_s26 + $0x158] sm:$0xff] }
 0xb6e   : > { %v2561_v63 = vsel %vm237_vm0, %v2543_v11, -inf  ;;  %v2650_v11 = vsel %vm237_vm0, %v6955_v10, -inf  ;;  %v2653_v30 = vsel %vm237_vm0, %v6958_v19, -inf }
 0xb6f   : > { %2562 = vmax.xlane.f32.xlu1 %v2561_v63  ;;  %v6965_v63 = vld [vmem:[%s5036_s26 + $0x28] sm:$0xff] }
 0xb70   : > { %v2620_v37 = vsel %vm237_vm0, %v6965_v63, -inf }
 0xb72   : > { %v2443_v62 = vpop.xlane.xlu2 %2442 }
 0xb73   : > { %v2517_v5 = vperm.slane %v2443_v62, %v5228_v21  ;;  %v2659_v62 = vsel %vm237_vm0, %v6970_v6, -inf }
 0xb75   : > { %v2545_v36 = vsel %vm402_vm3, %v2517_v5, %v2544_v16  ;;  %v2662_v5 = vsel %vm237_vm0, %v6973_v51, -inf  ;;  %v6980_v16 = vld [vmem:[%s5036_s26 + $0x58] sm:$0xff] }
 0xb76   : > { %v2546_v48 = vsel %vm404_vm4, %v2518_v42, %v2545_v36  ;;  %v2629_v42 = vsel %vm237_vm0, %v6980_v16, -inf  ;;  %v6985_v36 = vld [vmem:[%s5036_s26 + $0x228] sm:$0xff] }
 0xb77   : > { %v2547_v55 = vsel %vm406_vm5, %v2519_v1, %v2546_v48  ;;  %2615 = vmax.xlane.f32.xlu1 %v2614_v7  ;;  %v2668_v1 = vsel %vm237_vm0, %v6985_v36, -inf  ;;  %v6995_v48 = vld [vmem:[%s5036_s26 + $0x108] sm:$0xff] }
 0xb7a   : > { %v2452_v39 = vpop.xlane.xlu2 %2451 }
 0xb7b   : > { %v2520_v57 = vperm.slane %v2452_v39, %v5228_v21  ;;  %v2638_v39 = vsel %vm237_vm0, %v6995_v48, -inf }
 0xb7d   : > { %v2548_v56 = vsel %vm408_vm6, %v2520_v57, %v2547_v55  ;;  %v7003_v57 = vld [vmem:[%s5036_s26 + $0x268] sm:$0xff] }
 0xb7e   : > { %v2549_v47 = vsel %vm410_vm7, %v2521_v3, %v2548_v56  ;;  %v7000_v3 = vld [vmem:[%s5036_s26 + $0x258] sm:$0xff]  ;;  %v2680_v55 = vsel %vm237_vm0, %v7003_v57, -inf }
 0xb7f   : > { %v2550_v29 = vsel %vm412_vm8, %v2522_v31, %v2549_v47  ;;  %2624 = vmax.xlane.f32.xlu1 %v2623_v27  ;;  %v2677_v31 = vsel %vm237_vm0, %v7000_v3, -inf  ;;  %v7010_v56 = vld [vmem:[%s5036_s26 + $0x138] sm:$0xff]  ;;  %v7025_v27 = vld [vmem:[%s5036_s26 + $0x168] sm:$0xff] }
 0xb80   : > { %v2564_v20 = vsel %vm237_vm0, %v2550_v29, -inf  ;;  %v2647_v47 = vsel %vm237_vm0, %v7010_v56, -inf  ;;  %v7015_v29 = vld [vmem:[%s5036_s26 + $0x308] sm:$0xff] }
 0xb81   : > { %2565 = vmax.xlane.f32.xlu2 %v2564_v20  ;;  %v7018_v20 = vld [vmem:[%s5036_s26 + $0x318] sm:$0xff]  ;;  %v2686_v7 = vsel %vm237_vm0, %v7015_v29, -inf }
 0xb87   : > { %2633 = vmax.xlane.f32.xlu1 %v2632_v35  ;;  %v7030_v35 = vld [vmem:[%s5036_s26 + $0x338] sm:$0xff] }
 0xb89   : > { %2618 = vmax.xlane.f32.xlu2 %v2617_v53  ;;  %v2689_v53 = vsel %vm237_vm0, %v7018_v20, -inf }
 0xb8f   : > { %2642 = vmax.xlane.f32.xlu1 %v2641_v50 }
 0xb91   : > { %2627 = vmax.xlane.f32.xlu2 %v2626_v49  ;;  %v2656_v49 = vsel %vm237_vm0, %v7025_v27, -inf }
 0xb97   : > { %2651 = vmax.xlane.f32.xlu1 %v2650_v11  ;;  %v7070_v11 = vld [vmem:[%s5036_s26 + $0x358] sm:$0xff] }
 0xb99   : > { %2636 = vmax.xlane.f32.xlu2 %v2635_v41  ;;  %v2695_v41 = vsel %vm237_vm0, %v7030_v35, -inf }
 0xb9f   : > { %2660 = vmax.xlane.f32.xlu1 %v2659_v62 }
 0xba1   : > { %2645 = vmax.xlane.f32.xlu2 %v2644_v9 }
 0xba7   : > { %2669 = vmax.xlane.f32.xlu1 %v2668_v1 }
 0xba9   : > { %2654 = vmax.xlane.f32.xlu2 %v2653_v30  ;;  %v2701_v30 = vsel %vm237_vm0, %v7070_v11, -inf }
 0xbaf   : > { %2678 = vmax.xlane.f32.xlu1 %v2677_v31 }
 0xbb1   : > { %2663 = vmax.xlane.f32.xlu2 %v2662_v5 }
 0xbb4   : > { %v2557_v40 = vpop.xlane.xlu2 %2556 }
 0xbb5   : > { %v2571_v54 = vperm.slane %v2557_v40, %v5228_v21  ;;  %v7035_v40 = vld [vmem:[%s5036_s26 + $0x348] sm:$0xff] }
 0xbb6   : > { %v2698_v50 = vsel %vm237_vm0, %v7035_v40, -inf }
 0xbb7   : > { %2687 = vmax.xlane.f32.xlu1 %v2686_v7 }
 0xbb9   : > { %2672 = vmax.xlane.f32.xlu2 %v2671_v26 }
 0xbbf   : > { %2696 = vmax.xlane.f32.xlu1 %v2695_v41 }
 0xbc1   : > { %2681 = vmax.xlane.f32.xlu2 %v2680_v55 }
 0xbc9   : > { %2690 = vmax.xlane.f32.xlu2 %v2689_v53 }
 0xbcb   : > { %v2560_v2 = vpop.xlane.xlu0 %2559 }
 0xbcc   : > { %v2572_v44 = vperm.slane %v2560_v2, %v5228_v21  ;;  %v7040_v2 = vld [vmem:[%s5036_s26 + $0x218] sm:$0xff] }
 0xbce   : > { %v2575_v23 = vsel %vm400_vm2, %v2572_v44, %v2571_v54  ;;  %v7045_v44 = vld [vmem:[%s5036_s26 + $0x368] sm:$0xff] }
 0xbcf   : > { %v2704_v9 = vsel %vm237_vm0, %v7045_v44, -inf }
 0xbd0   : > { %2705 = vmax.xlane.f32.xlu1 %v2704_v9 }
 0xbd1   : > { %2699 = vmax.xlane.f32.xlu2 %v2698_v50 }
 0xbe2   : > { %v2563_v24 = vpop.xlane.xlu1 %2562 }
 0xbe3   : > { %v2573_v18 = vperm.slane %v2563_v24, %v5228_v21  ;;  %v2665_v24 = vsel %vm237_vm0, %v7040_v2, -inf }
 0xbe5   : > { %v2576_v46 = vsel %vm402_vm3, %v2573_v18, %v2575_v23  ;;  %v7050_v18 = vld [vmem:[%s5036_s26 + $0x378] sm:$0xff] }
 0xbe6   : > { %v2707_v54 = vsel %vm237_vm0, %v7050_v18, -inf }
 0xbe7   : > { %2708 = vmax.xlane.f32.xlu2 %v2707_v54 }
 0xbf4   : > { %v2566_v15 = vpop.xlane.xlu2 %2565 }
 0xbf5   : > { %v2574_v4 = vperm.slane %v2566_v15, %v5228_v21  ;;  %v7055_v15 = vld [vmem:[%s5036_s26 + $0x248] sm:$0xff] }
 0xbf6   : > { %v2674_v23 = vsel %vm237_vm0, %v7055_v15, -inf }
 0xbf7   : > { %v2577_v33 = vsel %vm404_vm4, %v2574_v4, %v2576_v46  ;;  %v7060_v4 = vld [vmem:[%s5036_s26 + $0x278] sm:$0xff] }
 0xbf8   : > { %v2579_v34 = vsel %vm463_vm9, %v2577_v33, -inf  ;;  %v2683_v46 = vsel %vm237_vm0, %v7060_v4, -inf  ;;  %v7065_v33 = vld [vmem:[%s5036_s26 + $0x328] sm:$0xff] }
 0xbf9   : > { %2580 = vmax.xlane.f32.xlu0 %v2579_v34  ;;  %v2692_v34 = vsel %vm237_vm0, %v7065_v33, -inf }
 0xbfc   : > { %v2619_v62 = vpop.xlane.xlu2 %2618 }
 0xbfd   : > { %v2743_v55 = vperm.slane %v2619_v62, %v5228_v21 }
 0xc01   : > { %2621 = vmax.xlane.f32.xlu0 %v2620_v37  ;;  %v2616_v37 = vpop.xlane.xlu1 %2615 }
 0xc02   : > { %v2742_v31 = vperm.slane %v2616_v37, %v5228_v21 }
 0xc04   : > { %v2774_v41 = vsel %vm400_vm2, %v2743_v55, %v2742_v31 }
 0xc09   : > { %2630 = vmax.xlane.f32.xlu0 %v2629_v42  ;;  %v2625_v5 = vpop.xlane.xlu1 %2624  ;;  %v2628_v42 = vpop.xlane.xlu2 %2627 }
 0xc0a   : > { %v2745_v50 = vperm.slane %v2625_v5, %v5228_v21  ;;  %v2746_v9 = vperm.slane %v2628_v42, %v5228_v21 }
 0xc11   : > { %2639 = vmax.xlane.f32.xlu0 %v2638_v39  ;;  %v2634_v1 = vpop.xlane.xlu1 %2633  ;;  %v2637_v26 = vpop.xlane.xlu2 %2636 }
 0xc19   : > { %2648 = vmax.xlane.f32.xlu0 %v2647_v47  ;;  %v2643_v47 = vpop.xlane.xlu1 %2642  ;;  %v2646_v53 = vpop.xlane.xlu2 %2645 }
 0xc21   : > { %2657 = vmax.xlane.f32.xlu0 %v2656_v49  ;;  %v2652_v37 = vpop.xlane.xlu1 %2651 }
 0xc29   : > { %2666 = vmax.xlane.f32.xlu0 %v2665_v24 }
 0xc31   : > { %2675 = vmax.xlane.f32.xlu0 %v2674_v23  ;;  %v2748_v23 = vperm.slane %v2634_v1, %v5228_v21  ;;  %v2661_v1 = vpop.xlane.xlu1 %2660 }
 0xc39   : > { %2684 = vmax.xlane.f32.xlu0 %v2683_v46 }
 0xc41   : > { %2693 = vmax.xlane.f32.xlu0 %v2692_v34 }
 0xc49   : > { %2702 = vmax.xlane.f32.xlu0 %v2701_v30  ;;  %v2749_v30 = vperm.slane %v2637_v26, %v5228_v21 }
 0xc6c   : > { %v7074_v39 = vpop.xlane.xlu0 %2580 }
 0xc74   : > { %v2622_v7 = vpop.xlane.xlu0 %2621 }
 0xc75   : > { %v2744_v49 = vperm.slane %v2622_v7, %v5228_v21  ;;  %v2655_v7 = vpop.xlane.xlu2 %2654 }
 0xc77   : > { %v2775_v24 = vsel %vm402_vm3, %v2744_v49, %v2774_v41  ;;  %v2751_v41 = vperm.slane %v2643_v47, %v5228_v21 }
 0xc78   : > { %v2776_v54 = vsel %vm404_vm4, %v2745_v50, %v2775_v24  ;;  %v2752_v24 = vperm.slane %v2646_v53, %v5228_v21  ;;  %v2757_v53 = vperm.slane %v2661_v1, %v5228_v21 }
 0xc79   : > { %v2777_v62 = vsel %vm406_vm5, %v2746_v9, %v2776_v54 }
 0xc7c   : > { %v2631_v46 = vpop.xlane.xlu0 %2630 }
 0xc7d   : > { %v2747_v34 = vperm.slane %v2631_v46, %v5228_v21  ;;  %v2664_v26 = vpop.xlane.xlu2 %2663 }
 0xc7f   : > { %v2778_v31 = vsel %vm408_vm6, %v2747_v34, %v2777_v62  ;;  %v2754_v34 = vperm.slane %v2652_v37, %v5228_v21  ;;  %v2670_v62 = vpop.xlane.xlu1 %2669 }
 0xc80   : > { %v2779_v5 = vsel %vm410_vm7, %v2748_v23, %v2778_v31  ;;  %v2755_v31 = vperm.slane %v2655_v7, %v5228_v21  ;;  %v2760_v1 = vperm.slane %v2670_v62, %v5228_v21 }
 0xc81   : > { %v2780_v55 = vsel %vm412_vm8, %v2749_v30, %v2779_v5 }
 0xc82   : > { %v2806_v42 = vsel %vm237_vm0, %v2780_v55, -inf }
 0xc83   : > { %2807 = vmax.xlane.f32.xlu0 %v2806_v42 }
 0xc84   : > { %v2640_v49 = vpop.xlane.xlu0 %2639 }
 0xc85   : > { %v2750_v50 = vperm.slane %v2640_v49, %v5228_v21  ;;  %v2673_v47 = vpop.xlane.xlu2 %2672 }
 0xc87   : > { %v2781_v9 = vsel %vm400_vm2, %v2751_v41, %v2750_v50 }
 0xc88   : > { %v2782_v23 = vsel %vm402_vm3, %v2752_v24, %v2781_v9  ;;  %v2679_v24 = vpop.xlane.xlu1 %2678 }
 0xc8c   : > { %v2649_v54 = vpop.xlane.xlu0 %2648 }
 0xc8d   : > { %v2753_v46 = vperm.slane %v2649_v54, %v5228_v21  ;;  %v2682_v7 = vpop.xlane.xlu2 %2681 }
 0xc8f   : > { %v2783_v30 = vsel %vm404_vm4, %v2753_v46, %v2782_v23  ;;  %v2758_v46 = vperm.slane %v2664_v26, %v5228_v21  ;;  %v2764_v26 = vperm.slane %v2682_v7, %v5228_v21 }
 0xc90   : > { %v2784_v5 = vsel %vm406_vm5, %v2754_v34, %v2783_v30  ;;  %v2761_v34 = vperm.slane %v2673_v47, %v5228_v21 }
 0xc91   : > { %v2785_v49 = vsel %vm408_vm6, %v2755_v31, %v2784_v5 }
 0xc94   : > { %v2658_v55 = vpop.xlane.xlu0 %2657 }
 0xc95   : > { %v2756_v42 = vperm.slane %v2658_v55, %v5228_v21  ;;  %v2688_v55 = vpop.xlane.xlu1 %2687 }
 0xc97   : > { %v2786_v41 = vsel %vm410_vm7, %v2756_v42, %v2785_v49  ;;  %v2763_v49 = vperm.slane %v2679_v24, %v5228_v21  ;;  %v2766_v24 = vperm.slane %v2688_v55, %v5228_v21 }
 0xc98   : > { %v2787_v50 = vsel %vm412_vm8, %v2757_v53, %v2786_v41  ;;  %v2691_v53 = vpop.xlane.xlu2 %2690 }
 0xc99   : > { %v2809_v37 = vsel %vm237_vm0, %v2787_v50, -inf }
 0xc9a   : > { %2810 = vmax.xlane.f32.xlu1 %v2809_v37 }
 0xc9c   : > { %v2667_v9 = vpop.xlane.xlu0 %2666 }
 0xc9d   : > { %v2759_v54 = vperm.slane %v2667_v9, %v5228_v21 }
 0xc9f   : > { %v2788_v23 = vsel %vm400_vm2, %v2759_v54, %v2758_v46  ;;  %v2697_v54 = vpop.xlane.xlu1 %2696 }
 0xca0   : > { %v2789_v30 = vsel %vm402_vm3, %v2760_v1, %v2788_v23  ;;  %v2700_v1 = vpop.xlane.xlu2 %2699  ;;  %v2767_v23 = vperm.slane %v2691_v53, %v5228_v21 }
 0xca1   : > { %v2790_v42 = vsel %vm404_vm4, %v2761_v34, %v2789_v30 }
 0xca2   : > { %v2795_v30 = vsel %vm400_vm2, %v2767_v23, %v2766_v24  ;;  %v2836_v24 = vsel %vm467_vm1, %v6912_v28, -inf  ;;  %v2842_v23 = vsel %vm467_vm1, %v6917_v59, -inf  ;;  %v2860_v28 = vsel %vm467_vm1, %v6937_v25, -inf }
 0xca4   : > { %v2676_v31 = vpop.xlane.xlu0 %2675 }
 0xca5   : > { %v2762_v5 = vperm.slane %v2676_v31, %v5228_v21  ;;  %v2769_v31 = vperm.slane %v2697_v54, %v5228_v21 }
 0xca7   : > { %v2791_v41 = vsel %vm406_vm5, %v2762_v5, %v2790_v42  ;;  %v2706_v42 = vpop.xlane.xlu1 %2705 }
 0xca8   : > { %v2792_v62 = vsel %vm408_vm6, %v2763_v49, %v2791_v41  ;;  %v2770_v49 = vperm.slane %v2700_v1, %v5228_v21  ;;  %v2709_v41 = vpop.xlane.xlu2 %2708  ;;  %v2772_v55 = vperm.slane %v2706_v42, %v5228_v21  ;;  %v2833_v1 = vsel %vm467_vm1, %v6907_v0, -inf }
 0xca9   : > { %v2793_v37 = vsel %vm410_vm7, %v2764_v26, %v2792_v62  ;;  %v2854_v0 = vsel %vm467_vm1, %v6932_v17, -inf }
 0xcac   : > { %v2685_v50 = vpop.xlane.xlu0 %2684 }
 0xcad   : > { %v2765_v47 = vperm.slane %v2685_v50, %v5228_v21  ;;  %v2773_v50 = vperm.slane %v2709_v41, %v5228_v21 }
 0xcaf   : > { %v2794_v9 = vsel %vm412_vm8, %v2765_v47, %v2793_v37 }
 0xcb0   : > { %v2812_v46 = vsel %vm237_vm0, %v2794_v9, -inf }
 0xcb1   : > { %2813 = vmax.xlane.f32.xlu2 %v2812_v46 }
 0xcb4   : > { %v2694_v34 = vpop.xlane.xlu0 %2693 }
 0xcb5   : > { %v2768_v7 = vperm.slane %v2694_v34, %v5228_v21  ;;  %v2845_v34 = vsel %vm467_vm1, %v6922_v13, -inf  ;;  %v2863_v13 = vsel %vm467_vm1, %v6942_v52, -inf  ;;  %v2869_v52 = vsel %vm467_vm1, %v6955_v10, -inf }
 0xcb6   : > { %v2848_v10 = vsel %vm467_vm1, %v6980_v16, -inf  ;;  %v2866_v16 = vsel %vm467_vm1, %v7010_v56, -inf  ;;  %v2884_v56 = vsel %vm467_vm1, %v7040_v2, -inf  ;;  %v2920_v2 = vsel %vm467_vm1, %v7070_v11, -inf }
 0xcb7   : > { %v2796_v5 = vsel %vm402_vm3, %v2768_v7, %v2795_v30  ;;  %v2851_v7 = vsel %vm467_vm1, %v6927_v43, -inf }
 0xcb8   : > { %v2797_v26 = vsel %vm404_vm4, %v2769_v31, %v2796_v5 }
 0xcb9   : > { %v2798_v47 = vsel %vm406_vm5, %v2770_v49, %v2797_v26  ;;  %2834 = vmax.xlane.f32.xlu2 %v2833_v1 }
 0xcbc   : > { %v2703_v62 = vpop.xlane.xlu0 %2702 }
 0xcbd   : > { %v2771_v53 = vperm.slane %v2703_v62, %v5228_v21 }
 0xcbf   : > { %v2799_v37 = vsel %vm408_vm6, %v2771_v53, %v2798_v47  ;;  %v2839_v53 = vsel %vm467_vm1, %v6965_v63, -inf  ;;  %v2881_v47 = vsel %vm467_vm1, %v6973_v51, -inf  ;;  %v2857_v63 = vsel %vm467_vm1, %v6995_v48, -inf }
 0xcc0   : > { %v2800_v9 = vsel %vm410_vm7, %v2772_v55, %v2799_v37  ;;  %v2872_v55 = vsel %vm467_vm1, %v6958_v19, -inf  ;;  %v2887_v19 = vsel %vm467_vm1, %v6985_v36, -inf  ;;  %v2890_v37 = vsel %vm467_vm1, %v6988_v8, -inf }
 0xcc1   : > { %v2801_v54 = vsel %vm412_vm8, %v2773_v50, %v2800_v9  ;;  %2843 = vmax.xlane.f32.xlu2 %v2842_v23  ;;  %v2878_v50 = vsel %vm467_vm1, %v6970_v6, -inf  ;;  %v2896_v6 = vsel %vm467_vm1, %v7000_v3, -inf  ;;  %v2899_v51 = vsel %vm467_vm1, %v7003_v57, -inf }
 0xcc2   : > { %v2815_v46 = vsel %vm237_vm0, %v2801_v54, -inf  ;;  %v2905_v36 = vsel %vm467_vm1, %v7015_v29, -inf  ;;  %v2908_v8 = vsel %vm467_vm1, %v7018_v20, -inf  ;;  %v2875_v48 = vsel %vm467_vm1, %v7025_v27, -inf }
 0xcc3   : > { %2816 = vmax.xlane.f32.xlu0 %v2815_v46  ;;  %v2914_v3 = vsel %vm467_vm1, %v7030_v35, -inf  ;;  %v2917_v57 = vsel %vm467_vm1, %v7035_v40, -inf  ;;  %v2923_v29 = vsel %vm467_vm1, %v7045_v44, -inf  ;;  %v2926_v20 = vsel %vm467_vm1, %v7050_v18, -inf }
 0xcc4   : > { %v2893_v27 = vsel %vm467_vm1, %v7055_v15, -inf  ;;  %v2902_v35 = vsel %vm467_vm1, %v7060_v4, -inf  ;;  %v2911_v40 = vsel %vm467_vm1, %v7065_v33, -inf }
 0xcc9   : > { %2852 = vmax.xlane.f32.xlu2 %v2851_v7 }
 0xccb   : > { %2837 = vmax.xlane.f32.xlu0 %v2836_v24 }
 0xcd1   : > { %2861 = vmax.xlane.f32.xlu2 %v2860_v28 }
 0xcd3   : > { %2846 = vmax.xlane.f32.xlu0 %v2845_v34 }
 0xcd9   : > { %2870 = vmax.xlane.f32.xlu2 %v2869_v52 }
 0xcdb   : > { %2855 = vmax.xlane.f32.xlu0 %v2854_v0 }
 0xce1   : > { %2879 = vmax.xlane.f32.xlu2 %v2878_v50 }
 0xce3   : > { %2864 = vmax.xlane.f32.xlu0 %v2863_v13 }
 0xce9   : > { %2888 = vmax.xlane.f32.xlu2 %v2887_v19 }
 0xceb   : > { %2873 = vmax.xlane.f32.xlu0 %v2872_v55 }
 0xcf1   : > { %2897 = vmax.xlane.f32.xlu2 %v2896_v6 }
 0xcf3   : > { %2882 = vmax.xlane.f32.xlu0 %v2881_v47 }
 0xcf6   : > { %v2808_v30 = vpop.xlane.xlu0 %2807 }
 0xcf7   : > { %v2822_v43 = vperm.slane %v2808_v30, %v5228_v21 }
 0xcf9   : > { %2906 = vmax.xlane.f32.xlu2 %v2905_v36 }
 0xcfb   : > { %2891 = vmax.xlane.f32.xlu0 %v2890_v37 }
 0xd01   : > { %2915 = vmax.xlane.f32.xlu2 %v2914_v3 }
 0xd03   : > { %2900 = vmax.xlane.f32.xlu0 %v2899_v51 }
 0xd09   : > { %2924 = vmax.xlane.f32.xlu2 %v2923_v29 }
 0xd0b   : > { %2909 = vmax.xlane.f32.xlu0 %v2908_v8 }
 0xd0d   : > { %v2811_v31 = vpop.xlane.xlu1 %2810 }
 0xd0e   : > { %v2823_v5 = vperm.slane %v2811_v31, %v5228_v21 }
 0xd10   : > { %v2826_v17 = vsel %vm400_vm2, %v2823_v5, %v2822_v43 }
 0xd13   : > { %2918 = vmax.xlane.f32.xlu0 %v2917_v57 }
 0xd1b   : > { %2927 = vmax.xlane.f32.xlu0 %v2926_v20 }
 0xd24   : > { %v2814_v59 = vpop.xlane.xlu2 %2813 }
 0xd25   : > { %v2824_v42 = vperm.slane %v2814_v59, %v5228_v21 }
 0xd27   : > { %v2827_v25 = vsel %vm402_vm3, %v2824_v42, %v2826_v17 }
 0xd2c   : > { %v2835_v44 = vpop.xlane.xlu2 %2834 }
 0xd2d   : > { %v2961_v24 = vperm.slane %v2835_v44, %v5228_v21 }
 0xd34   : > { %v2844_v9 = vpop.xlane.xlu2 %2843 }
 0xd35   : > { %v2964_v0 = vperm.slane %v2844_v9, %v5228_v21 }
 0xd36   : > { %v2817_v49 = vpop.xlane.xlu0 %2816 }
 0xd37   : > { %v2825_v41 = vperm.slane %v2817_v49, %v5228_v21 }
 0xd39   : > { %v2828_v26 = vsel %vm404_vm4, %v2825_v41, %v2827_v25 }
 0xd3a   : > { %v2830_v62 = vsel %vm463_vm9, %v2828_v26, -inf }
 0xd3b   : > { %2831 = vmax.xlane.f32.xlu1 %v2830_v62 }
 0xd3c   : > { %v2853_v46 = vpop.xlane.xlu2 %2852 }
 0xd3d   : > { %v2967_v59 = vperm.slane %v2853_v46, %v5228_v21 }
 0xd3e   : > { %v2838_v18 = vpop.xlane.xlu0 %2837 }
 0xd3f   : > { %v2962_v4 = vperm.slane %v2838_v18, %v5228_v21 }
 0xd41   : > { %v2993_v11 = vsel %vm400_vm2, %v2962_v4, %v2961_v24 }
 0xd43   : > { %2840 = vmax.xlane.f32.xlu1 %v2839_v53 }
 0xd44   : > { %v2862_v23 = vpop.xlane.xlu2 %2861 }
 0xd45   : > { %v2970_v53 = vperm.slane %v2862_v23, %v5228_v21 }
 0xd46   : > { %v2847_v54 = vpop.xlane.xlu0 %2846 }
 0xd47   : > { %v2965_v30 = vperm.slane %v2847_v54, %v5228_v21 }
 0xd4b   : > { %2849 = vmax.xlane.f32.xlu1 %v2848_v10 }
 0xd4c   : > { %v2871_v43 = vpop.xlane.xlu2 %2870 }
 0xd4d   : > { %v2973_v51 = vperm.slane %v2871_v43, %v5228_v21 }
 0xd4e   : > { %v2856_v1 = vpop.xlane.xlu0 %2855 }
 0xd4f   : > { %v2968_v42 = vperm.slane %v2856_v1, %v5228_v21 }
 0xd53   : > { %2858 = vmax.xlane.f32.xlu1 %v2857_v63 }
 0xd54   : > { %v2880_v55 = vpop.xlane.xlu2 %2879 }
 0xd56   : > { %v2865_v33 = vpop.xlane.xlu0 %2864 }
 0xd57   : > { %v2971_v10 = vperm.slane %v2865_v33, %v5228_v21 }
 0xd5b   : > { %2867 = vmax.xlane.f32.xlu1 %v2866_v16 }
 0xd5c   : > { %v2889_v36 = vpop.xlane.xlu2 %2888 }
 0xd5d   : > { %v2979_v46 = vperm.slane %v2889_v36, %v5228_v21 }
 0xd5e   : > { %v2874_v17 = vpop.xlane.xlu0 %2873 }
 0xd5f   : > { %v2974_v8 = vperm.slane %v2874_v17, %v5228_v21 }
 0xd63   : > { %2876 = vmax.xlane.f32.xlu1 %v2875_v48 }
 0xd66   : > { %v2883_v47 = vpop.xlane.xlu0 %2882 }
 0xd67   : > { %v2977_v54 = vperm.slane %v2883_v47, %v5228_v21 }
 0xd6b   : > { %2885 = vmax.xlane.f32.xlu1 %v2884_v56  ;;  %v2976_v56 = vperm.slane %v2880_v55, %v5228_v21 }
 0xd6e   : > { %v2892_v48 = vpop.xlane.xlu0 %2891 }
 0xd6f   : > { %v2980_v24 = vperm.slane %v2892_v48, %v5228_v21 }
 0xd73   : > { %2894 = vmax.xlane.f32.xlu1 %v2893_v27 }
 0xd76   : > { %v2901_v18 = vpop.xlane.xlu0 %2900 }
 0xd7b   : > { %2903 = vmax.xlane.f32.xlu1 %v2902_v35 }
 0xd83   : > { %2912 = vmax.xlane.f32.xlu1 %v2911_v40 }
 0xd8b   : > { %2921 = vmax.xlane.f32.xlu1 %v2920_v2  ;;  %v2898_v2 = vpop.xlane.xlu2 %2897 }
 0xd93   : > { %v2907_v33 = vpop.xlane.xlu2 %2906 }
 0xd9b   : > { %v2916_v43 = vpop.xlane.xlu2 %2915 }
 0xd9c   : > { %v2988_v55 = vperm.slane %v2916_v43, %v5228_v21  ;;  %v7330_v43 = vld [vmem:[%s5036_s26 + $0x1d0] sm:$0xff] }
 0xdae   : > { %v7212_v15 = vpop.xlane.xlu1 %2831 }
 0xdb6   : > { %v2841_v34 = vpop.xlane.xlu1 %2840 }
 0xdb7   : > { %v2963_v7 = vperm.slane %v2841_v34, %v5228_v21 }
 0xdb9   : > { %v2994_v28 = vsel %vm402_vm3, %v2963_v7, %v2993_v11  ;;  %v2910_v7 = vpop.xlane.xlu0 %2909 }
 0xdba   : > { %v2995_v31 = vsel %vm404_vm4, %v2964_v0, %v2994_v28  ;;  %v2982_v0 = vperm.slane %v2898_v2, %v5228_v21 }
 0xdbb   : > { %v2996_v49 = vsel %vm406_vm5, %v2965_v30, %v2995_v31  ;;  %v2983_v30 = vperm.slane %v2901_v18, %v5228_v21 }
 0xdbe   : > { %v2850_v5 = vpop.xlane.xlu1 %2849 }
 0xdbf   : > { %v2966_v13 = vperm.slane %v2850_v5, %v5228_v21 }
 0xdc1   : > { %v2997_v41 = vsel %vm408_vm6, %v2966_v13, %v2996_v49  ;;  %v2919_v17 = vpop.xlane.xlu0 %2918 }
 0xdc2   : > { %v2998_v25 = vsel %vm410_vm7, %v2967_v59, %v2997_v41  ;;  %v2985_v41 = vperm.slane %v2907_v33, %v5228_v21  ;;  %v2989_v47 = vperm.slane %v2919_v17, %v5228_v21  ;;  %v3124_v17 = vsel %vm237_vm0, %v7330_v43, -inf }
 0xdc3   : > { %v2999_v26 = vsel %vm412_vm8, %v2968_v42, %v2998_v25  ;;  %v2986_v25 = vperm.slane %v2910_v7, %v5228_v21 }
 0xdc4   : > { %v3025_v62 = vsel %vm237_vm0, %v2999_v26, -inf }
 0xdc5   : > { %3026 = vmax.xlane.f32.xlu1 %v3025_v62 }
 0xdc6   : > { %v2859_v52 = vpop.xlane.xlu1 %2858 }
 0xdc7   : > { %v2969_v50 = vperm.slane %v2859_v52, %v5228_v21  ;;  %v3014_v52 = vsel %vm400_vm2, %v2986_v25, %v2985_v41  ;;  %v7337_v41 = vld [vmem:[%s5036_s26 + $0xa0] sm:$0xff] }
 0xdc8   : > { %v3091_v25 = vsel %vm237_vm0, %v7337_v41, -inf }
 0xdc9   : > { %v3000_v19 = vsel %vm400_vm2, %v2970_v53, %v2969_v50  ;;  %v2925_v50 = vpop.xlane.xlu2 %2924 }
 0xdca   : > { %v3001_v6 = vsel %vm402_vm3, %v2971_v10, %v3000_v19  ;;  %v2928_v10 = vpop.xlane.xlu0 %2927 }
 0xdce   : > { %v2868_v37 = vpop.xlane.xlu1 %2867 }
 0xdcf   : > { %v2972_v63 = vperm.slane %v2868_v37, %v5228_v21 }
 0xdd1   : > { %v3002_v16 = vsel %vm404_vm4, %v2972_v63, %v3001_v6  ;;  %v2991_v63 = vperm.slane %v2925_v50, %v5228_v21 }
 0xdd2   : > { %v3003_v3 = vsel %vm406_vm5, %v2973_v51, %v3002_v16  ;;  %v2992_v51 = vperm.slane %v2928_v10, %v5228_v21  ;;  %v7360_v10 = vld [vmem:[%s5036_s26 + $0x2b0] sm:$0xff] }
 0xdd3   : > { %v3004_v20 = vsel %vm408_vm6, %v2974_v8, %v3003_v3 }
 0xdd6   : > { %v2877_v57 = vpop.xlane.xlu1 %2876 }
 0xdd7   : > { %v2975_v29 = vperm.slane %v2877_v57, %v5228_v21  ;;  %v7279_v57 = vld [vmem:[%s5036_s26 + $0x80] sm:$0xff] }
 0xdd9   : > { %v3005_v27 = vsel %vm410_vm7, %v2975_v29, %v3004_v20  ;;  %v7284_v29 = vld [vmem:[%s5036_s26 + $0x90] sm:$0xff] }
 0xdda   : > { %v3006_v35 = vsel %vm412_vm8, %v2976_v56, %v3005_v27  ;;  %v3085_v56 = vsel %vm237_vm0, %v7279_v57, -inf  ;;  %v3088_v20 = vsel %vm237_vm0, %v7284_v29, -inf  ;;  %v7289_v27 = vld [vmem:[%s5036_s26 + $0xb0] sm:$0xff] }
 0xddb   : > { %v3028_v40 = vsel %vm237_vm0, %v3006_v35, -inf  ;;  %v3094_v35 = vsel %vm237_vm0, %v7289_v27, -inf }
 0xddc   : > { %3029 = vmax.xlane.f32.xlu2 %v3028_v40  ;;  %v7294_v40 = vld [vmem:[%s5036_s26 + $0xc0] sm:$0xff] }
 0xddd   : > { %v3097_v2 = vsel %vm237_vm0, %v7294_v40, -inf }
 0xdde   : > { %v2886_v44 = vpop.xlane.xlu1 %2885 }
 0xddf   : > { %v2978_v9 = vperm.slane %v2886_v44, %v5228_v21  ;;  %v7299_v44 = vld [vmem:[%s5036_s26 + $0xe0] sm:$0xff] }
 0xde0   : > { %v3103_v18 = vsel %vm237_vm0, %v7299_v44, -inf }
 0xde1   : > { %v3007_v1 = vsel %vm400_vm2, %v2978_v9, %v2977_v54  ;;  %v7304_v9 = vld [vmem:[%s5036_s26 + $0xf0] sm:$0xff] }
 0xde2   : > { %v3008_v4 = vsel %vm402_vm3, %v2979_v46, %v3007_v1  ;;  %v3106_v54 = vsel %vm237_vm0, %v7304_v9, -inf  ;;  %v7309_v46 = vld [vmem:[%s5036_s26 + $0x190] sm:$0xff] }
 0xde3   : > { %v3009_v11 = vsel %vm404_vm4, %v2980_v24, %v3008_v4  ;;  %v3112_v24 = vsel %vm237_vm0, %v7309_v46, -inf }
 0xde6   : > { %v2895_v23 = vpop.xlane.xlu1 %2894 }
 0xde7   : > { %v2981_v34 = vperm.slane %v2895_v23, %v5228_v21 }
 0xde9   : > { %v3010_v28 = vsel %vm406_vm5, %v2981_v34, %v3009_v11  ;;  %v7314_v34 = vld [vmem:[%s5036_s26 + $0x1a0] sm:$0xff] }
 0xdea   : > { %v3011_v31 = vsel %vm408_vm6, %v2982_v0, %v3010_v28  ;;  %v3115_v7 = vsel %vm237_vm0, %v7314_v34, -inf }
 0xdeb   : > { %v3012_v13 = vsel %vm410_vm7, %v2983_v30, %v3011_v31 }
 0xdee   : > { %v2904_v59 = vpop.xlane.xlu1 %2903 }
 0xdef   : > { %v2984_v5 = vperm.slane %v2904_v59, %v5228_v21 }
 0xdf1   : > { %v3013_v42 = vsel %vm412_vm8, %v2984_v5, %v3012_v13 }
 0xdf2   : > { %v3031_v49 = vsel %vm237_vm0, %v3013_v42, -inf  ;;  %v7327_v42 = vld [vmem:[%s5036_s26 + $0x1c0] sm:$0xff] }
 0xdf3   : > { %3032 = vmax.xlane.f32.xlu0 %v3031_v49  ;;  %v3121_v49 = vsel %vm237_vm0, %v7327_v42, -inf }
 0xdf6   : > { %v2913_v26 = vpop.xlane.xlu1 %2912 }
 0xdf7   : > { %v2987_v62 = vperm.slane %v2913_v26, %v5228_v21  ;;  %v7342_v26 = vld [vmem:[%s5036_s26 + $0x1f0] sm:$0xff] }
 0xdf9   : > { %v3015_v53 = vsel %vm402_vm3, %v2987_v62, %v3014_v52  ;;  %v7345_v62 = vld [vmem:[%s5036_s26 + $0x280] sm:$0xff]  ;;  %v3130_v52 = vsel %vm237_vm0, %v7342_v26, -inf }
 0xdfa   : > { %v3016_v19 = vsel %vm404_vm4, %v2988_v55, %v3015_v53  ;;  %v3133_v55 = vsel %vm237_vm0, %v7345_v62, -inf  ;;  %v7352_v53 = vld [vmem:[%s5036_s26 + $0xd0] sm:$0xff] }
 0xdfb   : > { %v3017_v16 = vsel %vm406_vm5, %v2989_v47, %v3016_v19  ;;  %3086 = vmax.xlane.f32.xlu0 %v3085_v56  ;;  %v3100_v50 = vsel %vm237_vm0, %v7352_v53, -inf  ;;  %v7357_v47 = vld [vmem:[%s5036_s26 + $0x2a0] sm:$0xff] }
 0xdfc   : > { %v3139_v19 = vsel %vm237_vm0, %v7357_v47, -inf  ;;  %v7387_v56 = vld [vmem:[%s5036_s26 + $0x380] sm:$0xff] }
 0xdfe   : > { %v2922_v37 = vpop.xlane.xlu1 %2921 }
 0xdff   : > { %v2990_v6 = vperm.slane %v2922_v37, %v5228_v21  ;;  %v3142_v37 = vsel %vm237_vm0, %v7360_v10, -inf }
 0xe01   : > { %v3018_v36 = vsel %vm408_vm6, %v2990_v6, %v3017_v16  ;;  %v7375_v16 = vld [vmem:[%s5036_s26 + $0x2e0] sm:$0xff] }
 0xe02   : > { %v3019_v8 = vsel %vm410_vm7, %v2991_v63, %v3018_v36  ;;  %v7367_v63 = vld [vmem:[%s5036_s26 + $0x180] sm:$0xff] }
 0xe03   : > { %v3020_v48 = vsel %vm412_vm8, %v2992_v51, %v3019_v8  ;;  %3095 = vmax.xlane.f32.xlu0 %v3094_v35  ;;  %v3109_v6 = vsel %vm237_vm0, %v7367_v63, -inf  ;;  %v7372_v51 = vld [vmem:[%s5036_s26 + $0x2d0] sm:$0xff]  ;;  %v3151_v8 = vsel %vm237_vm0, %v7375_v16, -inf  ;;  %v3157_v35 = vsel %vm237_vm0, %v7387_v56, -inf }
 0xe04   : > { %v3034_v3 = vsel %vm237_vm0, %v3020_v48, -inf  ;;  %v3148_v36 = vsel %vm237_vm0, %v7372_v51, -inf  ;;  %v7382_v48 = vld [vmem:[%s5036_s26 + $0x1b0] sm:$0xff] }
 0xe05   : > { %3035 = vmax.xlane.f32.xlu1 %v3034_v3  ;;  %v3118_v3 = vsel %vm237_vm0, %v7382_v48, -inf }
 0xe0b   : > { %3104 = vmax.xlane.f32.xlu0 %v3103_v18  ;;  %v7397_v18 = vld [vmem:[%s5036_s26 + $0x1e0] sm:$0xff] }
 0xe0d   : > { %3089 = vmax.xlane.f32.xlu1 %v3088_v20  ;;  %v7390_v20 = vld [vmem:[%s5036_s26 + $0x390] sm:$0xff] }
 0xe13   : > { %3113 = vmax.xlane.f32.xlu0 %v3112_v24 }
 0xe15   : > { %3098 = vmax.xlane.f32.xlu1 %v3097_v2  ;;  %v3160_v2 = vsel %vm237_vm0, %v7390_v20, -inf }
 0xe1b   : > { %3122 = vmax.xlane.f32.xlu0 %v3121_v49  ;;  %v7437_v49 = vld [vmem:[%s5036_s26 + $0x3a0] sm:$0xff] }
 0xe1d   : > { %3107 = vmax.xlane.f32.xlu1 %v3106_v54  ;;  %v3127_v54 = vsel %vm237_vm0, %v7397_v18, -inf }
 0xe23   : > { %3131 = vmax.xlane.f32.xlu0 %v3130_v52 }
 0xe25   : > { %3116 = vmax.xlane.f32.xlu1 %v3115_v7 }
 0xe2b   : > { %3140 = vmax.xlane.f32.xlu0 %v3139_v19 }
 0xe2d   : > { %3125 = vmax.xlane.f32.xlu1 %v3124_v17  ;;  %v3163_v17 = vsel %vm237_vm0, %v7437_v49, -inf }
 0xe33   : > { %3149 = vmax.xlane.f32.xlu0 %v3148_v36 }
 0xe35   : > { %3134 = vmax.xlane.f32.xlu1 %v3133_v55 }
 0xe38   : > { %v3027_v1 = vpop.xlane.xlu1 %3026 }
 0xe39   : > { %v3041_v0 = vperm.slane %v3027_v1, %v5228_v21  ;;  %v7402_v1 = vld [vmem:[%s5036_s26 + $0x3b0] sm:$0xff] }
 0xe3a   : > { %v3166_v24 = vsel %vm237_vm0, %v7402_v1, -inf }
 0xe3b   : > { %3158 = vmax.xlane.f32.xlu0 %v3157_v35 }
 0xe3d   : > { %3143 = vmax.xlane.f32.xlu1 %v3142_v37 }
 0xe43   : > { %3167 = vmax.xlane.f32.xlu0 %v3166_v24 }
 0xe45   : > { %3152 = vmax.xlane.f32.xlu1 %v3151_v8 }
 0xe4d   : > { %3161 = vmax.xlane.f32.xlu1 %v3160_v2 }
 0xe4f   : > { %v3030_v4 = vpop.xlane.xlu2 %3029 }
 0xe50   : > { %v3042_v33 = vperm.slane %v3030_v4, %v5228_v21  ;;  %v7407_v4 = vld [vmem:[%s5036_s26 + $0x3c0] sm:$0xff] }
 0xe52   : > { %v3045_v30 = vsel %vm400_vm2, %v3042_v33, %v3041_v0  ;;  %v7412_v33 = vld [vmem:[%s5036_s26 + $0x290] sm:$0xff] }
 0xe53   : > { %v3136_v7 = vsel %vm237_vm0, %v7412_v33, -inf }
 0xe66   : > { %v3033_v23 = vpop.xlane.xlu0 %3032 }
 0xe67   : > { %v3043_v11 = vperm.slane %v3033_v23, %v5228_v21  ;;  %v3169_v23 = vsel %vm237_vm0, %v7407_v4, -inf }
 0xe68   : > { %3170 = vmax.xlane.f32.xlu1 %v3169_v23 }
 0xe69   : > { %v3046_v59 = vsel %vm402_vm3, %v3043_v11, %v3045_v30  ;;  %v7417_v11 = vld [vmem:[%s5036_s26 + $0x3e0] sm:$0xff] }
 0xe6a   : > { %v3175_v0 = vsel %vm237_vm0, %v7417_v11, -inf }
 0xe6b   : > { %3176 = vmax.xlane.f32.xlu0 %v3175_v0 }
 0xe6e   : > { %v3087_v55 = vpop.xlane.xlu0 %3086 }
 0xe76   : > { %v3096_v19 = vpop.xlane.xlu0 %3095 }
 0xe77   : > { %v3216_v0 = vperm.slane %v3096_v19, %v5228_v21 }
 0xe78   : > { %v3036_v28 = vpop.xlane.xlu1 %3035 }
 0xe79   : > { %v3044_v31 = vperm.slane %v3036_v28, %v5228_v21  ;;  %v7422_v28 = vld [vmem:[%s5036_s26 + $0x3f0] sm:$0xff] }
 0xe7a   : > { %v3178_v30 = vsel %vm237_vm0, %v7422_v28, -inf }
 0xe7b   : > { %v3047_v5 = vsel %vm404_vm4, %v3044_v31, %v3046_v59  ;;  %v7427_v31 = vld [vmem:[%s5036_s26 + $0x2c0] sm:$0xff]  ;;  %3179 = vmax.xlane.f32.xlu1 %v3178_v30 }
 0xe7c   : > { %v3049_v13 = vsel %vm463_vm9, %v3047_v5, -inf  ;;  %v3145_v59 = vsel %vm237_vm0, %v7427_v31, -inf  ;;  %v7432_v5 = vld [vmem:[%s5036_s26 + $0x2f0] sm:$0xff] }
 0xe7d   : > { %3050 = vmax.xlane.f32.xlu2 %v3049_v13  ;;  %v3154_v13 = vsel %vm237_vm0, %v7432_v5, -inf }
 0xe85   : > { %3092 = vmax.xlane.f32.xlu2 %v3091_v25  ;;  %v7442_v25 = vld [vmem:[%s5036_s26 + $0x3d0] sm:$0xff] }
 0xe86   : > { %v3172_v52 = vsel %vm237_vm0, %v7442_v25, -inf }
 0xe8d   : > { %3101 = vmax.xlane.f32.xlu2 %v3100_v50  ;;  %v3090_v50 = vpop.xlane.xlu1 %3089 }
 0xe8e   : > { %v3214_v35 = vperm.slane %v3090_v50, %v5228_v21 }
 0xe95   : > { %3110 = vmax.xlane.f32.xlu2 %v3109_v6  ;;  %v3099_v37 = vpop.xlane.xlu1 %3098  ;;  %v3105_v6 = vpop.xlane.xlu0 %3104 }
 0xe9d   : > { %3119 = vmax.xlane.f32.xlu2 %v3118_v3  ;;  %v3108_v36 = vpop.xlane.xlu1 %3107  ;;  %v3213_v3 = vperm.slane %v3087_v55, %v5228_v21  ;;  %v3114_v2 = vpop.xlane.xlu0 %3113 }
 0xe9e   : > { %v3220_v50 = vperm.slane %v3108_v36, %v5228_v21 }
 0xea5   : > { %3128 = vmax.xlane.f32.xlu2 %v3127_v54  ;;  %v3117_v24 = vpop.xlane.xlu1 %3116  ;;  %v3123_v38 = vpop.xlane.xlu0 %3122 }
 0xead   : > { %3137 = vmax.xlane.f32.xlu2 %v3136_v7  ;;  %v3245_v7 = vsel %vm400_vm2, %v3214_v35, %v3213_v3  ;;  %v3126_v45 = vpop.xlane.xlu1 %3125 }
 0xeb5   : > { %3146 = vmax.xlane.f32.xlu2 %v3145_v59  ;;  %v3217_v59 = vperm.slane %v3099_v37, %v5228_v21  ;;  %v3135_v36 = vpop.xlane.xlu1 %3134 }
 0xebd   : > { %3155 = vmax.xlane.f32.xlu2 %v3154_v13 }
 0xec5   : > { %3164 = vmax.xlane.f32.xlu2 %v3163_v17 }
 0xecd   : > { %3173 = vmax.xlane.f32.xlu2 %v3172_v52  ;;  %v3219_v52 = vperm.slane %v3105_v6, %v5228_v21 }
 0xef0   : > { %v7446_v8 = vpop.xlane.xlu2 %3050 }
 0xef8   : > { %v3093_v54 = vpop.xlane.xlu2 %3092 }
 0xef9   : > { %v3215_v23 = vperm.slane %v3093_v54, %v5228_v21 }
 0xefb   : > { %v3246_v30 = vsel %vm402_vm3, %v3215_v23, %v3245_v7  ;;  %v3132_v7 = vpop.xlane.xlu0 %3131 }
 0xefc   : > { %v3247_v13 = vsel %vm404_vm4, %v3216_v0, %v3246_v30  ;;  %v3222_v0 = vperm.slane %v3114_v2, %v5228_v21  ;;  %v3223_v30 = vperm.slane %v3117_v24, %v5228_v21  ;;  %v3228_v24 = vperm.slane %v3132_v7, %v5228_v21 }
 0xefd   : > { %v3248_v54 = vsel %vm406_vm5, %v3217_v59, %v3247_v13 }
 0xf00   : > { %v3102_v17 = vpop.xlane.xlu2 %3101 }
 0xf01   : > { %v3218_v55 = vperm.slane %v3102_v17, %v5228_v21 }
 0xf03   : > { %v3249_v3 = vsel %vm408_vm6, %v3218_v55, %v3248_v54  ;;  %v3225_v55 = vperm.slane %v3123_v38, %v5228_v21  ;;  %v3141_v54 = vpop.xlane.xlu0 %3140 }
 0xf04   : > { %v3250_v19 = vsel %vm410_vm7, %v3219_v52, %v3249_v3  ;;  %v3226_v3 = vperm.slane %v3126_v45, %v5228_v21  ;;  %v3231_v7 = vperm.slane %v3141_v54, %v5228_v21 }
 0xf05   : > { %v3251_v35 = vsel %vm412_vm8, %v3220_v50, %v3250_v19  ;;  %v3144_v19 = vpop.xlane.xlu1 %3143 }
 0xf06   : > { %v3277_v37 = vsel %vm237_vm0, %v3251_v35, -inf }
 0xf07   : > { %3278 = vmax.xlane.f32.xlu2 %v3277_v37 }
 0xf08   : > { %v3111_v23 = vpop.xlane.xlu2 %3110 }
 0xf09   : > { %v3221_v6 = vperm.slane %v3111_v23, %v5228_v21 }
 0xf0b   : > { %v3252_v59 = vsel %vm400_vm2, %v3222_v0, %v3221_v6 }
 0xf0c   : > { %v3253_v52 = vsel %vm402_vm3, %v3223_v30, %v3252_v59  ;;  %v3150_v30 = vpop.xlane.xlu0 %3149 }
 0xf0d   : > { %v3153_v45 = vpop.xlane.xlu1 %3152 }
 0xf10   : > { %v3120_v13 = vpop.xlane.xlu2 %3119 }
 0xf11   : > { %v3224_v17 = vperm.slane %v3120_v13, %v5228_v21 }
 0xf13   : > { %v3254_v50 = vsel %vm404_vm4, %v3224_v17, %v3253_v52  ;;  %v3229_v17 = vperm.slane %v3135_v36, %v5228_v21  ;;  %v3235_v36 = vperm.slane %v3153_v45, %v5228_v21 }
 0xf14   : > { %v3255_v2 = vsel %vm406_vm5, %v3225_v55, %v3254_v50  ;;  %v3232_v55 = vperm.slane %v3144_v19, %v5228_v21 }
 0xf15   : > { %v3256_v23 = vsel %vm408_vm6, %v3226_v3, %v3255_v2 }
 0xf18   : > { %v3129_v35 = vpop.xlane.xlu2 %3128 }
 0xf19   : > { %v3227_v37 = vperm.slane %v3129_v35, %v5228_v21  ;;  %v3159_v35 = vpop.xlane.xlu0 %3158 }
 0xf1b   : > { %v3257_v6 = vsel %vm410_vm7, %v3227_v37, %v3256_v23  ;;  %v3234_v23 = vperm.slane %v3150_v30, %v5228_v21 }
 0xf1c   : > { %v3258_v0 = vsel %vm412_vm8, %v3228_v24, %v3257_v6  ;;  %v3162_v24 = vpop.xlane.xlu1 %3161 }
 0xf1d   : > { %v3280_v38 = vsel %vm237_vm0, %v3258_v0, -inf  ;;  %v3238_v30 = vperm.slane %v3162_v24, %v5228_v21 }
 0xf1e   : > { %3281 = vmax.xlane.f32.xlu0 %v3280_v38 }
 0xf20   : > { %v3138_v59 = vpop.xlane.xlu2 %3137 }
 0xf21   : > { %v3230_v13 = vperm.slane %v3138_v59, %v5228_v21 }
 0xf23   : > { %v3259_v52 = vsel %vm400_vm2, %v3230_v13, %v3229_v17  ;;  %v3168_v13 = vpop.xlane.xlu0 %3167 }
 0xf24   : > { %v3260_v50 = vsel %vm402_vm3, %v3231_v7, %v3259_v52  ;;  %v3171_v7 = vpop.xlane.xlu1 %3170  ;;  %v3237_v52 = vperm.slane %v3159_v35, %v5228_v21 }
 0xf25   : > { %v3261_v37 = vsel %vm404_vm4, %v3232_v55, %v3260_v50 }
 0xf26   : > { %v3266_v50 = vsel %vm400_vm2, %v3238_v30, %v3237_v52  ;;  %v3307_v30 = vsel %vm467_vm1, %v7284_v29, -inf  ;;  %v3313_v52 = vsel %vm467_vm1, %v7289_v27, -inf  ;;  %v3331_v29 = vsel %vm467_vm1, %v7309_v46, -inf }
 0xf28   : > { %v3147_v3 = vpop.xlane.xlu2 %3146 }
 0xf29   : > { %v3233_v2 = vperm.slane %v3147_v3, %v5228_v21  ;;  %v3240_v3 = vperm.slane %v3168_v13, %v5228_v21 }
 0xf2b   : > { %v3262_v6 = vsel %vm406_vm5, %v3233_v2, %v3261_v37  ;;  %v3177_v37 = vpop.xlane.xlu0 %3176 }
 0xf2c   : > { %v3263_v54 = vsel %vm408_vm6, %v3234_v23, %v3262_v6  ;;  %v3241_v23 = vperm.slane %v3171_v7, %v5228_v21  ;;  %v3180_v6 = vpop.xlane.xlu1 %3179  ;;  %v3243_v24 = vperm.slane %v3177_v37, %v5228_v21  ;;  %v3304_v7 = vsel %vm467_vm1, %v7279_v57, -inf }
 0xf2d   : > { %v3264_v38 = vsel %vm410_vm7, %v3235_v36, %v3263_v54  ;;  %v3325_v57 = vsel %vm467_vm1, %v7304_v9, -inf }
 0xf30   : > { %v3156_v0 = vpop.xlane.xlu2 %3155 }
 0xf31   : > { %v3236_v19 = vperm.slane %v3156_v0, %v5228_v21  ;;  %v3244_v0 = vperm.slane %v3180_v6, %v5228_v21 }
 0xf33   : > { %v3265_v59 = vsel %vm412_vm8, %v3236_v19, %v3264_v38 }
 0xf34   : > { %v3283_v17 = vsel %vm237_vm0, %v3265_v59, -inf }
 0xf35   : > { %3284 = vmax.xlane.f32.xlu1 %v3283_v17 }
 0xf38   : > { %v3165_v55 = vpop.xlane.xlu2 %3164 }
 0xf39   : > { %v3239_v45 = vperm.slane %v3165_v55, %v5228_v21  ;;  %v3316_v55 = vsel %vm467_vm1, %v7294_v40, -inf  ;;  %v3334_v40 = vsel %vm467_vm1, %v7314_v34, -inf  ;;  %v3340_v34 = vsel %vm467_vm1, %v7327_v42, -inf }
 0xf3a   : > { %v3319_v42 = vsel %vm467_vm1, %v7352_v53, -inf  ;;  %v3337_v53 = vsel %vm467_vm1, %v7382_v48, -inf  ;;  %v3355_v48 = vsel %vm467_vm1, %v7412_v33, -inf  ;;  %v3391_v33 = vsel %vm467_vm1, %v7442_v25, -inf }
 0xf3b   : > { %v3267_v2 = vsel %vm402_vm3, %v3239_v45, %v3266_v50  ;;  %v3322_v45 = vsel %vm467_vm1, %v7299_v44, -inf }
 0xf3c   : > { %v3268_v36 = vsel %vm404_vm4, %v3240_v3, %v3267_v2 }
 0xf3d   : > { %v3269_v19 = vsel %vm406_vm5, %v3241_v23, %v3268_v36  ;;  %3305 = vmax.xlane.f32.xlu1 %v3304_v7 }
 0xf40   : > { %v3174_v54 = vpop.xlane.xlu2 %3173 }
 0xf41   : > { %v3242_v35 = vperm.slane %v3174_v54, %v5228_v21 }
 0xf43   : > { %v3270_v38 = vsel %vm408_vm6, %v3242_v35, %v3269_v19  ;;  %v3310_v35 = vsel %vm467_vm1, %v7337_v41, -inf  ;;  %v3352_v19 = vsel %vm467_vm1, %v7345_v62, -inf  ;;  %v3328_v41 = vsel %vm467_vm1, %v7367_v63, -inf }
 0xf44   : > { %v3271_v59 = vsel %vm410_vm7, %v3243_v24, %v3270_v38  ;;  %v3343_v24 = vsel %vm467_vm1, %v7330_v43, -inf  ;;  %v3358_v43 = vsel %vm467_vm1, %v7357_v47, -inf  ;;  %v3361_v38 = vsel %vm467_vm1, %v7360_v10, -inf }
 0xf45   : > { %v3272_v13 = vsel %vm412_vm8, %v3244_v0, %v3271_v59  ;;  %3314 = vmax.xlane.f32.xlu1 %v3313_v52  ;;  %v3349_v0 = vsel %vm467_vm1, %v7342_v26, -inf  ;;  %v3367_v26 = vsel %vm467_vm1, %v7372_v51, -inf  ;;  %v3370_v62 = vsel %vm467_vm1, %v7375_v16, -inf }
 0xf46   : > { %v3286_v17 = vsel %vm237_vm0, %v3272_v13, -inf  ;;  %v3376_v47 = vsel %vm467_vm1, %v7387_v56, -inf  ;;  %v3379_v10 = vsel %vm467_vm1, %v7390_v20, -inf  ;;  %v3346_v63 = vsel %vm467_vm1, %v7397_v18, -inf }
 0xf47   : > { %3287 = vmax.xlane.f32.xlu2 %v3286_v17  ;;  %v3385_v51 = vsel %vm467_vm1, %v7402_v1, -inf  ;;  %v3388_v16 = vsel %vm467_vm1, %v7407_v4, -inf  ;;  %v3394_v56 = vsel %vm467_vm1, %v7417_v11, -inf  ;;  %v3397_v20 = vsel %vm467_vm1, %v7422_v28, -inf }
 0xf48   : > { %v3364_v18 = vsel %vm467_vm1, %v7427_v31, -inf  ;;  %v3373_v1 = vsel %vm467_vm1, %v7432_v5, -inf  ;;  %v3382_v4 = vsel %vm467_vm1, %v7437_v49, -inf }
 0xf4d   : > { %3323 = vmax.xlane.f32.xlu1 %v3322_v45 }
 0xf4f   : > { %3308 = vmax.xlane.f32.xlu2 %v3307_v30 }
 0xf55   : > { %3332 = vmax.xlane.f32.xlu1 %v3331_v29 }
 0xf57   : > { %3317 = vmax.xlane.f32.xlu2 %v3316_v55 }
 0xf5d   : > { %3341 = vmax.xlane.f32.xlu1 %v3340_v34 }
 0xf5f   : > { %3326 = vmax.xlane.f32.xlu2 %v3325_v57 }
 0xf65   : > { %3350 = vmax.xlane.f32.xlu1 %v3349_v0 }
 0xf67   : > { %3335 = vmax.xlane.f32.xlu2 %v3334_v40 }
 0xf6d   : > { %3359 = vmax.xlane.f32.xlu1 %v3358_v43 }
 0xf6f   : > { %3344 = vmax.xlane.f32.xlu2 %v3343_v24 }
 0xf75   : > { %3368 = vmax.xlane.f32.xlu1 %v3367_v26 }
 0xf77   : > { %3353 = vmax.xlane.f32.xlu2 %v3352_v19 }
 0xf7a   : > { %v3279_v50 = vpop.xlane.xlu2 %3278 }
 0xf7b   : > { %v3293_v44 = vperm.slane %v3279_v50, %v5228_v21 }
 0xf7d   : > { %3377 = vmax.xlane.f32.xlu1 %v3376_v47 }
 0xf7f   : > { %3362 = vmax.xlane.f32.xlu2 %v3361_v38 }
 0xf85   : > { %3386 = vmax.xlane.f32.xlu1 %v3385_v51 }
 0xf87   : > { %3371 = vmax.xlane.f32.xlu2 %v3370_v62 }
 0xf8d   : > { %3395 = vmax.xlane.f32.xlu1 %v3394_v56 }
 0xf8f   : > { %3380 = vmax.xlane.f32.xlu2 %v3379_v10 }
 0xf91   : > { %v3282_v3 = vpop.xlane.xlu0 %3281 }
 0xf92   : > { %v3294_v2 = vperm.slane %v3282_v3, %v5228_v21 }
 0xf94   : > { %v3297_v9 = vsel %vm400_vm2, %v3294_v2, %v3293_v44 }
 0xf97   : > { %3389 = vmax.xlane.f32.xlu2 %v3388_v16 }
 0xf9f   : > { %3398 = vmax.xlane.f32.xlu2 %v3397_v20 }
 0xfa8   : > { %v3285_v27 = vpop.xlane.xlu1 %3284 }
 0xfa9   : > { %v3295_v37 = vperm.slane %v3285_v27, %v5228_v21 }
 0xfab   : > { %v3298_v46 = vsel %vm402_vm3, %v3295_v37, %v3297_v9 }
 0xfb0   : > { %v3306_v11 = vpop.xlane.xlu1 %3305 }
 0xfb1   : > { %v3432_v30 = vperm.slane %v3306_v11, %v5228_v21 }
 0xfb8   : > { %v3315_v59 = vpop.xlane.xlu1 %3314 }
 0xfb9   : > { %v3435_v57 = vperm.slane %v3315_v59, %v5228_v21 }
 0xfba   : > { %v3288_v23 = vpop.xlane.xlu2 %3287 }
 0xfbb   : > { %v3296_v6 = vperm.slane %v3288_v23, %v5228_v21 }
 0xfbd   : > { %v3299_v36 = vsel %vm404_vm4, %v3296_v6, %v3298_v46 }
 0xfbe   : > { %v3301_v54 = vsel %vm463_vm9, %v3299_v36, -inf }
 0xfbf   : > { %3302 = vmax.xlane.f32.xlu0 %v3301_v54 }
 0xfc0   : > { %v3324_v17 = vpop.xlane.xlu1 %3323 }
 0xfc1   : > { %v3438_v27 = vperm.slane %v3324_v17, %v5228_v21 }
 0xfc2   : > { %v3309_v28 = vpop.xlane.xlu2 %3308 }
 0xfc3   : > { %v3433_v5 = vperm.slane %v3309_v28, %v5228_v21 }
 0xfc5   : > { %v3464_v25 = vsel %vm400_vm2, %v3433_v5, %v3432_v30 }
 0xfc7   : > { %3311 = vmax.xlane.f32.xlu0 %v3310_v35 }
 0xfc8   : > { %v3333_v52 = vpop.xlane.xlu1 %3332 }
 0xfc9   : > { %v3441_v35 = vperm.slane %v3333_v52, %v5228_v21 }
 0xfca   : > { %v3318_v13 = vpop.xlane.xlu2 %3317 }
 0xfcb   : > { %v3436_v50 = vperm.slane %v3318_v13, %v5228_v21 }
 0xfcf   : > { %3320 = vmax.xlane.f32.xlu0 %v3319_v42 }
 0xfd0   : > { %v3342_v44 = vpop.xlane.xlu1 %3341 }
 0xfd1   : > { %v3444_v62 = vperm.slane %v3342_v44, %v5228_v21 }
 0xfd2   : > { %v3327_v7 = vpop.xlane.xlu2 %3326 }
 0xfd3   : > { %v3439_v37 = vperm.slane %v3327_v7, %v5228_v21 }
 0xfd7   : > { %3329 = vmax.xlane.f32.xlu0 %v3328_v41 }
 0xfd8   : > { %v3351_v24 = vpop.xlane.xlu1 %3350 }
 0xfda   : > { %v3336_v49 = vpop.xlane.xlu2 %3335 }
 0xfdb   : > { %v3442_v42 = vperm.slane %v3336_v49, %v5228_v21 }
 0xfdf   : > { %3338 = vmax.xlane.f32.xlu0 %v3337_v53 }
 0xfe0   : > { %v3360_v47 = vpop.xlane.xlu1 %3359 }
 0xfe1   : > { %v3450_v17 = vperm.slane %v3360_v47, %v5228_v21 }
 0xfe2   : > { %v3345_v9 = vpop.xlane.xlu2 %3344 }
 0xfe3   : > { %v3445_v10 = vperm.slane %v3345_v9, %v5228_v21 }
 0xfe7   : > { %3347 = vmax.xlane.f32.xlu0 %v3346_v63 }
 0xfea   : > { %v3354_v19 = vpop.xlane.xlu2 %3353 }
 0xfeb   : > { %v3448_v13 = vperm.slane %v3354_v19, %v5228_v21 }
 0xfef   : > { %3356 = vmax.xlane.f32.xlu0 %v3355_v48  ;;  %v3447_v48 = vperm.slane %v3351_v24, %v5228_v21 }
 0xff2   : > { %v3363_v63 = vpop.xlane.xlu2 %3362 }
 0xff3   : > { %v3451_v30 = vperm.slane %v3363_v63, %v5228_v21 }
 0xff7   : > { %3365 = vmax.xlane.f32.xlu0 %v3364_v18 }
 0xffa   : > { %v3372_v28 = vpop.xlane.xlu2 %3371 }
 0xfff   : > { %3374 = vmax.xlane.f32.xlu0 %v3373_v1 }
0x1007   : > { %3383 = vmax.xlane.f32.xlu0 %v3382_v4 }
0x100f   : > { %3392 = vmax.xlane.f32.xlu0 %v3391_v33  ;;  %v3369_v33 = vpop.xlane.xlu1 %3368 }
0x1017   : > { %v3378_v49 = vpop.xlane.xlu1 %3377 }
0x101f   : > { %v3387_v44 = vpop.xlane.xlu1 %3386 }
0x1020   : > { %v3459_v24 = vperm.slane %v3387_v44, %v5228_v21  ;;  %v7702_v44 = vld [vmem:[%s5036_s26 + $0x1d8] sm:$0xff] }
0x1032   : > { %v7584_v31 = vpop.xlane.xlu0 %3302 }
0x103a   : > { %v3312_v55 = vpop.xlane.xlu0 %3311 }
0x103b   : > { %v3434_v45 = vperm.slane %v3312_v55, %v5228_v21 }
0x103d   : > { %v3465_v29 = vsel %vm402_vm3, %v3434_v45, %v3464_v25  ;;  %v3381_v45 = vpop.xlane.xlu2 %3380 }
0x103e   : > { %v3466_v3 = vsel %vm404_vm4, %v3435_v57, %v3465_v29  ;;  %v3453_v57 = vperm.slane %v3369_v33, %v5228_v21 }
0x103f   : > { %v3467_v23 = vsel %vm406_vm5, %v3436_v50, %v3466_v3  ;;  %v3454_v50 = vperm.slane %v3372_v28, %v5228_v21 }
0x1042   : > { %v3321_v2 = vpop.xlane.xlu0 %3320 }
0x1043   : > { %v3437_v40 = vperm.slane %v3321_v2, %v5228_v21 }
0x1045   : > { %v3468_v6 = vsel %vm408_vm6, %v3437_v40, %v3467_v23  ;;  %v3390_v9 = vpop.xlane.xlu2 %3389 }
0x1046   : > { %v3469_v46 = vsel %vm410_vm7, %v3438_v27, %v3468_v6  ;;  %v3456_v6 = vperm.slane %v3378_v49, %v5228_v21  ;;  %v3460_v19 = vperm.slane %v3390_v9, %v5228_v21  ;;  %v3594_v9 = vsel %vm237_vm0, %v7702_v44, -inf }
0x1047   : > { %v3470_v36 = vsel %vm412_vm8, %v3439_v37, %v3469_v46  ;;  %v3457_v46 = vperm.slane %v3381_v45, %v5228_v21 }
0x1048   : > { %v3496_v54 = vsel %vm237_vm0, %v3470_v36, -inf }
0x1049   : > { %3497 = vmax.xlane.f32.xlu0 %v3496_v54 }
0x104a   : > { %v3330_v34 = vpop.xlane.xlu0 %3329 }
0x104b   : > { %v3440_v0 = vperm.slane %v3330_v34, %v5228_v21  ;;  %v3485_v34 = vsel %vm400_vm2, %v3457_v46, %v3456_v6  ;;  %v7709_v6 = vld [vmem:[%s5036_s26 + $0xa8] sm:$0xff] }
0x104c   : > { %v3561_v46 = vsel %vm237_vm0, %v7709_v6, -inf }
0x104d   : > { %v3471_v43 = vsel %vm400_vm2, %v3441_v35, %v3440_v0  ;;  %v3396_v0 = vpop.xlane.xlu1 %3395 }
0x104e   : > { %v3472_v26 = vsel %vm402_vm3, %v3442_v42, %v3471_v43  ;;  %v3399_v42 = vpop.xlane.xlu2 %3398 }
0x1052   : > { %v3339_v38 = vpop.xlane.xlu0 %3338 }
0x1053   : > { %v3443_v41 = vperm.slane %v3339_v38, %v5228_v21 }
0x1055   : > { %v3473_v53 = vsel %vm404_vm4, %v3443_v41, %v3472_v26  ;;  %v3462_v41 = vperm.slane %v3396_v0, %v5228_v21 }
0x1056   : > { %v3474_v51 = vsel %vm406_vm5, %v3444_v62, %v3473_v53  ;;  %v3463_v62 = vperm.slane %v3399_v42, %v5228_v21  ;;  %v7732_v42 = vld [vmem:[%s5036_s26 + $0x2b8] sm:$0xff] }
0x1057   : > { %v3475_v20 = vsel %vm408_vm6, %v3445_v10, %v3474_v51 }
0x105a   : > { %v3348_v16 = vpop.xlane.xlu0 %3347 }
0x105b   : > { %v3446_v56 = vperm.slane %v3348_v16, %v5228_v21  ;;  %v7651_v16 = vld [vmem:[%s5036_s26 + $0x88] sm:$0xff] }
0x105d   : > { %v3476_v18 = vsel %vm410_vm7, %v3446_v56, %v3475_v20  ;;  %v7656_v56 = vld [vmem:[%s5036_s26 + $0x98] sm:$0xff] }
0x105e   : > { %v3477_v1 = vsel %vm412_vm8, %v3447_v48, %v3476_v18  ;;  %v3555_v48 = vsel %vm237_vm0, %v7651_v16, -inf  ;;  %v3558_v20 = vsel %vm237_vm0, %v7656_v56, -inf  ;;  %v7661_v18 = vld [vmem:[%s5036_s26 + $0xb8] sm:$0xff] }
0x105f   : > { %v3499_v4 = vsel %vm237_vm0, %v3477_v1, -inf  ;;  %v3564_v1 = vsel %vm237_vm0, %v7661_v18, -inf }
0x1060   : > { %3500 = vmax.xlane.f32.xlu1 %v3499_v4  ;;  %v7666_v4 = vld [vmem:[%s5036_s26 + $0xc8] sm:$0xff] }
0x1061   : > { %v3567_v33 = vsel %vm237_vm0, %v7666_v4, -inf }
0x1062   : > { %v3357_v11 = vpop.xlane.xlu0 %3356 }
0x1063   : > { %v3449_v59 = vperm.slane %v3357_v11, %v5228_v21  ;;  %v7671_v11 = vld [vmem:[%s5036_s26 + $0xe8] sm:$0xff] }
0x1064   : > { %v3573_v28 = vsel %vm237_vm0, %v7671_v11, -inf }
0x1065   : > { %v3478_v7 = vsel %vm400_vm2, %v3449_v59, %v3448_v13  ;;  %v7676_v59 = vld [vmem:[%s5036_s26 + $0xf8] sm:$0xff] }
0x1066   : > { %v3479_v5 = vsel %vm402_vm3, %v3450_v17, %v3478_v7  ;;  %v3576_v13 = vsel %vm237_vm0, %v7676_v59, -inf  ;;  %v7681_v17 = vld [vmem:[%s5036_s26 + $0x198] sm:$0xff] }
0x1067   : > { %v3480_v25 = vsel %vm404_vm4, %v3451_v30, %v3479_v5  ;;  %v3582_v30 = vsel %vm237_vm0, %v7681_v17, -inf }
0x106a   : > { %v3366_v52 = vpop.xlane.xlu0 %3365 }
0x106b   : > { %v3452_v55 = vperm.slane %v3366_v52, %v5228_v21 }
0x106d   : > { %v3481_v29 = vsel %vm406_vm5, %v3452_v55, %v3480_v25  ;;  %v7686_v55 = vld [vmem:[%s5036_s26 + $0x1a8] sm:$0xff] }
0x106e   : > { %v3482_v3 = vsel %vm408_vm6, %v3453_v57, %v3481_v29  ;;  %v3585_v45 = vsel %vm237_vm0, %v7686_v55, -inf }
0x106f   : > { %v3483_v40 = vsel %vm410_vm7, %v3454_v50, %v3482_v3 }
0x1072   : > { %v3375_v27 = vpop.xlane.xlu0 %3374 }
0x1073   : > { %v3455_v2 = vperm.slane %v3375_v27, %v5228_v21 }
0x1075   : > { %v3484_v37 = vsel %vm412_vm8, %v3455_v2, %v3483_v40 }
0x1076   : > { %v3502_v23 = vsel %vm237_vm0, %v3484_v37, -inf  ;;  %v7699_v37 = vld [vmem:[%s5036_s26 + $0x1c8] sm:$0xff] }
0x1077   : > { %3503 = vmax.xlane.f32.xlu2 %v3502_v23  ;;  %v3591_v23 = vsel %vm237_vm0, %v7699_v37, -inf }
0x107a   : > { %v3384_v36 = vpop.xlane.xlu0 %3383 }
0x107b   : > { %v3458_v54 = vperm.slane %v3384_v36, %v5228_v21  ;;  %v7714_v36 = vld [vmem:[%s5036_s26 + $0x1f8] sm:$0xff] }
0x107d   : > { %v3486_v35 = vsel %vm402_vm3, %v3458_v54, %v3485_v34  ;;  %v7717_v54 = vld [vmem:[%s5036_s26 + $0x288] sm:$0xff]  ;;  %v3600_v34 = vsel %vm237_vm0, %v7714_v36, -inf }
0x107e   : > { %v3487_v43 = vsel %vm404_vm4, %v3459_v24, %v3486_v35  ;;  %v3603_v24 = vsel %vm237_vm0, %v7717_v54, -inf  ;;  %v7724_v35 = vld [vmem:[%s5036_s26 + $0xd8] sm:$0xff] }
0x107f   : > { %v3488_v53 = vsel %vm406_vm5, %v3460_v19, %v3487_v43  ;;  %3556 = vmax.xlane.f32.xlu2 %v3555_v48  ;;  %v3570_v0 = vsel %vm237_vm0, %v7724_v35, -inf  ;;  %v7729_v19 = vld [vmem:[%s5036_s26 + $0x2a8] sm:$0xff] }
0x1080   : > { %v3609_v43 = vsel %vm237_vm0, %v7729_v19, -inf  ;;  %v7759_v48 = vld [vmem:[%s5036_s26 + $0x388] sm:$0xff] }
0x1082   : > { %v3393_v38 = vpop.xlane.xlu0 %3392 }
0x1083   : > { %v3461_v26 = vperm.slane %v3393_v38, %v5228_v21  ;;  %v3612_v38 = vsel %vm237_vm0, %v7732_v42, -inf }
0x1085   : > { %v3489_v47 = vsel %vm408_vm6, %v3461_v26, %v3488_v53  ;;  %v7747_v53 = vld [vmem:[%s5036_s26 + $0x2e8] sm:$0xff] }
0x1086   : > { %v3490_v10 = vsel %vm410_vm7, %v3462_v41, %v3489_v47  ;;  %v7739_v41 = vld [vmem:[%s5036_s26 + $0x188] sm:$0xff] }
0x1087   : > { %v3491_v63 = vsel %vm412_vm8, %v3463_v62, %v3490_v10  ;;  %3565 = vmax.xlane.f32.xlu2 %v3564_v1  ;;  %v3579_v26 = vsel %vm237_vm0, %v7739_v41, -inf  ;;  %v7744_v62 = vld [vmem:[%s5036_s26 + $0x2d8] sm:$0xff]  ;;  %v3621_v10 = vsel %vm237_vm0, %v7747_v53, -inf  ;;  %v3627_v1 = vsel %vm237_vm0, %v7759_v48, -inf }
0x1088   : > { %v3505_v51 = vsel %vm237_vm0, %v3491_v63, -inf  ;;  %v3618_v47 = vsel %vm237_vm0, %v7744_v62, -inf  ;;  %v7754_v63 = vld [vmem:[%s5036_s26 + $0x1b8] sm:$0xff] }
0x1089   : > { %3506 = vmax.xlane.f32.xlu0 %v3505_v51  ;;  %v3588_v51 = vsel %vm237_vm0, %v7754_v63, -inf }
0x108f   : > { %3574 = vmax.xlane.f32.xlu2 %v3573_v28  ;;  %v7769_v28 = vld [vmem:[%s5036_s26 + $0x1e8] sm:$0xff] }
0x1091   : > { %3559 = vmax.xlane.f32.xlu0 %v3558_v20  ;;  %v7762_v20 = vld [vmem:[%s5036_s26 + $0x398] sm:$0xff] }
0x1097   : > { %3583 = vmax.xlane.f32.xlu2 %v3582_v30 }
0x1099   : > { %3568 = vmax.xlane.f32.xlu0 %v3567_v33  ;;  %v3630_v33 = vsel %vm237_vm0, %v7762_v20, -inf }
0x109f   : > { %3592 = vmax.xlane.f32.xlu2 %v3591_v23  ;;  %v7809_v23 = vld [vmem:[%s5036_s26 + $0x3a8] sm:$0xff] }
0x10a1   : > { %3577 = vmax.xlane.f32.xlu0 %v3576_v13  ;;  %v3597_v13 = vsel %vm237_vm0, %v7769_v28, -inf }
0x10a7   : > { %3601 = vmax.xlane.f32.xlu2 %v3600_v34 }
0x10a9   : > { %3586 = vmax.xlane.f32.xlu0 %v3585_v45 }
0x10af   : > { %3610 = vmax.xlane.f32.xlu2 %v3609_v43 }
0x10b1   : > { %3595 = vmax.xlane.f32.xlu0 %v3594_v9  ;;  %v3633_v9 = vsel %vm237_vm0, %v7809_v23, -inf }
0x10b7   : > { %3619 = vmax.xlane.f32.xlu2 %v3618_v47 }
0x10b9   : > { %3604 = vmax.xlane.f32.xlu0 %v3603_v24 }
0x10bc   : > { %v3498_v7 = vpop.xlane.xlu0 %3497 }
0x10bd   : > { %v3512_v57 = vperm.slane %v3498_v7, %v5228_v21  ;;  %v7774_v7 = vld [vmem:[%s5036_s26 + $0x3b8] sm:$0xff] }
0x10be   : > { %v3636_v30 = vsel %vm237_vm0, %v7774_v7, -inf }
0x10bf   : > { %3628 = vmax.xlane.f32.xlu2 %v3627_v1 }
0x10c1   : > { %3613 = vmax.xlane.f32.xlu0 %v3612_v38 }
0x10c7   : > { %3637 = vmax.xlane.f32.xlu2 %v3636_v30 }
0x10c9   : > { %3622 = vmax.xlane.f32.xlu0 %v3621_v10 }
0x10d1   : > { %3631 = vmax.xlane.f32.xlu0 %v3630_v33 }
0x10d3   : > { %v3501_v5 = vpop.xlane.xlu1 %3500 }
0x10d4   : > { %v3513_v49 = vperm.slane %v3501_v5, %v5228_v21  ;;  %v7779_v5 = vld [vmem:[%s5036_s26 + $0x3c8] sm:$0xff] }
0x10d6   : > { %v3516_v50 = vsel %vm400_vm2, %v3513_v49, %v3512_v57  ;;  %v7784_v49 = vld [vmem:[%s5036_s26 + $0x298] sm:$0xff] }
0x10d7   : > { %v3606_v45 = vsel %vm237_vm0, %v7784_v49, -inf }
0x10ea   : > { %v3504_v52 = vpop.xlane.xlu2 %3503 }
0x10eb   : > { %v3514_v25 = vperm.slane %v3504_v52, %v5228_v21  ;;  %v3639_v52 = vsel %vm237_vm0, %v7779_v5, -inf }
0x10ec   : > { %3640 = vmax.xlane.f32.xlu0 %v3639_v52 }
0x10ed   : > { %v3517_v27 = vsel %vm402_vm3, %v3514_v25, %v3516_v50  ;;  %v7789_v25 = vld [vmem:[%s5036_s26 + $0x3e8] sm:$0xff] }
0x10ee   : > { %v3645_v57 = vsel %vm237_vm0, %v7789_v25, -inf }
0x10ef   : > { %3646 = vmax.xlane.f32.xlu2 %v3645_v57 }
0x10f2   : > { %v3557_v24 = vpop.xlane.xlu2 %3556 }
0x10fa   : > { %v3566_v43 = vpop.xlane.xlu2 %3565 }
0x10fb   : > { %v3686_v57 = vperm.slane %v3566_v43, %v5228_v21 }
0x10fc   : > { %v3507_v29 = vpop.xlane.xlu0 %3506 }
0x10fd   : > { %v3515_v3 = vperm.slane %v3507_v29, %v5228_v21  ;;  %v7794_v29 = vld [vmem:[%s5036_s26 + $0x3f8] sm:$0xff] }
0x10fe   : > { %v3648_v50 = vsel %vm237_vm0, %v7794_v29, -inf }
0x10ff   : > { %v3518_v2 = vsel %vm404_vm4, %v3515_v3, %v3517_v27  ;;  %v7799_v3 = vld [vmem:[%s5036_s26 + $0x2c8] sm:$0xff]  ;;  %3649 = vmax.xlane.f32.xlu0 %v3648_v50 }
0x1100   : > { %v3520_v40 = vsel %vm463_vm9, %v3518_v2, -inf  ;;  %v3615_v27 = vsel %vm237_vm0, %v7799_v3, -inf  ;;  %v7804_v2 = vld [vmem:[%s5036_s26 + $0x2f8] sm:$0xff] }
0x1101   : > { %3521 = vmax.xlane.f32.xlu1 %v3520_v40  ;;  %v3624_v40 = vsel %vm237_vm0, %v7804_v2, -inf }
0x1109   : > { %3562 = vmax.xlane.f32.xlu1 %v3561_v46  ;;  %v7814_v46 = vld [vmem:[%s5036_s26 + $0x3d8] sm:$0xff] }
0x110a   : > { %v3642_v34 = vsel %vm237_vm0, %v7814_v46, -inf }
0x1111   : > { %3571 = vmax.xlane.f32.xlu1 %v3570_v0  ;;  %v3560_v0 = vpop.xlane.xlu0 %3559 }
0x1112   : > { %v3684_v1 = vperm.slane %v3560_v0, %v5228_v21 }
0x1119   : > { %3580 = vmax.xlane.f32.xlu1 %v3579_v26  ;;  %v3569_v38 = vpop.xlane.xlu0 %3568  ;;  %v3575_v26 = vpop.xlane.xlu2 %3574 }
0x1121   : > { %3589 = vmax.xlane.f32.xlu1 %v3588_v51  ;;  %v3578_v47 = vpop.xlane.xlu0 %3577  ;;  %v3683_v51 = vperm.slane %v3557_v24, %v5228_v21  ;;  %v3584_v33 = vpop.xlane.xlu2 %3583 }
0x1122   : > { %v3690_v0 = vperm.slane %v3578_v47, %v5228_v21 }
0x1129   : > { %3598 = vmax.xlane.f32.xlu1 %v3597_v13  ;;  %v3587_v30 = vpop.xlane.xlu0 %3586  ;;  %v3593_v61 = vpop.xlane.xlu2 %3592 }
0x1131   : > { %3607 = vmax.xlane.f32.xlu1 %v3606_v45  ;;  %v3715_v45 = vsel %vm400_vm2, %v3684_v1, %v3683_v51  ;;  %v3596_v32 = vpop.xlane.xlu0 %3595 }
0x1139   : > { %3616 = vmax.xlane.f32.xlu1 %v3615_v27  ;;  %v3687_v27 = vperm.slane %v3569_v38, %v5228_v21  ;;  %v3605_v47 = vpop.xlane.xlu0 %3604 }
0x1141   : > { %3625 = vmax.xlane.f32.xlu1 %v3624_v40 }
0x1149   : > { %3634 = vmax.xlane.f32.xlu1 %v3633_v9  ;;  %v3689_v9 = vperm.slane %v3575_v26, %v5228_v21  ;;  %v3602_v26 = vpop.xlane.xlu2 %3601 }
0x1151   : > { %3643 = vmax.xlane.f32.xlu1 %v3642_v34 }
0x1174   : > { %v7818_v10 = vpop.xlane.xlu1 %3521 }
0x117c   : > { %v3563_v13 = vpop.xlane.xlu1 %3562 }
0x117d   : > { %v3685_v52 = vperm.slane %v3563_v13, %v5228_v21 }
0x117f   : > { %v3716_v50 = vsel %vm402_vm3, %v3685_v52, %v3715_v45  ;;  %v3692_v45 = vperm.slane %v3584_v33, %v5228_v21  ;;  %v3614_v33 = vpop.xlane.xlu0 %3613 }
0x1180   : > { %v3717_v40 = vsel %vm404_vm4, %v3686_v57, %v3716_v50  ;;  %v3693_v50 = vperm.slane %v3587_v30, %v5228_v21  ;;  %v3698_v30 = vperm.slane %v3602_v26, %v5228_v21 }
0x1181   : > { %v3718_v13 = vsel %vm406_vm5, %v3687_v27, %v3717_v40 }
0x1184   : > { %v3572_v34 = vpop.xlane.xlu1 %3571 }
0x1185   : > { %v3688_v24 = vperm.slane %v3572_v34, %v5228_v21 }
0x1187   : > { %v3719_v51 = vsel %vm408_vm6, %v3688_v24, %v3718_v13  ;;  %v3695_v24 = vperm.slane %v3593_v61, %v5228_v21  ;;  %v3611_v13 = vpop.xlane.xlu2 %3610 }
0x1188   : > { %v3720_v43 = vsel %vm410_vm7, %v3689_v9, %v3719_v51  ;;  %v3696_v51 = vperm.slane %v3596_v32, %v5228_v21  ;;  %v3623_v32 = vpop.xlane.xlu0 %3622  ;;  %v3701_v26 = vperm.slane %v3611_v13, %v5228_v21 }
0x1189   : > { %v3721_v1 = vsel %vm412_vm8, %v3690_v0, %v3720_v43 }
0x118a   : > { %v3747_v38 = vsel %vm237_vm0, %v3721_v1, -inf }
0x118b   : > { %3748 = vmax.xlane.f32.xlu1 %v3747_v38 }
0x118c   : > { %v3581_v52 = vpop.xlane.xlu1 %3580 }
0x118d   : > { %v3691_v57 = vperm.slane %v3581_v52, %v5228_v21 }
0x118f   : > { %v3722_v27 = vsel %vm400_vm2, %v3692_v45, %v3691_v57 }
0x1190   : > { %v3723_v9 = vsel %vm402_vm3, %v3693_v50, %v3722_v27  ;;  %v3620_v50 = vpop.xlane.xlu2 %3619 }
0x1194   : > { %v3590_v40 = vpop.xlane.xlu1 %3589 }
0x1195   : > { %v3694_v34 = vperm.slane %v3590_v40, %v5228_v21 }
0x1197   : > { %v3724_v0 = vsel %vm404_vm4, %v3694_v34, %v3723_v9  ;;  %v3699_v34 = vperm.slane %v3605_v47, %v5228_v21  ;;  %v3705_v47 = vperm.slane %v3623_v32, %v5228_v21 }
0x1198   : > { %v3725_v43 = vsel %vm406_vm5, %v3695_v24, %v3724_v0  ;;  %v3702_v24 = vperm.slane %v3614_v33, %v5228_v21 }
0x1199   : > { %v3726_v52 = vsel %vm408_vm6, %v3696_v51, %v3725_v43 }
0x119c   : > { %v3599_v1 = vpop.xlane.xlu1 %3598 }
0x119d   : > { %v3697_v38 = vperm.slane %v3599_v1, %v5228_v21  ;;  %v3629_v1 = vpop.xlane.xlu2 %3628 }
0x119f   : > { %v3727_v45 = vsel %vm410_vm7, %v3697_v38, %v3726_v52  ;;  %v3704_v52 = vperm.slane %v3620_v50, %v5228_v21  ;;  %v3707_v50 = vperm.slane %v3629_v1, %v5228_v21 }
0x11a0   : > { %v3728_v57 = vsel %vm412_vm8, %v3698_v30, %v3727_v45  ;;  %v3632_v30 = vpop.xlane.xlu0 %3631 }
0x11a1   : > { %v3750_v61 = vsel %vm237_vm0, %v3728_v57, -inf }
0x11a2   : > { %3751 = vmax.xlane.f32.xlu2 %v3750_v61 }
0x11a4   : > { %v3608_v27 = vpop.xlane.xlu1 %3607 }
0x11a5   : > { %v3700_v40 = vperm.slane %v3608_v27, %v5228_v21 }
0x11a7   : > { %v3729_v9 = vsel %vm400_vm2, %v3700_v40, %v3699_v34  ;;  %v3638_v40 = vpop.xlane.xlu2 %3637 }
0x11a8   : > { %v3730_v0 = vsel %vm402_vm3, %v3701_v26, %v3729_v9  ;;  %v3641_v26 = vpop.xlane.xlu0 %3640  ;;  %v3708_v9 = vperm.slane %v3632_v30, %v5228_v21 }
0x11a9   : > { %v3731_v38 = vsel %vm404_vm4, %v3702_v24, %v3730_v0 }
0x11aa   : > { %v3736_v0 = vsel %vm400_vm2, %v3708_v9, %v3707_v50  ;;  %v3777_v50 = vsel %vm467_vm1, %v7656_v56, -inf  ;;  %v3783_v9 = vsel %vm467_vm1, %v7661_v18, -inf  ;;  %v3801_v56 = vsel %vm467_vm1, %v7681_v17, -inf }
0x11ac   : > { %v3617_v51 = vpop.xlane.xlu1 %3616 }
0x11ad   : > { %v3703_v43 = vperm.slane %v3617_v51, %v5228_v21  ;;  %v3710_v51 = vperm.slane %v3638_v40, %v5228_v21 }
0x11af   : > { %v3732_v45 = vsel %vm406_vm5, %v3703_v43, %v3731_v38  ;;  %v3647_v38 = vpop.xlane.xlu2 %3646 }
0x11b0   : > { %v3733_v13 = vsel %vm408_vm6, %v3704_v52, %v3732_v45  ;;  %v3711_v52 = vperm.slane %v3641_v26, %v5228_v21  ;;  %v3650_v45 = vpop.xlane.xlu0 %3649  ;;  %v3713_v1 = vperm.slane %v3647_v38, %v5228_v21  ;;  %v3774_v26 = vsel %vm467_vm1, %v7651_v16, -inf }
0x11b1   : > { %v3734_v61 = vsel %vm410_vm7, %v3705_v47, %v3733_v13  ;;  %v3795_v16 = vsel %vm467_vm1, %v7676_v59, -inf }
0x11b4   : > { %v3626_v57 = vpop.xlane.xlu1 %3625 }
0x11b5   : > { %v3706_v33 = vperm.slane %v3626_v57, %v5228_v21  ;;  %v3714_v57 = vperm.slane %v3650_v45, %v5228_v21 }
0x11b7   : > { %v3735_v27 = vsel %vm412_vm8, %v3706_v33, %v3734_v61 }
0x11b8   : > { %v3753_v34 = vsel %vm237_vm0, %v3735_v27, -inf }
0x11b9   : > { %3754 = vmax.xlane.f32.xlu0 %v3753_v34 }
0x11bc   : > { %v3635_v24 = vpop.xlane.xlu1 %3634 }
0x11bd   : > { %v3709_v32 = vperm.slane %v3635_v24, %v5228_v21  ;;  %v3786_v24 = vsel %vm467_vm1, %v7666_v4, -inf  ;;  %v3804_v4 = vsel %vm467_vm1, %v7686_v55, -inf  ;;  %v3810_v55 = vsel %vm467_vm1, %v7699_v37, -inf }
0x11be   : > { %v3789_v37 = vsel %vm467_vm1, %v7724_v35, -inf  ;;  %v3807_v35 = vsel %vm467_vm1, %v7754_v63, -inf  ;;  %v3825_v63 = vsel %vm467_vm1, %v7784_v49, -inf  ;;  %v3861_v49 = vsel %vm467_vm1, %v7814_v46, -inf }
0x11bf   : > { %v3737_v43 = vsel %vm402_vm3, %v3709_v32, %v3736_v0  ;;  %v3792_v32 = vsel %vm467_vm1, %v7671_v11, -inf  ;;  %v2099_v46 = vsel %vm2098_vm10, %v5632_v12, %v5634_v14  ;;  %v8222_v14 = vld [vmem:[#allocation14_spill] sm:$0xff] }
0x11c0   : > { %v3738_v47 = vsel %vm404_vm4, %v3710_v51, %v3737_v43 }
0x11c1   : > { %v3739_v33 = vsel %vm406_vm5, %v3711_v52, %v3738_v47  ;;  %3775 = vmax.xlane.f32.xlu0 %v3774_v26 }
0x11c4   : > { %v3644_v13 = vpop.xlane.xlu1 %3643 }
0x11c5   : > { %v3712_v30 = vperm.slane %v3644_v13, %v5228_v21 }
0x11c7   : > { %v3740_v61 = vsel %vm408_vm6, %v3712_v30, %v3739_v33  ;;  %v3780_v30 = vsel %vm467_vm1, %v7709_v6, -inf  ;;  %v3822_v33 = vsel %vm467_vm1, %v7717_v54, -inf  ;;  %v3798_v6 = vsel %vm467_vm1, %v7739_v41, -inf }
0x11c8   : > { %v3741_v27 = vsel %vm410_vm7, %v3713_v1, %v3740_v61  ;;  %v3813_v1 = vsel %vm467_vm1, %v7702_v44, -inf  ;;  %v3828_v44 = vsel %vm467_vm1, %v7729_v19, -inf  ;;  %v3831_v61 = vsel %vm467_vm1, %v7732_v42, -inf }
0x11c9   : > { %v3742_v40 = vsel %vm412_vm8, %v3714_v57, %v3741_v27  ;;  %3784 = vmax.xlane.f32.xlu0 %v3783_v9  ;;  %v3819_v57 = vsel %vm467_vm1, %v7714_v36, -inf  ;;  %v3837_v36 = vsel %vm467_vm1, %v7744_v62, -inf  ;;  %v3840_v54 = vsel %vm467_vm1, %v7747_v53, -inf }
0x11ca   : > { %v3756_v34 = vsel %vm237_vm0, %v3742_v40, -inf  ;;  %v3846_v19 = vsel %vm467_vm1, %v7759_v48, -inf  ;;  %v3849_v42 = vsel %vm467_vm1, %v7762_v20, -inf  ;;  %v3816_v41 = vsel %vm467_vm1, %v7769_v28, -inf }
0x11cb   : > { %3757 = vmax.xlane.f32.xlu1 %v3756_v34  ;;  %v3855_v62 = vsel %vm467_vm1, %v7774_v7, -inf  ;;  %v3858_v53 = vsel %vm467_vm1, %v7779_v5, -inf  ;;  %v3864_v48 = vsel %vm467_vm1, %v7789_v25, -inf  ;;  %v3867_v20 = vsel %vm467_vm1, %v7794_v29, -inf }
0x11cc   : > { %v3834_v28 = vsel %vm467_vm1, %v7799_v3, -inf  ;;  %v3843_v7 = vsel %vm467_vm1, %v7804_v2, -inf  ;;  %v3852_v5 = vsel %vm467_vm1, %v7809_v23, -inf  ;;  %v3993_v3 = vsel %vm2098_vm10, %v6840_v22, %v7074_v39 }
0x11cd   : > { %v3994_v2 = vsel %vm2100_vm11, %v3993_v3, %v7212_v15  ;;  %v2101_v9 = vsel %vm2100_vm11, %v2099_v46, %v5724_v60  ;;  %vm2110_vm1 = vcmask 56320  }
0x11ce   : > { %v3995_v23 = vsel %vm2102_vm12, %v3994_v2, %v7446_v8  ;;  %v2103_v39 = vsel %vm2102_vm12, %v2101_v9, %v5958_v58  ;;  %v8220_v8 = vld [vmem:[#allocation12_spill] sm:$0xff] }
0x11d1   : > { %3793 = vmax.xlane.f32.xlu0 %v3792_v32  ;;  %v8219_v32 = vld [vmem:[#allocation11_spill] sm:$0xff] }
0x11d3   : > { %3778 = vmax.xlane.f32.xlu1 %v3777_v50  ;;  %v3996_v50 = vsel %vm2104_vm13, %v3995_v23, %v7584_v31 }
0x11d9   : > { %3802 = vmax.xlane.f32.xlu0 %v3801_v56 }
0x11db   : > { %3787 = vmax.xlane.f32.xlu1 %v3786_v24  ;;  %v3997_v24 = vsel %vm2106_vm14, %v3996_v50, %v7818_v10 }
0x11e1   : > { %3811 = vmax.xlane.f32.xlu0 %v3810_v55 }
0x11e3   : > { %3796 = vmax.xlane.f32.xlu1 %v3795_v16  ;;  %v2105_v16 = vsel %vm2104_vm13, %v2103_v39, %v8219_v32 }
0x11e4   : > { %v2107_v56 = vsel %vm2106_vm14, %v2105_v16, %v8220_v8 }
0x11e9   : > { %3820 = vmax.xlane.f32.xlu0 %v3819_v57 }
0x11eb   : > { %3805 = vmax.xlane.f32.xlu1 %v3804_v4 }
0x11f1   : > { %3829 = vmax.xlane.f32.xlu0 %v3828_v44 }
0x11f3   : > { %3814 = vmax.xlane.f32.xlu1 %v3813_v1 }
0x11f9   : > { %3838 = vmax.xlane.f32.xlu0 %v3837_v36 }
0x11fb   : > { %3823 = vmax.xlane.f32.xlu1 %v3822_v33 }
0x11fe   : > { %v3749_v0 = vpop.xlane.xlu1 %3748 }
0x11ff   : > { %v3763_v11 = vperm.slane %v3749_v0, %v5228_v21  ;;  %v8221_v0 = vld [vmem:[#allocation13_spill] sm:$0xff] }
0x1200   : > { %v2109_v12 = vsel %vm2108_vm15, %v2107_v56, %v8221_v0 }
0x1201   : > { %3847 = vmax.xlane.f32.xlu0 %v3846_v19  ;;  %v7973_v31 = vsel %vm2110_vm1, %v2109_v12, %v8222_v14 }
0x1202   : > { %v4000_v58 = vmul.f32 %v7973_v31, %v7973_v31 }
0x1203   : > { %3832 = vmax.xlane.f32.xlu1 %v3831_v61 }
0x1209   : > { %3856 = vmax.xlane.f32.xlu0 %v3855_v62 }
0x120b   : > { %3841 = vmax.xlane.f32.xlu1 %v3840_v54 }
0x1211   : > { %3865 = vmax.xlane.f32.xlu0 %v3864_v48 }
0x1213   : > { %3850 = vmax.xlane.f32.xlu1 %v3849_v42 }
0x1215   : > { %v3752_v51 = vpop.xlane.xlu2 %3751 }
0x1216   : > { %v3764_v43 = vperm.slane %v3752_v51, %v5228_v21 }
0x1218   : > { %v3767_v59 = vsel %vm400_vm2, %v3764_v43, %v3763_v11 }
0x121b   : > { %3859 = vmax.xlane.f32.xlu1 %v3858_v53 }
0x1223   : > { %3868 = vmax.xlane.f32.xlu1 %v3867_v20 }
0x122c   : > { %v3755_v18 = vpop.xlane.xlu0 %3754 }
0x122d   : > { %v3765_v38 = vperm.slane %v3755_v18, %v5228_v21 }
0x122f   : > { %v3768_v17 = vsel %vm402_vm3, %v3765_v38, %v3767_v59 }
0x1234   : > { %v3776_v25 = vpop.xlane.xlu0 %3775 }
0x1235   : > { %v3902_v60 = vperm.slane %v3776_v25, %v5228_v21 }
0x123c   : > { %v3785_v27 = vpop.xlane.xlu0 %3784 }
0x123d   : > { %v3905_v11 = vperm.slane %v3785_v27, %v5228_v21 }
0x123e   : > { %v3758_v52 = vpop.xlane.xlu1 %3757 }
0x123f   : > { %v3766_v45 = vperm.slane %v3758_v52, %v5228_v21  ;;  %v4001_v52 = vsel %vm463_vm9, %v4000_v58, 0.0 }
0x1241   : > { %v3769_v47 = vsel %vm404_vm4, %v3766_v45, %v3768_v17  ;;  %v4002_v17 = vrot.slane %v4001_v52, 4 }
0x1242   : > { %v3771_v13 = vsel %vm463_vm9, %v3769_v47, -inf }
0x1243   : > { %3772 = vmax.xlane.f32.xlu2 %v3771_v13  ;;  %v4003_v44 = vadd.f32 %v4002_v17, %v4001_v52 }
0x1244   : > { %v3794_v34 = vpop.xlane.xlu0 %3793 }
0x1245   : > { %v3908_v55 = vperm.slane %v3794_v34, %v5228_v21 }
0x1246   : > { %v3779_v29 = vpop.xlane.xlu1 %3778 }
0x1247   : > { %v3903_v10 = vperm.slane %v3779_v29, %v5228_v21 }
0x1249   : > { %v3934_v38 = vsel %vm400_vm2, %v3903_v10, %v3902_v60 }
0x124b   : > { %3781 = vmax.xlane.f32.xlu2 %v3780_v30 }
0x124c   : > { %v3803_v51 = vpop.xlane.xlu0 %3802 }
0x124d   : > { %v3911_v53 = vperm.slane %v3803_v51, %v5228_v21 }
0x124e   : > { %v3788_v40 = vpop.xlane.xlu1 %3787 }
0x124f   : > { %v3906_v45 = vperm.slane %v3788_v40, %v5228_v21 }
0x1253   : > { %3790 = vmax.xlane.f32.xlu2 %v3789_v37 }
0x1254   : > { %v3812_v57 = vpop.xlane.xlu0 %3811 }
0x1255   : > { %v3914_v29 = vperm.slane %v3812_v57, %v5228_v21 }
0x1256   : > { %v3797_v26 = vpop.xlane.xlu1 %3796 }
0x1257   : > { %v3909_v30 = vperm.slane %v3797_v26, %v5228_v21 }
0x125b   : > { %3799 = vmax.xlane.f32.xlu2 %v3798_v6 }
0x125e   : > { %v3806_v43 = vpop.xlane.xlu1 %3805 }
0x125f   : > { %v3912_v20 = vperm.slane %v3806_v43, %v5228_v21  ;;  %v4880_v43 = vmov 0  }
0x1260   : > { %4718 = vset.pattern.permute.xlu1 %v4880_v43  ;;  %4719 = vset.pattern.permute.xlu2 %v4880_v43 }
0x1261   : > { %4720 = vset.pattern.permute.xlu0 %v4880_v43 }
0x1263   : > { %3808 = vmax.xlane.f32.xlu2 %v3807_v35  ;;  %v4004_v35 = vrot.slane %v4003_v44, 2 }
0x1265   : > { %v4005_v42 = vadd.f32 %v4004_v35, %v4003_v44 }
0x1266   : > { %v3815_v37 = vpop.xlane.xlu1 %3814 }
0x1267   : > { %v4006_v48 = vrot.slane %v4005_v42, 1  ;;  %v3915_v3 = vperm.slane %v3815_v37, %v5228_v21 }
0x126b   : > { %3817 = vmax.xlane.f32.xlu2 %v3816_v41  ;;  %v3821_v41 = vpop.xlane.xlu0 %3820 }
0x126c   : > { %v3917_v26 = vperm.slane %v3821_v41, %v5228_v21 }
0x1273   : > { %3826 = vmax.xlane.f32.xlu2 %v3825_v63  ;;  %v3824_v63 = vpop.xlane.xlu1 %3823  ;;  %v3830_v40 = vpop.xlane.xlu0 %3829 }
0x1274   : > { %v3918_v12 = vperm.slane %v3824_v63, %v5228_v21  ;;  %v3920_v14 = vperm.slane %v3830_v40, %v5228_v21 }
0x127b   : > { %3835 = vmax.xlane.f32.xlu2 %v3834_v28  ;;  %v3833_v2 = vpop.xlane.xlu1 %3832  ;;  %v3839_v32 = vpop.xlane.xlu0 %3838 }
0x127c   : > { %v3921_v51 = vperm.slane %v3833_v2, %v5228_v21 }
0x1283   : > { %3844 = vmax.xlane.f32.xlu2 %v3843_v7  ;;  %v3842_v8 = vpop.xlane.xlu1 %3841 }
0x128b   : > { %3853 = vmax.xlane.f32.xlu2 %v3852_v5  ;;  %v3851_v52 = vpop.xlane.xlu1 %3850 }
0x1293   : > { %3862 = vmax.xlane.f32.xlu2 %v3861_v49  ;;  %v7999_v49 = vadd.f32 %v4006_v48, %v4005_v42 }
0x1295   : > { %4738 = vrsqrt.f32 %v7999_v49  ;;  %vm4015_vm10 = vcmp.eq.f32.partialorder %v7999_v49, inf  ;;  %vm4017_vm11 = vcmp.eq.f32.partialorder %v7999_v49, 0.0 }
0x12b6   : > { %v3773_v22 = vpop.xlane.xlu2 %3772 }
0x12b7   : > { %v7966_v15 = vsel %vm2108_vm15, %v3997_v24, %v3773_v22  ;;  %v4739_v22 = vpop.eup %4738 }
0x12b8   : > { %v4009_v56 = vmul.f32 %v4739_v22, %v7999_v49 }
0x12ba   : > { %v4010_v60 = vmul.f32 %v4739_v22, %v4009_v56 }
0x12be   : > { %v3782_v18 = vpop.xlane.xlu2 %3781 }
0x12bf   : > { %v3904_v4 = vperm.slane %v3782_v18, %v5228_v21 }
0x12c1   : > { %v3935_v59 = vsel %vm402_vm3, %v3904_v4, %v3934_v38  ;;  %v4011_v4 = vmul.f32 0.5, %v4010_v60 }
0x12c2   : > { %v3936_v47 = vsel %vm404_vm4, %v3905_v11, %v3935_v59  ;;  %v3848_v11 = vpop.xlane.xlu0 %3847 }
0x12c3   : > { %v3937_v33 = vsel %vm406_vm5, %v3906_v45, %v3936_v47  ;;  %v3923_v45 = vperm.slane %v3839_v32, %v5228_v21  ;;  %v4012_v47 = vsub.f32 1.5, %v4011_v4  ;;  %v3926_v35 = vperm.slane %v3848_v11, %v5228_v21 }
0x12c6   : > { %v3791_v13 = vpop.xlane.xlu2 %3790 }
0x12c7   : > { %v3907_v1 = vperm.slane %v3791_v13, %v5228_v21  ;;  %v3924_v13 = vperm.slane %v3842_v8, %v5228_v21 }
0x12c9   : > { %v3938_v61 = vsel %vm408_vm6, %v3907_v1, %v3937_v33 }
0x12ca   : > { %v3939_v6 = vsel %vm410_vm7, %v3908_v55, %v3938_v61  ;;  %v3857_v44 = vpop.xlane.xlu0 %3856 }
0x12cb   : > { %v3940_v36 = vsel %vm412_vm8, %v3909_v30, %v3939_v6  ;;  %v4013_v30 = vmul.f32 %v4739_v22, %v4012_v47  ;;  %v3860_v6 = vpop.xlane.xlu1 %3859  ;;  %v3929_v63 = vperm.slane %v3857_v44, %v5228_v21 }
0x12cc   : > { %v3966_v54 = vsel %vm237_vm0, %v3940_v36, -inf }
0x12cd   : > { %3967 = vmax.xlane.f32.xlu2 %v3966_v54  ;;  %v4014_v36 = vmul.f32 %v4013_v30, %v7999_v49  ;;  %v3927_v54 = vperm.slane %v3851_v52, %v5228_v21  ;;  %v4882_v30 = vmov 1  }
0x12ce   : > { %v3800_v19 = vpop.xlane.xlu2 %3799 }
0x12cf   : > { %v3910_v62 = vperm.slane %v3800_v19, %v5228_v21  ;;  %v4016_v42 = vsel %vm4015_vm10, %v7999_v49, %v4014_v36 }
0x12d1   : > { %v3941_v28 = vsel %vm400_vm2, %v3911_v53, %v3910_v62  ;;  %v4018_v62 = vand.u32 2147483648, %v7999_v49  ;;  %v3955_v53 = vsel %vm400_vm2, %v3927_v54, %v3926_v35 }
0x12d2   : > { %v3942_v25 = vsel %vm402_vm3, %v3912_v20, %v3941_v28  ;;  %v3866_v28 = vpop.xlane.xlu0 %3865 }
0x12d3   : > { %v4019_v48 = vsel %vm4017_vm11, %v4018_v62, %v4016_v42  ;;  %v3932_v40 = vperm.slane %v3866_v28, %v5228_v21 }
0x12d6   : > { %v3809_v7 = vpop.xlane.xlu2 %3808 }
0x12d7   : > { %v3913_v5 = vperm.slane %v3809_v7, %v5228_v21  ;;  %v3930_v7 = vperm.slane %v3860_v6, %v5228_v21 }
0x12d9   : > { %v3943_v27 = vsel %vm404_vm4, %v3913_v5, %v3942_v25  ;;  %v3869_v5 = vpop.xlane.xlu1 %3868  ;;  %v4020_v25 = vadd.f32 1e-08, %v4019_v48 }
0x12da   : > { %v3944_v34 = vsel %vm406_vm5, %v3914_v29, %v3943_v27  ;;  %v3933_v49 = vperm.slane %v3869_v5, %v5228_v21 }
0x12db   : > { %v3945_v50 = vsel %vm408_vm6, %v3915_v3, %v3944_v34  ;;  %4740 = vrcp.f32 %v4020_v25  ;;  %v4032_v32 = vand.u32 2147483648, %v4020_v25 }
0x12dd   : > { %v4033_v56 = vor.u32 1.1754944e-38, %v4032_v32 }
0x12de   : > { %v3818_v23 = vpop.xlane.xlu2 %3817 }
0x12df   : > { %v3916_v46 = vperm.slane %v3818_v23, %v5228_v21 }
0x12e1   : > { %v3946_v9 = vsel %vm410_vm7, %v3916_v46, %v3945_v50  ;;  %v4741_v50 = vpop.eup %4740 }
0x12e2   : > { %v3947_v24 = vsel %vm412_vm8, %v3917_v26, %v3946_v9  ;;  %v4022_v9 = vmul.f32 %v4741_v50, %v4020_v25  ;;  %vm4027_vm12 = vweird.f32 %v4741_v50 }
0x12e3   : > { %v3969_v39 = vsel %vm237_vm0, %v3947_v24, -inf }
0x12e4   : > { %3970 = vmax.xlane.f32.xlu0 %v3969_v39  ;;  %v4023_v24 = vsub.f32 1.0, %v4022_v9 }
0x12e6   : > { %v3827_v16 = vpop.xlane.xlu2 %3826  ;;  %v4024_v22 = vmul.f32 %v4741_v50, %v4023_v24 }
0x12e7   : > { %v3919_v0 = vperm.slane %v3827_v16, %v5228_v21  ;;  %v4030_v16 = vand.u32 2147483647, %v4020_v25 }
0x12e8   : > { %v4025_v39 = vadd.f32 %v4741_v50, %v4024_v22 }
0x12e9   : > { %v3948_v10 = vsel %vm400_vm2, %v3919_v0, %v3918_v12 }
0x12ea   : > { %v3949_v58 = vsel %vm402_vm3, %v3920_v14, %v3948_v10 }
0x12eb   : > { %v3950_v59 = vsel %vm404_vm4, %v3921_v51, %v3949_v58 }
0x12ee   : > { %v3836_v18 = vpop.xlane.xlu2 %3835 }
0x12ef   : > { %v3922_v38 = vperm.slane %v3836_v18, %v5228_v21 }
0x12f1   : > { %v3951_v17 = vsel %vm406_vm5, %v3922_v38, %v3950_v59  ;;  %v4881_v59 = vmov 2  }
0x12f2   : > { %v3952_v55 = vsel %vm408_vm6, %v3923_v45, %v3951_v17 }
0x12f3   : > { %v3953_v33 = vsel %vm410_vm7, %v3924_v13, %v3952_v55 }
0x12f6   : > { %v3845_v1 = vpop.xlane.xlu2 %3844 }
0x12f7   : > { %v3925_v57 = vperm.slane %v3845_v1, %v5228_v21 }
0x12f9   : > { %v3954_v37 = vsel %vm412_vm8, %v3925_v57, %v3953_v33 }
0x12fa   : > { %v3972_v61 = vsel %vm237_vm0, %v3954_v37, -inf }
0x12fb   : > { %3973 = vmax.xlane.f32.xlu1 %v3972_v61 }
0x12fe   : > { %v3854_v19 = vpop.xlane.xlu2 %3853 }
0x12ff   : > { %v3928_v41 = vperm.slane %v3854_v19, %v5228_v21 }
0x1301   : > { %v3956_v20 = vsel %vm402_vm3, %v3928_v41, %v3955_v53 }
0x1302   : > { %v3957_v29 = vsel %vm404_vm4, %v3929_v63, %v3956_v20 }
0x1303   : > { %v3958_v2 = vsel %vm406_vm5, %v3930_v7, %v3957_v29  ;;  %vm4026_vm5 = vweird.f32 %v4020_v25 }
0x1304   : > { %vm4028_vm13 = vmor %vm4026_vm5, %vm4027_vm12 }
0x1305   : > { %v4029_v8 = vsel %vm4028_vm13, %v4741_v50, %v4025_v39 }
0x1306   : > { %v3863_v27 = vpop.xlane.xlu2 %3862 }
0x1307   : > { %v3931_v3 = vperm.slane %v3863_v27, %v5228_v21 }
0x1309   : > { %v3959_v34 = vsel %vm408_vm6, %v3931_v3, %v3958_v2  ;;  %vm4031_vm6 = vcmp.eq.f32.partialorder %v4030_v16, 8.507059e+37  ;;  %v4884_v3 = vmov 4  }
0x130a   : > { %v3960_v23 = vsel %vm410_vm7, %v3932_v40, %v3959_v34  ;;  %v8052_v0 = vsel %vm4031_vm6, %v4033_v56, %v4029_v8  ;;  %v4883_v40 = vmov 3  }
0x130b   : > { %v3961_v26 = vsel %vm412_vm8, %v3933_v49, %v3960_v23  ;;  %v4885_v49 = vmov 5  }
0x130c   : > { %v3975_v46 = vsel %vm237_vm0, %v3961_v26, -inf }
0x130d   : > { %3976 = vmax.xlane.f32.xlu2 %v3975_v46 }
0x1314   : > { %4072 = vperm.xlu1 %4718, %v7973_v31  }
0x131c   : > { %4724 = vset.pattern.permute.xlu1 %v4881_v59 }
0x1325   : > { %4085 = vperm.xlu2 %4719, %v8052_v0  }
0x1340   : > { %v3968_v12 = vpop.xlane.xlu2 %3967 }
0x1341   : > { %v3982_v58 = vperm.slane %v3968_v12, %v5228_v21 }
0x1357   : > { %v3971_v14 = vpop.xlane.xlu0 %3970 }
0x1358   : > { %v3983_v10 = vperm.slane %v3971_v14, %v5228_v21  ;;  %v4886_v14 = vmov 6  }
0x135a   : > { %v3986_v43 = vsel %vm400_vm2, %v3983_v10, %v3982_v58 }
0x136e   : > { %v3974_v60 = vpop.xlane.xlu1 %3973 }
0x136f   : > { %v3984_v51 = vperm.slane %v3974_v60, %v5228_v21 }
0x1371   : > { %v3987_v38 = vsel %vm402_vm3, %v3984_v51, %v3986_v43 }
0x1380   : > { %v3977_v18 = vpop.xlane.xlu2 %3976 }
0x1381   : > { %v3985_v4 = vperm.slane %v3977_v18, %v5228_v21 }
0x1383   : > { %v3988_v11 = vsel %vm404_vm4, %v3985_v4, %v3987_v38 }
0x1384   : > { %v3990_v52 = vsel %vm463_vm9, %v3988_v11, -inf }
0x1385   : > { %3991 = vmax.xlane.f32.xlu0 %v3990_v52 }
0x1386   : > { %v4073_v2 = vpop.permute.xlu1 %4072 }
0x1387   : > { %v4075_v23 = vmul.f32 %v4073_v2, %v7973_v31 }
0x1388   : > { %v4086_v56 = vpop.permute.xlu2 %4085 }
0x1389   : > { %v4076_v46 = vsel %vm463_vm9, %v4075_v23, 0.0  ;;  %v4088_v4 = vmul.f32 %v4086_v56, %v8052_v0 }
0x138a   : > { %v4077_v9 = vrot.slane %v4076_v46, 4 }
0x138c   : > { %v4078_v22 = vadd.f32 %v4077_v9, %v4076_v46 }
0x138e   : > { %v4079_v32 = vrot.slane %v4078_v22, 2 }
0x1390   : > { %v4080_v8 = vadd.f32 %v4079_v32, %v4078_v22 }
0x1392   : > { %v4081_v60 = vrot.slane %v4080_v8, 1 }
0x1394   : > { %v4082_v58 = vadd.f32 %v4081_v60, %v4080_v8 }
0x1396   : > { %v4089_v52 = vmul.f32 %v4088_v4, %v4082_v58 }
0x13f8   : > { %v3992_v45 = vpop.xlane.xlu0 %3991 }
0x13f9   : > { %v8065_v17 = vsel %vm2110_vm1, %v7966_v15, %v3992_v45 }
0x13fa   : > { %v4035_v47 = vmul.f32 %v8065_v17, %v8065_v17  ;;  %4092 = vperm.xlu0 %4720, %v8065_v17  }
0x13fc   : > { %v4036_v21 = vsel %vm463_vm9, %v4035_v47, 0.0 }
0x13fd   : > { %v4037_v13 = vrot.slane %v4036_v21, 4 }
0x13ff   : > { %v4038_v55 = vadd.f32 %v4037_v13, %v4036_v21 }
0x1401   : > { %v4039_v1 = vrot.slane %v4038_v55, 2 }
0x1402   : > { %4722 = vset.pattern.permute.xlu0 %v4882_v30 }
0x1403   : > { %v4040_v57 = vadd.f32 %v4039_v1, %v4038_v55  ;;  %4135 = vperm.xlu0 %4722, %v8065_v17  }
0x1405   : > { %v4041_v33 = vrot.slane %v4040_v57, 1 }
0x1407   : > { %v4042_v37 = vadd.f32 %v4041_v33, %v4040_v57  ;;  %v4887_v33 = vmov 7  }
0x1409   : > { %4742 = vrsqrt.f32 %v4042_v37  ;;  %vm4050_vm2 = vcmp.eq.f32.partialorder %v4042_v37, inf  ;;  %v4053_v19 = vand.u32 2147483648, %v4042_v37  ;;  %vm4052_vm3 = vcmp.eq.f32.partialorder %v4042_v37, 0.0 }
0x140b   : > { %4723 = vset.pattern.permute.xlu0 %v4881_v59 }
0x140c   : > { %4159 = vperm.xlu0 %4723, %v7973_v31  }
0x140f   : > { %v4743_v15 = vpop.eup %4742 }
0x1410   : > { %v4044_v44 = vmul.f32 %v4743_v15, %v4042_v37 }
0x1412   : > { %v4045_v61 = vmul.f32 %v4743_v15, %v4044_v44 }
0x1414   : > { %4177 = vperm.xlu0 %4723, %v8065_v17   ;;  %v4046_v6 = vmul.f32 0.5, %v4045_v61 }
0x1416   : > { %v4047_v36 = vsub.f32 1.5, %v4046_v6 }
0x1418   : > { %v4048_v54 = vmul.f32 %v4743_v15, %v4047_v36 }
0x141a   : > { %v4049_v35 = vmul.f32 %v4048_v54, %v4042_v37 }
0x141c   : > { %v4051_v42 = vsel %vm4050_vm2, %v4042_v37, %v4049_v35 }
0x141d   : > { %v4054_v41 = vsel %vm4052_vm3, %v4053_v19, %v4051_v42 }
0x141e   : > { %v4055_v62 = vadd.f32 1e-08, %v4054_v41 }
0x1420   : > { %4744 = vrcp.f32 %v4055_v62  ;;  %v4067_v20 = vand.u32 2147483648, %v4055_v62  ;;  %v4065_v7 = vand.u32 2147483647, %v4055_v62  ;;  %vm4061_vm7 = vweird.f32 %v4055_v62 }
0x1422   : > { %v4068_v25 = vor.u32 1.1754944e-38, %v4067_v20  ;;  %vm4066_vm14 = vcmp.eq.f32.partialorder %v4065_v7, 8.507059e+37 }
0x1426   : > { %v4745_v53 = vpop.eup %4744 }
0x1427   : > { %v4057_v63 = vmul.f32 %v4745_v53, %v4055_v62  ;;  %vm4062_vm4 = vweird.f32 %v4745_v53 }
0x1428   : > { %vm4063_vm8 = vmor %vm4061_vm7, %vm4062_vm4 }
0x1429   : > { %v4058_v48 = vsub.f32 1.0, %v4057_v63 }
0x142b   : > { %v4059_v28 = vmul.f32 %v4745_v53, %v4058_v48 }
0x142d   : > { %v4060_v5 = vadd.f32 %v4745_v53, %v4059_v28 }
0x142f   : > { %v4064_v29 = vsel %vm4063_vm8, %v4745_v53, %v4060_v5 }
0x1430   : > { %v8074_v27 = vsel %vm4066_vm14, %v4068_v25, %v4064_v29 }
0x1431   : > { %4189 = vperm.xlu0 %4723, %v8074_v27   ;;  %4105 = vperm.xlu2 %4719, %v8074_v27  }
0x1439   : > { %4725 = vset.pattern.permute.xlu0 %v4883_v40  ;;  %4721 = vset.pattern.permute.xlu2 %v4882_v30 }
0x143a   : > { %4201 = vperm.xlu0 %4725, %v7973_v31   ;;  %4117 = vperm.xlu2 %4721, %v7973_v31  }
0x1442   : > { %4219 = vperm.xlu0 %4725, %v8065_v17   ;;  %4129 = vperm.xlu2 %4721, %v8052_v0  }
0x144a   : > { %4231 = vperm.xlu0 %4725, %v8074_v27   ;;  %4147 = vperm.xlu2 %4721, %v8074_v27  }
0x1452   : > { %4727 = vset.pattern.permute.xlu0 %v4884_v3  ;;  %4726 = vset.pattern.permute.xlu2 %v4883_v40 }
0x1453   : > { %4243 = vperm.xlu0 %4727, %v7973_v31  }
0x145b   : > { %4261 = vperm.xlu0 %4727, %v8065_v17  }
0x1463   : > { %4273 = vperm.xlu0 %4727, %v8074_v27  }
0x146b   : > { %4729 = vset.pattern.permute.xlu0 %v4885_v49 }
0x146c   : > { %4285 = vperm.xlu0 %4729, %v7973_v31   ;;  %v4093_v34 = vpop.permute.xlu0 %4092 }
0x146d   : > { %v4095_v26 = vmul.f32 %v4093_v34, %v8065_v17 }
0x146f   : > { %v4096_v50 = vsel %vm463_vm9, %v4095_v26, 0.0 }
0x1470   : > { %v4097_v24 = vrot.slane %v4096_v50, 4 }
0x1472   : > { %v4098_v39 = vadd.f32 %v4097_v24, %v4096_v50 }
0x1474   : > { %4303 = vperm.xlu0 %4729, %v8065_v17   ;;  %v4099_v16 = vrot.slane %v4098_v39, 2 }
0x1475   : > { %v4136_v10 = vpop.permute.xlu0 %4135 }
0x1476   : > { %v4100_v12 = vadd.f32 %v4099_v16, %v4098_v39  ;;  %v4138_v18 = vmul.f32 %v4136_v10, %v8065_v17 }
0x1478   : > { %v4101_v51 = vrot.slane %v4100_v12, 1  ;;  %v4139_v59 = vsel %vm463_vm9, %v4138_v18, 0.0 }
0x1479   : > { %v4140_v21 = vrot.slane %v4139_v59, 4 }
0x147a   : > { %v4102_v38 = vadd.f32 %v4101_v51, %v4100_v12 }
0x147b   : > { %v4141_v30 = vadd.f32 %v4140_v21, %v4139_v59 }
0x147c   : > { %4315 = vperm.xlu0 %4729, %v8074_v27  }
0x147d   : > { %v4142_v44 = vrot.slane %v4141_v30, 2 }
0x147e   : > { %v4160_v29 = vpop.permute.xlu0 %4159 }
0x147f   : > { %v4143_v54 = vadd.f32 %v4142_v44, %v4141_v30  ;;  %v4162_v23 = vmul.f32 %v4160_v29, %v7973_v31 }
0x1481   : > { %v4144_v42 = vrot.slane %v4143_v54, 1  ;;  %v4163_v46 = vsel %vm463_vm9, %v4162_v23, 0.0 }
0x1482   : > { %v4164_v24 = vrot.slane %v4163_v46, 4 }
0x1483   : > { %v4145_v63 = vadd.f32 %v4144_v42, %v4143_v54 }
0x1484   : > { %4732 = vset.pattern.permute.xlu0 %v4886_v14 }
0x1485   : > { %4345 = vperm.xlu0 %4732, %v8065_v17  }
0x1486   : > { %v4178_v40 = vpop.permute.xlu0 %4177 }
0x1487   : > { %v4180_v26 = vmul.f32 %v4178_v40, %v8065_v17 }
0x1489   : > { %v4181_v50 = vsel %vm463_vm9, %v4180_v26, 0.0 }
0x148a   : > { %v4182_v22 = vrot.slane %v4181_v50, 4 }
0x148b   : > { %v4106_v43 = vpop.permute.xlu2 %4105 }
0x148c   : > { %v4108_v11 = vmul.f32 %v4106_v43, %v8074_v27  ;;  %v4183_v32 = vadd.f32 %v4182_v22, %v4181_v50 }
0x148d   : > { %4357 = vperm.xlu0 %4732, %v8074_v27  }
0x148e   : > { %v4109_v45 = vmul.f32 %v4108_v11, %v4102_v38  ;;  %v4184_v60 = vrot.slane %v4183_v32, 2 }
0x1490   : > { %v4110_v47 = vsub.f32 %v4109_v45, %v4089_v52  ;;  %v4185_v43 = vadd.f32 %v4184_v60, %v4183_v32 }
0x1492   : > { %v4111_v13 = vmul.f32 %v4110_v47, %v4110_v47  ;;  %v4186_v11 = vrot.slane %v4185_v43, 1 }
0x1494   : > { %v4118_v55 = vpop.permute.xlu2 %4117  ;;  %v4112_v1 = vsel %vm237_vm0, %v4111_v13, 0.0  ;;  %v4187_v13 = vadd.f32 %v4186_v11, %v4185_v43 }
0x1495   : > { %v4120_v57 = vmul.f32 %v4118_v55, %v7973_v31  ;;  %4737 = vset.pattern.permute.xlu0 %v4887_v33  ;;  %4113 = vadd.xlane.f32.xlu1 %v4112_v1 }
0x1496   : > { %4399 = vperm.xlu0 %4737, %v8074_v27  }
0x1497   : > { %v4121_v37 = vsel %vm463_vm9, %v4120_v57, 0.0 }
0x1498   : > { %v4122_v15 = vrot.slane %v4121_v37, 4 }
0x149a   : > { %v4123_v61 = vadd.f32 %v4122_v15, %v4121_v37 }
0x149c   : > { %v4124_v6 = vrot.slane %v4123_v61, 2  ;;  %v4130_v36 = vpop.permute.xlu2 %4129 }
0x149d   : > { %v4132_v53 = vmul.f32 %v4130_v36, %v8052_v0 }
0x149e   : > { %v4125_v35 = vadd.f32 %v4124_v6, %v4123_v61 }
0x14a0   : > { %v4126_v19 = vrot.slane %v4125_v35, 1 }
0x14a2   : > { %v4127_v41 = vadd.f32 %v4126_v19, %v4125_v35 }
0x14a3   : > { %v4190_v2 = vpop.permute.xlu0 %4189 }
0x14a4   : > { %v4148_v62 = vpop.permute.xlu2 %4147  ;;  %v4133_v20 = vmul.f32 %v4132_v53, %v4127_v41  ;;  %v4192_v45 = vmul.f32 %v4190_v2, %v8074_v27 }
0x14a5   : > { %v4150_v48 = vmul.f32 %v4148_v62, %v8074_v27 }
0x14a6   : > { %v4193_v15 = vmul.f32 %v4192_v45, %v4187_v13 }
0x14a7   : > { %v4151_v28 = vmul.f32 %v4150_v48, %v4145_v63 }
0x14a9   : > { %v4152_v7 = vsub.f32 %v4151_v28, %v4133_v20 }
0x14ab   : > { %v4153_v5 = vmul.f32 %v4152_v7, %v4152_v7 }
0x14ac   : > { %v4202_v34 = vpop.permute.xlu0 %4201 }
0x14ad   : > { %v4154_v25 = vsel %vm237_vm0, %v4153_v5, 0.0  ;;  %v4204_v39 = vmul.f32 %v4202_v34, %v7973_v31 }
0x14ae   : > { %4171 = vperm.xlu1 %4724, %v8052_v0   ;;  %4155 = vadd.xlane.f32.xlu2 %v4154_v25 }
0x14af   : > { %v4205_v8 = vsel %vm463_vm9, %v4204_v39, 0.0 }
0x14b0   : > { %v4206_v10 = vrot.slane %v4205_v8, 4 }
0x14b2   : > { %v4207_v4 = vadd.f32 %v4206_v10, %v4205_v8 }
0x14b4   : > { %v4220_v9 = vpop.permute.xlu0 %4219  ;;  %v4208_v59 = vrot.slane %v4207_v4, 2 }
0x14b6   : > { %4728 = vset.pattern.permute.xlu1 %v4884_v3  ;;  %v4222_v3 = vmul.f32 %v4220_v9, %v8065_v17  ;;  %v4209_v57 = vadd.f32 %v4208_v59, %v4207_v4 }
0x14b8   : > { %v4223_v16 = vsel %vm463_vm9, %v4222_v3, 0.0  ;;  %v4210_v36 = vrot.slane %v4209_v57, 1 }
0x14b9   : > { %v4224_v56 = vrot.slane %v4223_v16, 4 }
0x14ba   : > { %v4211_v53 = vadd.f32 %v4210_v36, %v4209_v57 }
0x14bb   : > { %v4225_v51 = vadd.f32 %v4224_v56, %v4223_v16 }
0x14bc   : > { %v4232_v54 = vpop.permute.xlu0 %4231 }
0x14bd   : > { %v4226_v38 = vrot.slane %v4225_v51, 2  ;;  %v4234_v62 = vmul.f32 %v4232_v54, %v8074_v27 }
0x14bf   : > { %v4227_v47 = vadd.f32 %v4226_v38, %v4225_v51 }
0x14c1   : > { %v4228_v61 = vrot.slane %v4227_v47, 1 }
0x14c3   : > { %v4229_v19 = vadd.f32 %v4228_v61, %v4227_v47 }
0x14c5   : > { %v4235_v48 = vmul.f32 %v4234_v62, %v4229_v19  ;;  %v4244_v25 = vpop.permute.xlu0 %4243 }
0x14c6   : > { %4213 = vperm.xlu2 %4726, %v8052_v0  }
0x14cd   : > { %v4262_v29 = vpop.permute.xlu0 %4261 }
0x14ce   : > { %4730 = vset.pattern.permute.xlu2 %v4885_v49  ;;  %v4165_v49 = vadd.f32 %v4164_v24, %v4163_v46  ;;  %v4246_v24 = vmul.f32 %v4244_v25, %v7973_v31 }
0x14d0   : > { %v4166_v12 = vrot.slane %v4165_v49, 2  ;;  %v4247_v32 = vsel %vm463_vm9, %v4246_v24, 0.0 }
0x14d2   : > { %v4167_v18 = vadd.f32 %v4166_v12, %v4165_v49  ;;  %v4248_v12 = vrot.slane %v4247_v32, 4 }
0x14d4   : > { %v4168_v52 = vrot.slane %v4167_v18, 1 }
0x14d5   : > { %v4274_v40 = vpop.permute.xlu0 %4273 }
0x14d6   : > { %v4169_v55 = vadd.f32 %v4168_v52, %v4167_v18  ;;  %v4276_v19 = vmul.f32 %v4274_v40, %v8074_v27 }
0x14de   : > { %v4286_v2 = vpop.permute.xlu0 %4285 }
0x14df   : > { %v4288_v26 = vmul.f32 %v4286_v2, %v7973_v31 }
0x14e1   : > { %v4289_v50 = vsel %vm463_vm9, %v4288_v26, 0.0 }
0x14e6   : > { %v4304_v34 = vpop.permute.xlu0 %4303 }
0x14e7   : > { %v4306_v23 = vmul.f32 %v4304_v34, %v8065_v17 }
0x14e9   : > { %v4307_v46 = vsel %vm463_vm9, %v4306_v23, 0.0 }
0x14ea   : > { %v4308_v9 = vrot.slane %v4307_v46, 4 }
0x14ec   : > { %v4309_v3 = vadd.f32 %v4308_v9, %v4307_v46 }
0x14ee   : > { %v4310_v56 = vrot.slane %v4309_v3, 2  ;;  %v4316_v47 = vpop.permute.xlu0 %4315 }
0x14f0   : > { %v4311_v51 = vadd.f32 %v4310_v56, %v4309_v3 }
0x14f2   : > { %v4312_v11 = vrot.slane %v4311_v51, 1 }
0x1508   : > { %v4114_v58 = vpop.xlane.xlu1 %4113 }
0x1520   : > { %v4172_v21 = vpop.permute.xlu1 %4171 }
0x1521   : > { %v4174_v1 = vmul.f32 %v4172_v21, %v8052_v0  ;;  %v4156_v30 = vpop.xlane.xlu2 %4155  ;;  %v4313_v21 = vadd.f32 %v4312_v11, %v4311_v51 }
0x1522   : > { %v4157_v37 = vadd.f32 %v4156_v30, %v4114_v58  ;;  %v4249_v58 = vadd.f32 %v4248_v12, %v4247_v32 }
0x1523   : > { %v4175_v44 = vmul.f32 %v4174_v1, %v4169_v55  ;;  %v4318_v1 = vmul.f32 %v4316_v47, %v8074_v27 }
0x1524   : > { %v4250_v52 = vrot.slane %v4249_v58, 2 }
0x1525   : > { %v4194_v6 = vsub.f32 %v4193_v15, %v4175_v44  ;;  %v4319_v15 = vmul.f32 %v4318_v1, %v4313_v21 }
0x1526   : > { %v4251_v13 = vadd.f32 %v4250_v52, %v4249_v58 }
0x1527   : > { %v4195_v35 = vmul.f32 %v4194_v6, %v4194_v6 }
0x1528   : > { %v4252_v61 = vrot.slane %v4251_v13, 1 }
0x1529   : > { %v4214_v42 = vpop.permute.xlu2 %4213  ;;  %v4196_v41 = vsel %vm237_vm0, %v4195_v35, 0.0 }
0x152a   : > { %v4216_v63 = vmul.f32 %v4214_v42, %v8052_v0  ;;  %4197 = vadd.xlane.f32.xlu1 %v4196_v41  ;;  %v4253_v42 = vadd.f32 %v4252_v61, %v4251_v13 }
0x152c   : > { %v4217_v20 = vmul.f32 %v4216_v63, %v4211_v53 }
0x152e   : > { %v4236_v28 = vsub.f32 %v4235_v48, %v4217_v20 }
0x1530   : > { %v4237_v7 = vmul.f32 %v4236_v28, %v4236_v28 }
0x1532   : > { %v4238_v5 = vsel %vm237_vm0, %v4237_v7, 0.0  ;;  %v4346_v7 = vpop.permute.xlu0 %4345 }
0x1533   : > { %4239 = vadd.xlane.f32.xlu2 %v4238_v5  ;;  %v4348_v25 = vmul.f32 %v4346_v7, %v8065_v17 }
0x1535   : > { %v4349_v40 = vsel %vm463_vm9, %v4348_v25, 0.0 }
0x1536   : > { %v4350_v34 = vrot.slane %v4349_v40, 4 }
0x1538   : > { %v4351_v26 = vadd.f32 %v4350_v34, %v4349_v40 }
0x153a   : > { %v4358_v32 = vpop.permute.xlu0 %4357 }
0x153b   : > { %v4360_v56 = vmul.f32 %v4358_v32, %v8074_v27 }
0x1543   : > { %4255 = vperm.xlu1 %4728, %v8052_v0  }
0x154b   : > { %4297 = vperm.xlu2 %4730, %v8052_v0   ;;  %4734 = vset.pattern.permute.xlu1 %v4887_v33 }
0x1553   : > { %4731 = vset.pattern.permute.xlu2 %v4886_v14 }
0x1554   : > { %4327 = vperm.xlu2 %4731, %v7973_v31  }
0x155c   : > { %4733 = vset.pattern.permute.xlu2 %v4887_v33 }
0x155d   : > { %4369 = vperm.xlu2 %4733, %v7973_v31  }
0x1565   : > { %4735 = vset.pattern.permute.xlu2 %v4886_v14  ;;  %v4264_v14 = vmul.f32 %v4262_v29, %v8065_v17 }
0x1566   : > { %4339 = vperm.xlu2 %4735, %v8052_v0  }
0x1567   : > { %v4265_v22 = vsel %vm463_vm9, %v4264_v14, 0.0  ;;  %v4352_v14 = vrot.slane %v4351_v26, 2 }
0x1568   : > { %v4266_v8 = vrot.slane %v4265_v22, 4 }
0x1569   : > { %v4353_v24 = vadd.f32 %v4352_v14, %v4351_v26 }
0x156a   : > { %v4267_v10 = vadd.f32 %v4266_v8, %v4265_v22 }
0x156b   : > { %v4354_v3 = vrot.slane %v4353_v24, 1 }
0x156c   : > { %v4268_v38 = vrot.slane %v4267_v10, 2 }
0x156e   : > { %4736 = vset.pattern.permute.xlu2 %v4887_v33  ;;  %v4290_v33 = vrot.slane %v4289_v50, 4  ;;  %v4269_v45 = vadd.f32 %v4268_v38, %v4267_v10 }
0x156f   : > { %4381 = vperm.xlu2 %4736, %v8052_v0  }
0x1570   : > { %v4291_v16 = vadd.f32 %v4290_v33, %v4289_v50 }
0x1572   : > { %v4292_v60 = vrot.slane %v4291_v16, 2 }
0x1574   : > { %v4293_v43 = vadd.f32 %v4292_v60, %v4291_v16  ;;  %v4355_v16 = vadd.f32 %v4354_v3, %v4353_v24 }
0x1576   : > { %v4294_v59 = vrot.slane %v4293_v43, 1  ;;  %v4361_v60 = vmul.f32 %v4360_v56, %v4355_v16 }
0x1578   : > { %v4295_v30 = vadd.f32 %v4294_v59, %v4293_v43 }
0x159d   : > { %v4198_v39 = vpop.xlane.xlu1 %4197 }
0x159e   : > { %v4199_v49 = vadd.f32 %v4198_v39, %v4157_v37  ;;  %v4270_v37 = vrot.slane %v4269_v45, 1 }
0x15a0   : > { %v4271_v36 = vadd.f32 %v4270_v37, %v4269_v45 }
0x15a2   : > { %v4277_v53 = vmul.f32 %v4276_v19, %v4271_v36 }
0x15a6   : > { %v4240_v18 = vpop.xlane.xlu2 %4239 }
0x15a7   : > { %v8148_v4 = vadd.f32 %v4240_v18, %v4199_v49 }
0x15ae   : > { %v4298_v55 = vpop.permute.xlu2 %4297 }
0x15af   : > { %v4300_v57 = vmul.f32 %v4298_v55, %v8052_v0 }
0x15b1   : > { %v4301_v44 = vmul.f32 %v4300_v57, %v4295_v30 }
0x15b3   : > { %v4320_v6 = vsub.f32 %v4319_v15, %v4301_v44  ;;  %v4400_v44 = vpop.permute.xlu0 %4399 }
0x15b5   : > { %v4256_v54 = vpop.permute.xlu1 %4255  ;;  %v4321_v35 = vmul.f32 %v4320_v6, %v4320_v6  ;;  %v4402_v6 = vmul.f32 %v4400_v44, %v8074_v27 }
0x15b6   : > { %v4258_v41 = vmul.f32 %v4256_v54, %v8052_v0  ;;  %v4328_v5 = vpop.permute.xlu2 %4327 }
0x15b7   : > { %v4322_v62 = vsel %vm237_vm0, %v4321_v35, 0.0  ;;  %v4330_v29 = vmul.f32 %v4328_v5, %v7973_v31 }
0x15b8   : > { %v4259_v63 = vmul.f32 %v4258_v41, %v4253_v42  ;;  %4323 = vadd.xlane.f32.xlu2 %v4322_v62 }
0x15b9   : > { %v4331_v2 = vsel %vm463_vm9, %v4330_v29, 0.0 }
0x15ba   : > { %v4278_v48 = vsub.f32 %v4277_v53, %v4259_v63  ;;  %v4332_v23 = vrot.slane %v4331_v2, 4 }
0x15bc   : > { %v4279_v20 = vmul.f32 %v4278_v48, %v4278_v48  ;;  %v4333_v46 = vadd.f32 %v4332_v23, %v4331_v2 }
0x15be   : > { %v4280_v28 = vsel %vm237_vm0, %v4279_v20, 0.0  ;;  %v4370_v50 = vpop.permute.xlu2 %4369  ;;  %v4334_v9 = vrot.slane %v4333_v46, 2 }
0x15bf   : > { %4281 = vadd.xlane.f32.xlu1 %v4280_v28  ;;  %v4372_v38 = vmul.f32 %v4370_v50, %v7973_v31 }
0x15c0   : > { %v4335_v33 = vadd.f32 %v4334_v9, %v4333_v46 }
0x15c1   : > { %v4373_v11 = vsel %vm463_vm9, %v4372_v38, 0.0 }
0x15c2   : > { %v4336_v39 = vrot.slane %v4335_v33, 1  ;;  %v4374_v52 = vrot.slane %v4373_v11, 4 }
0x15c4   : > { %v4337_v8 = vadd.f32 %v4336_v39, %v4335_v33  ;;  %v4375_v59 = vadd.f32 %v4374_v52, %v4373_v11 }
0x15c6   : > { %v4340_v22 = vpop.permute.xlu2 %4339  ;;  %v4376_v21 = vrot.slane %v4375_v59, 2 }
0x15c7   : > { %v4342_v49 = vmul.f32 %v4340_v22, %v8052_v0 }
0x15c8   : > { %v4377_v1 = vadd.f32 %v4376_v21, %v4375_v59 }
0x15c9   : > { %v4343_v12 = vmul.f32 %v4342_v49, %v4337_v8 }
0x15ca   : > { %v4378_v15 = vrot.slane %v4377_v1, 1 }
0x15cb   : > { %v4362_v10 = vsub.f32 %v4361_v60, %v4343_v12 }
0x15cc   : > { %v4379_v36 = vadd.f32 %v4378_v15, %v4377_v1 }
0x15cd   : > { %v4363_v51 = vmul.f32 %v4362_v10, %v4362_v10 }
0x15ce   : > { %v4382_v37 = vpop.permute.xlu2 %4381 }
0x15cf   : > { %v4364_v58 = vsel %vm237_vm0, %v4363_v51, 0.0  ;;  %v4384_v31 = vmul.f32 %v4382_v37, %v8052_v0 }
0x15d1   : > { %v4385_v54 = vmul.f32 %v4384_v31, %v4379_v36 }
0x15d8   : > { %4387 = vperm.xlu1 %4734, %v8065_v17  }
0x1602   : > { %4365 = vadd.xlane.f32.xlu1 %v4364_v58 }
0x162b   : > { %v4324_v62 = vpop.xlane.xlu2 %4323 }
0x1632   : > { %v4282_v18 = vpop.xlane.xlu1 %4281 }
0x1633   : > { %v4283_v43 = vadd.f32 %v4282_v18, %v8148_v4 }
0x1635   : > { %v4325_v0 = vadd.f32 %v4324_v62, %v4283_v43 }
0x164a   : > { %v4388_v45 = vpop.permute.xlu1 %4387 }
0x164b   : > { %v4390_v47 = vmul.f32 %v4388_v45, %v8065_v17 }
0x164d   : > { %v4391_v13 = vsel %vm463_vm9, %v4390_v47, 0.0 }
0x164e   : > { %v4392_v55 = vrot.slane %v4391_v13, 4 }
0x1650   : > { %v4393_v30 = vadd.f32 %v4392_v55, %v4391_v13 }
0x1652   : > { %v4394_v57 = vrot.slane %v4393_v30, 2 }
0x1654   : > { %v4395_v4 = vadd.f32 %v4394_v57, %v4393_v30 }
0x1656   : > { %v4396_v61 = vrot.slane %v4395_v4, 1 }
0x1658   : > { %v4397_v17 = vadd.f32 %v4396_v61, %v4395_v4 }
0x165a   : > { %v4403_v35 = vmul.f32 %v4402_v6, %v4397_v17 }
0x165c   : > { %v4404_v19 = vsub.f32 %v4403_v35, %v4385_v54 }
0x165e   : > { %v4405_v42 = vmul.f32 %v4404_v19, %v4404_v19 }
0x1660   : > { %v4406_v41 = vsel %vm237_vm0, %v4405_v42, 0.0 }
0x1661   : > { %4407 = vadd.xlane.f32.xlu0 %v4406_v41 }
0x1675   : > { %v4366_v53 = vpop.xlane.xlu1 %4365 }
0x1676   : > { %v4367_v27 = vadd.f32 %v4366_v53, %v4325_v0 }
0x16d4   : > { %v4408_v63 = vpop.xlane.xlu0 %4407 }
0x16d5   : > { %v4409_v48 = vadd.f32 %v4408_v63, %v4367_v27 }
0x16d7   : > { %4410 = vst [vmem:[%s204_s8] sm:$0x1] %v4409_v48 }
0x16d8   : > { %4833 = shalt.err (!%p4830_p0)
}
0x16d9   : > { %4661 = dma.vmem_to_hbm [thread:$0]  (%p4953_p11), %s4423_s16, 16, %s4425_s17, %s4412_s19  }
0x16da PF: > { %s4436_s23 = sand.u32 1, %s4864_s9   ;;  %p8223_p1 = scmp.ge.s32.totalorder %s4876_s12, 2 }
0x16db   : > { %s4437_s25 = scalar_lea.sflag [#allocation4], %s4436_s23 }
0x16dc   : > { %p4671_p4 = pnand %p8223_p1, %p4957_p12 }
0x16de   : > { %p4672_p7 = pneg %p4671_p4 }
0x16e0   : > { %4859 = dma.done.wait (%p4672_p7), %s4437_s25, 16  }
0x16e1   : > { %4861 = vsyncadd (%p4672_p7), %s4437_s25, 4294967280  ;;  %p18_p5 = scmp.ge.s32.totalorder %s4928_s15, 4   ;;  %s8224_s9 = smov %s4868_s10 }
0x16e2   : > { %s8225_s10 = smov %s4872_s11  ;;  %s8226_s11 = smov %s4940_s18 }
0x16e3   : > { %s8227_s12 = smov %s4928_s15  ;;  %20 = sbr.rel (!%p18_p5) target bundleno = 7 (0x7), region = 88 }
0x16e8   :  { %4442 = vsyncpa [#allocation3], 1 }
0x16e9   :  { %4444 = vsyncpa [#allocation3 + $0x1], 1 }
0x16ea   :  { %4445 = vsyncpa [#allocation6], 1 }
0x16eb   :  { %4447 = vsyncpa [#allocation6 + $0x1], 1 }
0x16ec   :  { %4448 = vsyncpa [#allocation4], 1 }
0x16ed   :  { %4450 = vsyncpa [#allocation4 + $0x1], 1 }

</bundles_post_ra>
